<compile_context>
chip_gen: v7x
topology: tpu7x:2x2x1
jax: 0.10.0
libtpu: 0.0.40
codegen_flags: <defaults>
</compile_context>

<pallas_src>
import jax
import jax.numpy as jnp
from jax.experimental import pallas as pl
from jax.experimental.pallas import tpu as pltpu


def _round_up(x, m):
    return ((x + m - 1) // m) * m


def megrapt_kernel(cnt_ref, a_ref, x_ref,
                   w1_ref, b1_ref, w2_ref, b2_ref, w3_ref, b3_ref,
                   watt_ref, wntn_ref, sel_ref, btn_ref,
                   wfc1t_ref, bfc1t_ref, wfc2t_ref, bfc2_ref,
                   out_ref):
    f32 = jnp.float32
    Bt, G, N, _ = a_ref.shape            # G == 2: the two graphs of each pair
    D = x_ref.shape[3]
    F3 = watt_ref.shape[0]
    KF, K = sel_ref.shape                # K * F3, K

    def sigmoid(z):
        # == jax.nn.sigmoid; written via tanh so no intermediate overflows to inf.
        return 0.5 * (jnp.tanh(0.5 * z) + 1.0)

    a = a_ref[...].astype(f32)           # [Bt, 2, N, N] compact per-graph adjacency
    counts = cnt_ref[...]                # [Bt, 2] valid-node counts

    # In-register node-validity mask (replaces the streamed [Bt, 2N, 1] mask input).
    node_ids = jax.lax.broadcasted_iota(jnp.int32, (N, 1), 0).astype(f32)
    mask = (node_ids < counts[:, :, None, None]).astype(f32)        # [Bt, 2, N, 1]

    # ---- 3x GCNConv: H <- A_hat @ (H W) + b, ReLU between layers (dropout = identity) --
    def gcn_layer(h2d, w_ref, b_ref):
        F = w_ref.shape[1]
        hw = jnp.dot(h2d, w_ref[...], preferred_element_type=f32)    # one tall MXU matmul
        hw = hw.reshape(Bt, G, N, F)
        if N <= 32:
            # contraction width is tiny -> do A@H on the VPU (unrolled MAC over nodes)
            acc = a[:, :, :, 0:1] * hw[:, :, 0:1, :]
            for j in range(1, N):
                acc = acc + a[:, :, :, j:j + 1] * hw[:, :, j:j + 1, :]
        else:
            acc = jnp.einsum('bgij,bgjf->bgif', a, hw, preferred_element_type=f32)
        return acc + b_ref[...]

    x2d = x_ref[...].astype(f32).reshape(Bt * G * N, D)
    h = jnp.maximum(gcn_layer(x2d, w1_ref, b1_ref), 0.0)
    h = jnp.maximum(gcn_layer(h.reshape(Bt * G * N, h.shape[-1]), w2_ref, b2_ref), 0.0)
    h = gcn_layer(h.reshape(Bt * G * N, h.shape[-1]), w3_ref, b3_ref)
    h = h * mask                                                     # zero padded nodes

    # ---- AttentionModule pooling (both graphs of all Bt pairs at once) ------------------
    inv_cnt = pl.reciprocal(counts, approx=False)                    # [Bt, 2]
    mean = jnp.sum(h, axis=2) * inv_cnt[:, :, None]                  # [Bt, 2, F3]
    tg = jnp.tanh(jnp.dot(mean.reshape(Bt * G, F3), watt_ref[...],
                          preferred_element_type=f32)).reshape(Bt, G, F3)
    coefs = sigmoid(jnp.sum(h * tg[:, :, None, :], axis=3, keepdims=True))  # [Bt, 2, N, 1]
    pooled = jnp.sum(coefs * h, axis=2)                              # [Bt, 2, F3]
    e1 = pooled[:, 0, :]
    e2 = pooled[:, 1, :]

    # ---- Neural tensor network: one fused matmul for the bilinear + block terms --------
    ee = jnp.concatenate([e1, e2], axis=1)                           # [Bt, 2*F3]
    lin = jnp.dot(ee, wntn_ref[...], preferred_element_type=f32)     # [Bt, K*F3 + K]
    v = lin[:, :KF]                                                  # e1 @ W_k (all k)
    blk = lin[:, KF:]                                                # V [e1; e2]
    e2_tiled = jnp.concatenate([e2] * (KF // F3), axis=1)            # [Bt, K*F3] in-reg
    scoring = jnp.dot(v * e2_tiled, sel_ref[...],
                      preferred_element_type=f32)                    # [Bt, K] block reduce
    ntn = jnp.maximum(scoring + blk + btn_ref[...], 0.0)             # [Bt, K]

    # ---- FC tail, transposed so the output row is lane-dense over the batch ------------
    ntn_t = ntn.T                                                    # [K, Bt]
    fc1_t = jnp.maximum(jnp.dot(wfc1t_ref[...], ntn_t, preferred_element_type=f32)
                        + bfc1t_ref[...], 0.0)                       # [BN, Bt]
    logit = jnp.dot(wfc2t_ref[...], fc1_t,
                    preferred_element_type=f32) + bfc2_ref[...]      # [1, Bt]
    out_ref[0] = sigmoid(logit)                                      # lane-dense store


def _choose_bt(B, N, D):
    """Per-step pair-tile size from a VMEM-footprint model (bf16 a/x, double buffering)."""
    per_pair = 2 * (N * N + N * D) * 2            # bf16 bytes per pair per pipeline buffer
    cap = max(8, (4 << 20) // max(per_pair, 1))   # keep each data buffer ~<= 4 MiB (v7x-safe)
    cap = min(cap, 512)
    cap = (cap // 128) * 128 if cap >= 128 else max(8, (cap // 8) * 8)
    if B >= 16:
        # nb >= 2 so the "parallel" batch axis can shard across v7x's two TensorCores.
        return min(cap, _round_up((B + 1) // 2, 8))
    return min(cap, _round_up(max(B, 1), 8))


def megrapt_forward(a1, x1, m1, a2, x2, m2, params):
    f32 = jnp.float32
    bf16 = jnp.bfloat16
    (w1, b1, w2, b2, w3, b3, watt, wt, wb1, wb2, btn, wfc1t, bfc1, wfc2t, bfc2) = params
    B, N, D = x1.shape
    F3 = watt.shape[0]
    K = wt.shape[0]

    # ---- compact pair tensors: [B, 2, N, N]/[B, 2, N, D], streamed in bf16 --------------
    a_pair = jnp.stack([a1, a2], axis=1).astype(bf16)                # no zero blocks
    x_pair = jnp.stack([x1, x2], axis=1).astype(bf16)
    counts = jnp.concatenate([jnp.sum(m1, axis=1), jnp.sum(m2, axis=1)],
                             axis=1).astype(f32)                     # [B, 2] valid nodes

    # ---- fold the batch: pick Bt from the VMEM budget, pad B to a multiple of it --------
    Bt = _choose_bt(B, N, D)
    B_pad = _round_up(B, Bt)
    nb = B_pad // Bt
    pad = B_pad - B
    if pad:
        a_pair = jnp.concatenate([a_pair, jnp.zeros((pad,) + a_pair.shape[1:], bf16)], 0)
        x_pair = jnp.concatenate([x_pair, jnp.zeros((pad,) + x_pair.shape[1:], bf16)], 0)
        counts = jnp.concatenate([counts, jnp.full((pad, 2), float(N), f32)], 0)

    # ---- NTN weights fused into one matmul: [e1|e2] @ [[wt2d, wb1], [0, wb2]] ------------
    wt2d = jnp.transpose(wt, (1, 0, 2)).reshape(F3, K * F3)          # wt2d[i,k*F3+j]=wt[k,i,j]
    wntn = jnp.zeros((2 * F3, K * F3 + K), f32)
    wntn = wntn.at[:F3, :K * F3].set(wt2d)
    wntn = wntn.at[:F3, K * F3:].set(wb1)
    wntn = wntn.at[F3:, K * F3:].set(wb2)
    sel = (jnp.arange(K * F3)[:, None] // F3
           == jnp.arange(K)[None, :]).astype(f32)                    # [K*F3, K] block reduce

    # ---- transposed FC tail weights (lane-dense output) ----------------------------------
    wfc1T = wfc1t.T                                                  # [BN, K]
    bfc1T = bfc1.T                                                   # [BN, 1]
    wfc2T = wfc2t.T                                                  # [1, BN]

    kparams = (w1, b1, w2, b2, w3, b3, watt, wntn, sel, btn, wfc1T, bfc1T, wfc2T, bfc2)

    def data_spec(shape):
        nd = len(shape)
        return pl.BlockSpec((Bt,) + tuple(shape[1:]),
                            lambda i, nd=nd: (i,) + (0,) * (nd - 1))

    def full_spec(shape):
        nd = len(shape)
        return pl.BlockSpec(tuple(shape), lambda i, nd=nd: (0,) * nd)

    in_specs = [data_spec(counts.shape), data_spec(a_pair.shape), data_spec(x_pair.shape)]
    in_specs += [full_spec(p.shape) for p in kparams]

    # VMEM budget: double-buffered bf16 data blocks + weights + f32 in-kernel temporaries;
    # raised above the scoped defaults (16 MiB v5e / 32 MiB v6e,v7x), kept under v7x's 64.
    fmax = max(D, w1.shape[1], w2.shape[1], w3.shape[1])
    data_bytes = Bt * 2 * (N * N + N * D) * 2
    weight_bytes = sum(int(p.size) * p.dtype.itemsize for p in kparams)
    temp_bytes = Bt * 2 * N * fmax * 4 * 8 + Bt * 2 * N * N * 4
    vmem_limit = int(min(max(2 * (data_bytes + weight_bytes) + temp_bytes + (8 << 20),
                             32 << 20), 48 << 20))

    out = pl.pallas_call(
        megrapt_kernel,
        out_shape=jax.ShapeDtypeStruct((nb, 1, Bt), f32),
        grid_spec=pltpu.PrefetchScalarGridSpec(
            num_scalar_prefetch=0,
            grid=(nb,),
            in_specs=in_specs,
            out_specs=pl.BlockSpec((1, 1, Bt), lambda i: (i, 0, 0)),
        ),
        compiler_params=pltpu.CompilerParams(
            dimension_semantics=("parallel",),
            vmem_limit_bytes=vmem_limit,
        ),
    )(counts, a_pair, x_pair, *kparams)
    return out.reshape(-1)[:B]


def reference_forward(a1, x1, m1, a2, x2, m2, params):
    (w1, b1, w2, b2, w3, b3, watt, wt, wb1t, wb2t, btn, wfc1t, bfc1, wfc2t, bfc2) = params

    def embed(a, x, m):
        h = a @ (x @ w1) + b1
        h = jnp.maximum(h, 0.0)
        h = a @ (h @ w2) + b2
        h = jnp.maximum(h, 0.0)
        h = a @ (h @ w3) + b3
        return h * m

    def pool(h, m):
        mean = (h * m).sum(0, keepdims=True) / m.sum()
        tg = jnp.tanh(mean @ watt)
        coefs = jax.nn.sigmoid((h * tg).sum(1, keepdims=True))
        return (coefs * h * m).sum(0, keepdims=True)

    B = a1.shape[0]
    K = wt.shape[0]
    outs = []
    for b in range(B):
        h1 = embed(a1[b], x1[b], m1[b])
        h2 = embed(a2[b], x2[b], m2[b])
        e1 = pool(h1, m1[b])
        e2 = pool(h2, m2[b])
        scoring = jnp.stack([(e1 @ wt[k] * e2).sum() for k in range(K)])[None, :]
        block = e1 @ wb1t + e2 @ wb2t
        ntn = jnp.maximum(scoring + block + btn, 0.0)
        fc1 = jnp.maximum(ntn @ wfc1t + bfc1, 0.0)
        logit = fc1 @ wfc2t + bfc2
        outs.append(jax.nn.sigmoid(logit)[0, 0])
    return jnp.stack(outs)


if __name__ == "__main__":
    f32 = jnp.float32
    key = jax.random.PRNGKey(0)
    keys = jax.random.split(key, 32)

    # Small shapes consistent with the module's forward
    B, N, D = 2, 8, 16          # graph pairs, max nodes per graph, node-label dim
    F1, F2, F3 = 32, 32, 16     # filters_1/2/3
    K, BN = 16, 16              # tensor_neurons, bottle_neck_neurons

    def norm_adj(k, B, N, n_valid):
        # random symmetric graph on the first n_valid nodes -> GCN-normalized adjacency
        A = (jax.random.uniform(k, (B, N, N)) < 0.4).astype(f32)
        A = jnp.maximum(A, jnp.transpose(A, (0, 2, 1)))
        eye = jnp.eye(N, dtype=f32)[None]
        A = A * (1.0 - eye) + eye
        valid = (jnp.arange(N)[None, :] < n_valid[:, None]).astype(f32)   # [B, N]
        A = A * valid[:, :, None] * valid[:, None, :]
        deg = jnp.maximum(A.sum(-1), 1.0)
        dinv = 1.0 / jnp.sqrt(deg)
        return dinv[:, :, None] * A * dinv[:, None, :], valid[:, :, None]

    def bf16_round(x):
        # kernel streams a/x in bf16; round the reference's inputs identically
        return x.astype(jnp.bfloat16).astype(f32)

    n1 = jnp.array([6, 8], dtype=jnp.int32)
    n2 = jnp.array([8, 5], dtype=jnp.int32)
    a1_raw, m1 = norm_adj(keys[0], B, N, n1)
    a2_raw, m2 = norm_adj(keys[1], B, N, n2)
    a1 = bf16_round(a1_raw)
    a2 = bf16_round(a2_raw)
    x1 = bf16_round(jax.random.normal(keys[2], (B, N, D), f32))
    x2 = bf16_round(jax.random.normal(keys[3], (B, N, D), f32))

    def init(k, shape, scale=0.2):
        return (scale * jax.random.normal(k, shape)).astype(f32)

    # Deterministic synthetic parameters (shapes per module __init__; transposed-for-rowvec)
    params = (
        init(keys[4], (D, F1)),  init(keys[5], (1, F1)),    # GCNConv 1
        init(keys[6], (F1, F2)), init(keys[7], (1, F2)),    # GCNConv 2
        init(keys[8], (F2, F3)), init(keys[9], (1, F3)),    # GCNConv 3
        init(keys[10], (F3, F3)),                           # attention weight_matrix
        init(keys[11], (K, F3, F3)),                        # NTN bilinear (W[k,i,j] = W_pt[i,j,k])
        init(keys[12], (F3, K)), init(keys[13], (F3, K)),   # NTN block weight halves (transposed)
        init(keys[14], (1, K)),                             # NTN bias
        init(keys[15], (K, BN)), init(keys[16], (1, BN)),   # fully_connected_first (W^T, b)
        init(keys[17], (BN, 1)), init(keys[18], (1, 1)),    # scoring_layer (W^T, b)
    )

    out = jax.block_until_ready(megrapt_forward(a1, x1, m1, a2, x2, m2, params))
    ref = reference_forward(a1, x1, m1, a2, x2, m2, params)

    assert out.shape == (B,)
    assert jnp.allclose(out, ref, rtol=1e-3, atol=1e-5), (out, ref)
    print("KERNEL_OK")
</pallas_src>

<mosaic_0001>
module attributes {stable_mosaic.version = 11 : i64} {
  func.func @megrapt_kernel(%arg0: i32, %arg1: memref<8x2xf32, #tpu.memory_space<vmem>>, %arg2: memref<8x2x8x8xbf16, #tpu.memory_space<vmem>>, %arg3: memref<8x2x8x16xbf16, #tpu.memory_space<vmem>>, %arg4: memref<16x32xf32, #tpu.memory_space<vmem>>, %arg5: memref<1x32xf32, #tpu.memory_space<vmem>>, %arg6: memref<32x32xf32, #tpu.memory_space<vmem>>, %arg7: memref<1x32xf32, #tpu.memory_space<vmem>>, %arg8: memref<32x16xf32, #tpu.memory_space<vmem>>, %arg9: memref<1x16xf32, #tpu.memory_space<vmem>>, %arg10: memref<16x16xf32, #tpu.memory_space<vmem>>, %arg11: memref<32x272xf32, #tpu.memory_space<vmem>>, %arg12: memref<256x16xf32, #tpu.memory_space<vmem>>, %arg13: memref<1x16xf32, #tpu.memory_space<vmem>>, %arg14: memref<16x16xf32, #tpu.memory_space<vmem>>, %arg15: memref<16x1xf32, #tpu.memory_space<vmem>>, %arg16: memref<1x16xf32, #tpu.memory_space<vmem>>, %arg17: memref<1x1xf32, #tpu.memory_space<vmem>>, %arg18: memref<1x1x8xf32, #tpu.memory_space<vmem>>) attributes {dimension_semantics = [#tpu.dimension_semantics<parallel>], iteration_bounds = array<i64: 1>, scalar_prefetch = 0 : i64, scratch_operands = 0 : i64, tpu.core_type = #tpu.core_type<tc>, window_params = [{transform_indices = @transform_0, window_bounds = array<i64: 8, 2>}, {transform_indices = @transform_1, window_bounds = array<i64: 8, 2, 8, 8>}, {transform_indices = @transform_2, window_bounds = array<i64: 8, 2, 8, 16>}, {pipeline_mode = #tpu.pipeline_mode<synchronous>, transform_indices = @transform_3, window_bounds = array<i64: 16, 32>}, {pipeline_mode = #tpu.pipeline_mode<synchronous>, transform_indices = @transform_4, window_bounds = array<i64: 1, 32>}, {pipeline_mode = #tpu.pipeline_mode<synchronous>, transform_indices = @transform_5, window_bounds = array<i64: 32, 32>}, {pipeline_mode = #tpu.pipeline_mode<synchronous>, transform_indices = @transform_6, window_bounds = array<i64: 1, 32>}, {pipeline_mode = #tpu.pipeline_mode<synchronous>, transform_indices = @transform_7, window_bounds = array<i64: 32, 16>}, {pipeline_mode = #tpu.pipeline_mode<synchronous>, transform_indices = @transform_8, window_bounds = array<i64: 1, 16>}, {pipeline_mode = #tpu.pipeline_mode<synchronous>, transform_indices = @transform_9, window_bounds = array<i64: 16, 16>}, {pipeline_mode = #tpu.pipeline_mode<synchronous>, transform_indices = @transform_10, window_bounds = array<i64: 32, 272>}, {pipeline_mode = #tpu.pipeline_mode<synchronous>, transform_indices = @transform_11, window_bounds = array<i64: 256, 16>}, {pipeline_mode = #tpu.pipeline_mode<synchronous>, transform_indices = @transform_12, window_bounds = array<i64: 1, 16>}, {pipeline_mode = #tpu.pipeline_mode<synchronous>, transform_indices = @transform_13, window_bounds = array<i64: 16, 16>}, {pipeline_mode = #tpu.pipeline_mode<synchronous>, transform_indices = @transform_14, window_bounds = array<i64: 16, 1>}, {pipeline_mode = #tpu.pipeline_mode<synchronous>, transform_indices = @transform_15, window_bounds = array<i64: 1, 16>}, {pipeline_mode = #tpu.pipeline_mode<synchronous>, transform_indices = @transform_16, window_bounds = array<i64: 1, 1>}, {transform_indices = @transform_17, window_bounds = array<i64: 1, 1, 8>}]} {
    %c0 = arith.constant 0 : index
    %c0_0 = arith.constant 0 : index
    %c0_1 = arith.constant 0 : index
    %c0_2 = arith.constant 0 : index
    %0 = vector.load %arg2[%c0, %c0_0, %c0_1, %c0_2] : memref<8x2x8x8xbf16, #tpu.memory_space<vmem>>, vector<8x2x8x8xbf16>
    %1 = arith.extf %0 : vector<8x2x8x8xbf16> to vector<8x2x8x8xf32>
    %c0_3 = arith.constant 0 : index
    %c0_4 = arith.constant 0 : index
    %2 = vector.load %arg1[%c0_3, %c0_4] : memref<8x2xf32, #tpu.memory_space<vmem>>, vector<8x2xf32>
    %3 = tpu.iota {dimensions = array<i32: 0>} : vector<8x1xi32>
    %4 = arith.sitofp %3 : vector<8x1xi32> to vector<8x1xf32>
    %5 = vector.shape_cast %2 : vector<8x2xf32> to vector<8x2x1x1xf32>
    %6 = vector.shape_cast %4 : vector<8x1xf32> to vector<1x1x8x1xf32>
    %7 = vector.broadcast %6 : vector<1x1x8x1xf32> to vector<8x2x8x1xf32>
    %8 = vector.broadcast %5 : vector<8x2x1x1xf32> to vector<8x2x8x1xf32>
    %9 = arith.cmpf olt, %7, %8 : vector<8x2x8x1xf32>
    %10 = arith.extui %9 : vector<8x2x8x1xi1> to vector<8x2x8x1xi32>
    %11 = arith.sitofp %10 : vector<8x2x8x1xi32> to vector<8x2x8x1xf32>
    %c0_5 = arith.constant 0 : index
    %c0_6 = arith.constant 0 : index
    %c0_7 = arith.constant 0 : index
    %c0_8 = arith.constant 0 : index
    %12 = vector.load %arg3[%c0_5, %c0_6, %c0_7, %c0_8] : memref<8x2x8x16xbf16, #tpu.memory_space<vmem>>, vector<8x2x8x16xbf16>
    %13 = arith.extf %12 : vector<8x2x8x16xbf16> to vector<8x2x8x16xf32>
    %14 = vector.shape_cast %13 : vector<8x2x8x16xf32> to vector<128x16xf32>
    %c0_9 = arith.constant 0 : index
    %c0_10 = arith.constant 0 : index
    %15 = vector.load %arg4[%c0_9, %c0_10] : memref<16x32xf32, #tpu.memory_space<vmem>>, vector<16x32xf32>
    %cst = arith.constant dense<0.000000e+00> : vector<128x32xf32>
    %16 = tpu.matmul %14, %15, %cst {dimension_numbers = #tpu.dot_dimension_numbers<[1], [0], [0], [1], [0, 0, 1, 1], [], []>} : vector<128x16xf32>, vector<16x32xf32>, vector<128x32xf32> -> vector<128x32xf32>
    %17 = vector.shape_cast %16 : vector<128x32xf32> to vector<8x2x8x32xf32>
    %18 = vector.extract_strided_slice %1 {offsets = [0, 0, 0, 0], sizes = [8, 2, 8, 1], strides = [1, 1, 1, 1]} : vector<8x2x8x8xf32> to vector<8x2x8x1xf32>
    %19 = vector.extract_strided_slice %17 {offsets = [0, 0, 0, 0], sizes = [8, 2, 1, 32], strides = [1, 1, 1, 1]} : vector<8x2x8x32xf32> to vector<8x2x1x32xf32>
    %20 = vector.broadcast %18 : vector<8x2x8x1xf32> to vector<8x2x8x32xf32>
    %21 = vector.broadcast %19 : vector<8x2x1x32xf32> to vector<8x2x8x32xf32>
    %22 = arith.mulf %20, %21 : vector<8x2x8x32xf32>
    %23 = vector.extract_strided_slice %1 {offsets = [0, 0, 0, 1], sizes = [8, 2, 8, 1], strides = [1, 1, 1, 1]} : vector<8x2x8x8xf32> to vector<8x2x8x1xf32>
    %24 = vector.extract_strided_slice %17 {offsets = [0, 0, 1, 0], sizes = [8, 2, 1, 32], strides = [1, 1, 1, 1]} : vector<8x2x8x32xf32> to vector<8x2x1x32xf32>
    %25 = vector.broadcast %23 : vector<8x2x8x1xf32> to vector<8x2x8x32xf32>
    %26 = vector.broadcast %24 : vector<8x2x1x32xf32> to vector<8x2x8x32xf32>
    %27 = arith.mulf %25, %26 : vector<8x2x8x32xf32>
    %28 = arith.addf %22, %27 : vector<8x2x8x32xf32>
    %29 = vector.extract_strided_slice %1 {offsets = [0, 0, 0, 2], sizes = [8, 2, 8, 1], strides = [1, 1, 1, 1]} : vector<8x2x8x8xf32> to vector<8x2x8x1xf32>
    %30 = vector.extract_strided_slice %17 {offsets = [0, 0, 2, 0], sizes = [8, 2, 1, 32], strides = [1, 1, 1, 1]} : vector<8x2x8x32xf32> to vector<8x2x1x32xf32>
    %31 = vector.broadcast %29 : vector<8x2x8x1xf32> to vector<8x2x8x32xf32>
    %32 = vector.broadcast %30 : vector<8x2x1x32xf32> to vector<8x2x8x32xf32>
    %33 = arith.mulf %31, %32 : vector<8x2x8x32xf32>
    %34 = arith.addf %28, %33 : vector<8x2x8x32xf32>
    %35 = vector.extract_strided_slice %1 {offsets = [0, 0, 0, 3], sizes = [8, 2, 8, 1], strides = [1, 1, 1, 1]} : vector<8x2x8x8xf32> to vector<8x2x8x1xf32>
    %36 = vector.extract_strided_slice %17 {offsets = [0, 0, 3, 0], sizes = [8, 2, 1, 32], strides = [1, 1, 1, 1]} : vector<8x2x8x32xf32> to vector<8x2x1x32xf32>
    %37 = vector.broadcast %35 : vector<8x2x8x1xf32> to vector<8x2x8x32xf32>
    %38 = vector.broadcast %36 : vector<8x2x1x32xf32> to vector<8x2x8x32xf32>
    %39 = arith.mulf %37, %38 : vector<8x2x8x32xf32>
    %40 = arith.addf %34, %39 : vector<8x2x8x32xf32>
    %41 = vector.extract_strided_slice %1 {offsets = [0, 0, 0, 4], sizes = [8, 2, 8, 1], strides = [1, 1, 1, 1]} : vector<8x2x8x8xf32> to vector<8x2x8x1xf32>
    %42 = vector.extract_strided_slice %17 {offsets = [0, 0, 4, 0], sizes = [8, 2, 1, 32], strides = [1, 1, 1, 1]} : vector<8x2x8x32xf32> to vector<8x2x1x32xf32>
    %43 = vector.broadcast %41 : vector<8x2x8x1xf32> to vector<8x2x8x32xf32>
    %44 = vector.broadcast %42 : vector<8x2x1x32xf32> to vector<8x2x8x32xf32>
    %45 = arith.mulf %43, %44 : vector<8x2x8x32xf32>
    %46 = arith.addf %40, %45 : vector<8x2x8x32xf32>
    %47 = vector.extract_strided_slice %1 {offsets = [0, 0, 0, 5], sizes = [8, 2, 8, 1], strides = [1, 1, 1, 1]} : vector<8x2x8x8xf32> to vector<8x2x8x1xf32>
    %48 = vector.extract_strided_slice %17 {offsets = [0, 0, 5, 0], sizes = [8, 2, 1, 32], strides = [1, 1, 1, 1]} : vector<8x2x8x32xf32> to vector<8x2x1x32xf32>
    %49 = vector.broadcast %47 : vector<8x2x8x1xf32> to vector<8x2x8x32xf32>
    %50 = vector.broadcast %48 : vector<8x2x1x32xf32> to vector<8x2x8x32xf32>
    %51 = arith.mulf %49, %50 : vector<8x2x8x32xf32>
    %52 = arith.addf %46, %51 : vector<8x2x8x32xf32>
    %53 = vector.extract_strided_slice %1 {offsets = [0, 0, 0, 6], sizes = [8, 2, 8, 1], strides = [1, 1, 1, 1]} : vector<8x2x8x8xf32> to vector<8x2x8x1xf32>
    %54 = vector.extract_strided_slice %17 {offsets = [0, 0, 6, 0], sizes = [8, 2, 1, 32], strides = [1, 1, 1, 1]} : vector<8x2x8x32xf32> to vector<8x2x1x32xf32>
    %55 = vector.broadcast %53 : vector<8x2x8x1xf32> to vector<8x2x8x32xf32>
    %56 = vector.broadcast %54 : vector<8x2x1x32xf32> to vector<8x2x8x32xf32>
    %57 = arith.mulf %55, %56 : vector<8x2x8x32xf32>
    %58 = arith.addf %52, %57 : vector<8x2x8x32xf32>
    %59 = vector.extract_strided_slice %1 {offsets = [0, 0, 0, 7], sizes = [8, 2, 8, 1], strides = [1, 1, 1, 1]} : vector<8x2x8x8xf32> to vector<8x2x8x1xf32>
    %60 = vector.extract_strided_slice %17 {offsets = [0, 0, 7, 0], sizes = [8, 2, 1, 32], strides = [1, 1, 1, 1]} : vector<8x2x8x32xf32> to vector<8x2x1x32xf32>
    %61 = vector.broadcast %59 : vector<8x2x8x1xf32> to vector<8x2x8x32xf32>
    %62 = vector.broadcast %60 : vector<8x2x1x32xf32> to vector<8x2x8x32xf32>
    %63 = arith.mulf %61, %62 : vector<8x2x8x32xf32>
    %64 = arith.addf %58, %63 : vector<8x2x8x32xf32>
    %c0_11 = arith.constant 0 : index
    %c0_12 = arith.constant 0 : index
    %65 = vector.load %arg5[%c0_11, %c0_12] : memref<1x32xf32, #tpu.memory_space<vmem>>, vector<1x32xf32>
    %66 = vector.shape_cast %65 : vector<1x32xf32> to vector<1x1x1x32xf32>
    %67 = vector.broadcast %66 : vector<1x1x1x32xf32> to vector<8x2x8x32xf32>
    %68 = arith.addf %64, %67 : vector<8x2x8x32xf32>
    %cst_13 = arith.constant 0.000000e+00 : f32
    %69 = vector.broadcast %cst_13 : f32 to vector<8x2x8x32xf32>
    %70 = arith.maximumf %68, %69 : vector<8x2x8x32xf32>
    %71 = vector.shape_cast %70 : vector<8x2x8x32xf32> to vector<128x32xf32>
    %c0_14 = arith.constant 0 : index
    %c0_15 = arith.constant 0 : index
    %72 = vector.load %arg6[%c0_14, %c0_15] : memref<32x32xf32, #tpu.memory_space<vmem>>, vector<32x32xf32>
    %cst_16 = arith.constant dense<0.000000e+00> : vector<128x32xf32>
    %73 = tpu.matmul %71, %72, %cst_16 {dimension_numbers = #tpu.dot_dimension_numbers<[1], [0], [0], [1], [0, 0, 1, 1], [], []>} : vector<128x32xf32>, vector<32x32xf32>, vector<128x32xf32> -> vector<128x32xf32>
    %74 = vector.shape_cast %73 : vector<128x32xf32> to vector<8x2x8x32xf32>
    %75 = vector.extract_strided_slice %1 {offsets = [0, 0, 0, 0], sizes = [8, 2, 8, 1], strides = [1, 1, 1, 1]} : vector<8x2x8x8xf32> to vector<8x2x8x1xf32>
    %76 = vector.extract_strided_slice %74 {offsets = [0, 0, 0, 0], sizes = [8, 2, 1, 32], strides = [1, 1, 1, 1]} : vector<8x2x8x32xf32> to vector<8x2x1x32xf32>
    %77 = vector.broadcast %75 : vector<8x2x8x1xf32> to vector<8x2x8x32xf32>
    %78 = vector.broadcast %76 : vector<8x2x1x32xf32> to vector<8x2x8x32xf32>
    %79 = arith.mulf %77, %78 : vector<8x2x8x32xf32>
    %80 = vector.extract_strided_slice %1 {offsets = [0, 0, 0, 1], sizes = [8, 2, 8, 1], strides = [1, 1, 1, 1]} : vector<8x2x8x8xf32> to vector<8x2x8x1xf32>
    %81 = vector.extract_strided_slice %74 {offsets = [0, 0, 1, 0], sizes = [8, 2, 1, 32], strides = [1, 1, 1, 1]} : vector<8x2x8x32xf32> to vector<8x2x1x32xf32>
    %82 = vector.broadcast %80 : vector<8x2x8x1xf32> to vector<8x2x8x32xf32>
    %83 = vector.broadcast %81 : vector<8x2x1x32xf32> to vector<8x2x8x32xf32>
    %84 = arith.mulf %82, %83 : vector<8x2x8x32xf32>
    %85 = arith.addf %79, %84 : vector<8x2x8x32xf32>
    %86 = vector.extract_strided_slice %1 {offsets = [0, 0, 0, 2], sizes = [8, 2, 8, 1], strides = [1, 1, 1, 1]} : vector<8x2x8x8xf32> to vector<8x2x8x1xf32>
    %87 = vector.extract_strided_slice %74 {offsets = [0, 0, 2, 0], sizes = [8, 2, 1, 32], strides = [1, 1, 1, 1]} : vector<8x2x8x32xf32> to vector<8x2x1x32xf32>
    %88 = vector.broadcast %86 : vector<8x2x8x1xf32> to vector<8x2x8x32xf32>
    %89 = vector.broadcast %87 : vector<8x2x1x32xf32> to vector<8x2x8x32xf32>
    %90 = arith.mulf %88, %89 : vector<8x2x8x32xf32>
    %91 = arith.addf %85, %90 : vector<8x2x8x32xf32>
    %92 = vector.extract_strided_slice %1 {offsets = [0, 0, 0, 3], sizes = [8, 2, 8, 1], strides = [1, 1, 1, 1]} : vector<8x2x8x8xf32> to vector<8x2x8x1xf32>
    %93 = vector.extract_strided_slice %74 {offsets = [0, 0, 3, 0], sizes = [8, 2, 1, 32], strides = [1, 1, 1, 1]} : vector<8x2x8x32xf32> to vector<8x2x1x32xf32>
    %94 = vector.broadcast %92 : vector<8x2x8x1xf32> to vector<8x2x8x32xf32>
    %95 = vector.broadcast %93 : vector<8x2x1x32xf32> to vector<8x2x8x32xf32>
    %96 = arith.mulf %94, %95 : vector<8x2x8x32xf32>
    %97 = arith.addf %91, %96 : vector<8x2x8x32xf32>
    %98 = vector.extract_strided_slice %1 {offsets = [0, 0, 0, 4], sizes = [8, 2, 8, 1], strides = [1, 1, 1, 1]} : vector<8x2x8x8xf32> to vector<8x2x8x1xf32>
    %99 = vector.extract_strided_slice %74 {offsets = [0, 0, 4, 0], sizes = [8, 2, 1, 32], strides = [1, 1, 1, 1]} : vector<8x2x8x32xf32> to vector<8x2x1x32xf32>
    %100 = vector.broadcast %98 : vector<8x2x8x1xf32> to vector<8x2x8x32xf32>
    %101 = vector.broadcast %99 : vector<8x2x1x32xf32> to vector<8x2x8x32xf32>
    %102 = arith.mulf %100, %101 : vector<8x2x8x32xf32>
    %103 = arith.addf %97, %102 : vector<8x2x8x32xf32>
    %104 = vector.extract_strided_slice %1 {offsets = [0, 0, 0, 5], sizes = [8, 2, 8, 1], strides = [1, 1, 1, 1]} : vector<8x2x8x8xf32> to vector<8x2x8x1xf32>
    %105 = vector.extract_strided_slice %74 {offsets = [0, 0, 5, 0], sizes = [8, 2, 1, 32], strides = [1, 1, 1, 1]} : vector<8x2x8x32xf32> to vector<8x2x1x32xf32>
    %106 = vector.broadcast %104 : vector<8x2x8x1xf32> to vector<8x2x8x32xf32>
    %107 = vector.broadcast %105 : vector<8x2x1x32xf32> to vector<8x2x8x32xf32>
    %108 = arith.mulf %106, %107 : vector<8x2x8x32xf32>
    %109 = arith.addf %103, %108 : vector<8x2x8x32xf32>
    %110 = vector.extract_strided_slice %1 {offsets = [0, 0, 0, 6], sizes = [8, 2, 8, 1], strides = [1, 1, 1, 1]} : vector<8x2x8x8xf32> to vector<8x2x8x1xf32>
    %111 = vector.extract_strided_slice %74 {offsets = [0, 0, 6, 0], sizes = [8, 2, 1, 32], strides = [1, 1, 1, 1]} : vector<8x2x8x32xf32> to vector<8x2x1x32xf32>
    %112 = vector.broadcast %110 : vector<8x2x8x1xf32> to vector<8x2x8x32xf32>
    %113 = vector.broadcast %111 : vector<8x2x1x32xf32> to vector<8x2x8x32xf32>
    %114 = arith.mulf %112, %113 : vector<8x2x8x32xf32>
    %115 = arith.addf %109, %114 : vector<8x2x8x32xf32>
    %116 = vector.extract_strided_slice %1 {offsets = [0, 0, 0, 7], sizes = [8, 2, 8, 1], strides = [1, 1, 1, 1]} : vector<8x2x8x8xf32> to vector<8x2x8x1xf32>
    %117 = vector.extract_strided_slice %74 {offsets = [0, 0, 7, 0], sizes = [8, 2, 1, 32], strides = [1, 1, 1, 1]} : vector<8x2x8x32xf32> to vector<8x2x1x32xf32>
    %118 = vector.broadcast %116 : vector<8x2x8x1xf32> to vector<8x2x8x32xf32>
    %119 = vector.broadcast %117 : vector<8x2x1x32xf32> to vector<8x2x8x32xf32>
    %120 = arith.mulf %118, %119 : vector<8x2x8x32xf32>
    %121 = arith.addf %115, %120 : vector<8x2x8x32xf32>
    %c0_17 = arith.constant 0 : index
    %c0_18 = arith.constant 0 : index
    %122 = vector.load %arg7[%c0_17, %c0_18] : memref<1x32xf32, #tpu.memory_space<vmem>>, vector<1x32xf32>
    %123 = vector.shape_cast %122 : vector<1x32xf32> to vector<1x1x1x32xf32>
    %124 = vector.broadcast %123 : vector<1x1x1x32xf32> to vector<8x2x8x32xf32>
    %125 = arith.addf %121, %124 : vector<8x2x8x32xf32>
    %cst_19 = arith.constant 0.000000e+00 : f32
    %126 = vector.broadcast %cst_19 : f32 to vector<8x2x8x32xf32>
    %127 = arith.maximumf %125, %126 : vector<8x2x8x32xf32>
    %128 = vector.shape_cast %127 : vector<8x2x8x32xf32> to vector<128x32xf32>
    %c0_20 = arith.constant 0 : index
    %c0_21 = arith.constant 0 : index
    %129 = vector.load %arg8[%c0_20, %c0_21] : memref<32x16xf32, #tpu.memory_space<vmem>>, vector<32x16xf32>
    %cst_22 = arith.constant dense<0.000000e+00> : vector<128x16xf32>
    %130 = tpu.matmul %128, %129, %cst_22 {dimension_numbers = #tpu.dot_dimension_numbers<[1], [0], [0], [1], [0, 0, 1, 1], [], []>} : vector<128x32xf32>, vector<32x16xf32>, vector<128x16xf32> -> vector<128x16xf32>
    %131 = vector.shape_cast %130 : vector<128x16xf32> to vector<8x2x8x16xf32>
    %132 = vector.extract_strided_slice %1 {offsets = [0, 0, 0, 0], sizes = [8, 2, 8, 1], strides = [1, 1, 1, 1]} : vector<8x2x8x8xf32> to vector<8x2x8x1xf32>
    %133 = vector.extract_strided_slice %131 {offsets = [0, 0, 0, 0], sizes = [8, 2, 1, 16], strides = [1, 1, 1, 1]} : vector<8x2x8x16xf32> to vector<8x2x1x16xf32>
    %134 = vector.broadcast %132 : vector<8x2x8x1xf32> to vector<8x2x8x16xf32>
    %135 = vector.broadcast %133 : vector<8x2x1x16xf32> to vector<8x2x8x16xf32>
    %136 = arith.mulf %134, %135 : vector<8x2x8x16xf32>
    %137 = vector.extract_strided_slice %1 {offsets = [0, 0, 0, 1], sizes = [8, 2, 8, 1], strides = [1, 1, 1, 1]} : vector<8x2x8x8xf32> to vector<8x2x8x1xf32>
    %138 = vector.extract_strided_slice %131 {offsets = [0, 0, 1, 0], sizes = [8, 2, 1, 16], strides = [1, 1, 1, 1]} : vector<8x2x8x16xf32> to vector<8x2x1x16xf32>
    %139 = vector.broadcast %137 : vector<8x2x8x1xf32> to vector<8x2x8x16xf32>
    %140 = vector.broadcast %138 : vector<8x2x1x16xf32> to vector<8x2x8x16xf32>
    %141 = arith.mulf %139, %140 : vector<8x2x8x16xf32>
    %142 = arith.addf %136, %141 : vector<8x2x8x16xf32>
    %143 = vector.extract_strided_slice %1 {offsets = [0, 0, 0, 2], sizes = [8, 2, 8, 1], strides = [1, 1, 1, 1]} : vector<8x2x8x8xf32> to vector<8x2x8x1xf32>
    %144 = vector.extract_strided_slice %131 {offsets = [0, 0, 2, 0], sizes = [8, 2, 1, 16], strides = [1, 1, 1, 1]} : vector<8x2x8x16xf32> to vector<8x2x1x16xf32>
    %145 = vector.broadcast %143 : vector<8x2x8x1xf32> to vector<8x2x8x16xf32>
    %146 = vector.broadcast %144 : vector<8x2x1x16xf32> to vector<8x2x8x16xf32>
    %147 = arith.mulf %145, %146 : vector<8x2x8x16xf32>
    %148 = arith.addf %142, %147 : vector<8x2x8x16xf32>
    %149 = vector.extract_strided_slice %1 {offsets = [0, 0, 0, 3], sizes = [8, 2, 8, 1], strides = [1, 1, 1, 1]} : vector<8x2x8x8xf32> to vector<8x2x8x1xf32>
    %150 = vector.extract_strided_slice %131 {offsets = [0, 0, 3, 0], sizes = [8, 2, 1, 16], strides = [1, 1, 1, 1]} : vector<8x2x8x16xf32> to vector<8x2x1x16xf32>
    %151 = vector.broadcast %149 : vector<8x2x8x1xf32> to vector<8x2x8x16xf32>
    %152 = vector.broadcast %150 : vector<8x2x1x16xf32> to vector<8x2x8x16xf32>
    %153 = arith.mulf %151, %152 : vector<8x2x8x16xf32>
    %154 = arith.addf %148, %153 : vector<8x2x8x16xf32>
    %155 = vector.extract_strided_slice %1 {offsets = [0, 0, 0, 4], sizes = [8, 2, 8, 1], strides = [1, 1, 1, 1]} : vector<8x2x8x8xf32> to vector<8x2x8x1xf32>
    %156 = vector.extract_strided_slice %131 {offsets = [0, 0, 4, 0], sizes = [8, 2, 1, 16], strides = [1, 1, 1, 1]} : vector<8x2x8x16xf32> to vector<8x2x1x16xf32>
    %157 = vector.broadcast %155 : vector<8x2x8x1xf32> to vector<8x2x8x16xf32>
    %158 = vector.broadcast %156 : vector<8x2x1x16xf32> to vector<8x2x8x16xf32>
    %159 = arith.mulf %157, %158 : vector<8x2x8x16xf32>
    %160 = arith.addf %154, %159 : vector<8x2x8x16xf32>
    %161 = vector.extract_strided_slice %1 {offsets = [0, 0, 0, 5], sizes = [8, 2, 8, 1], strides = [1, 1, 1, 1]} : vector<8x2x8x8xf32> to vector<8x2x8x1xf32>
    %162 = vector.extract_strided_slice %131 {offsets = [0, 0, 5, 0], sizes = [8, 2, 1, 16], strides = [1, 1, 1, 1]} : vector<8x2x8x16xf32> to vector<8x2x1x16xf32>
    %163 = vector.broadcast %161 : vector<8x2x8x1xf32> to vector<8x2x8x16xf32>
    %164 = vector.broadcast %162 : vector<8x2x1x16xf32> to vector<8x2x8x16xf32>
    %165 = arith.mulf %163, %164 : vector<8x2x8x16xf32>
    %166 = arith.addf %160, %165 : vector<8x2x8x16xf32>
    %167 = vector.extract_strided_slice %1 {offsets = [0, 0, 0, 6], sizes = [8, 2, 8, 1], strides = [1, 1, 1, 1]} : vector<8x2x8x8xf32> to vector<8x2x8x1xf32>
    %168 = vector.extract_strided_slice %131 {offsets = [0, 0, 6, 0], sizes = [8, 2, 1, 16], strides = [1, 1, 1, 1]} : vector<8x2x8x16xf32> to vector<8x2x1x16xf32>
    %169 = vector.broadcast %167 : vector<8x2x8x1xf32> to vector<8x2x8x16xf32>
    %170 = vector.broadcast %168 : vector<8x2x1x16xf32> to vector<8x2x8x16xf32>
    %171 = arith.mulf %169, %170 : vector<8x2x8x16xf32>
    %172 = arith.addf %166, %171 : vector<8x2x8x16xf32>
    %173 = vector.extract_strided_slice %1 {offsets = [0, 0, 0, 7], sizes = [8, 2, 8, 1], strides = [1, 1, 1, 1]} : vector<8x2x8x8xf32> to vector<8x2x8x1xf32>
    %174 = vector.extract_strided_slice %131 {offsets = [0, 0, 7, 0], sizes = [8, 2, 1, 16], strides = [1, 1, 1, 1]} : vector<8x2x8x16xf32> to vector<8x2x1x16xf32>
    %175 = vector.broadcast %173 : vector<8x2x8x1xf32> to vector<8x2x8x16xf32>
    %176 = vector.broadcast %174 : vector<8x2x1x16xf32> to vector<8x2x8x16xf32>
    %177 = arith.mulf %175, %176 : vector<8x2x8x16xf32>
    %178 = arith.addf %172, %177 : vector<8x2x8x16xf32>
    %c0_23 = arith.constant 0 : index
    %c0_24 = arith.constant 0 : index
    %179 = vector.load %arg9[%c0_23, %c0_24] : memref<1x16xf32, #tpu.memory_space<vmem>>, vector<1x16xf32>
    %180 = vector.shape_cast %179 : vector<1x16xf32> to vector<1x1x1x16xf32>
    %181 = vector.broadcast %180 : vector<1x1x1x16xf32> to vector<8x2x8x16xf32>
    %182 = arith.addf %178, %181 : vector<8x2x8x16xf32>
    %183 = vector.broadcast %11 : vector<8x2x8x1xf32> to vector<8x2x8x16xf32>
    %184 = arith.mulf %182, %183 : vector<8x2x8x16xf32>
    %185 = tpu.reciprocal %2 : vector<8x2xf32> -> vector<8x2xf32>
    %cst_25 = arith.constant dense<0.000000e+00> : vector<8x2x16xf32>
    %186 = vector.multi_reduction <add>, %184, %cst_25 [2] : vector<8x2x8x16xf32> to vector<8x2x16xf32>
    %187 = vector.shape_cast %185 : vector<8x2xf32> to vector<8x2x1xf32>
    %188 = vector.broadcast %187 : vector<8x2x1xf32> to vector<8x2x16xf32>
    %189 = arith.mulf %186, %188 : vector<8x2x16xf32>
    %190 = vector.shape_cast %189 : vector<8x2x16xf32> to vector<16x16xf32>
    %c0_26 = arith.constant 0 : index
    %c0_27 = arith.constant 0 : index
    %191 = vector.load %arg10[%c0_26, %c0_27] : memref<16x16xf32, #tpu.memory_space<vmem>>, vector<16x16xf32>
    %cst_28 = arith.constant dense<0.000000e+00> : vector<16x16xf32>
    %192 = tpu.matmul %190, %191, %cst_28 {dimension_numbers = #tpu.dot_dimension_numbers<[1], [0], [0], [1], [0, 0, 1, 1], [], []>} : vector<16x16xf32>, vector<16x16xf32>, vector<16x16xf32> -> vector<16x16xf32>
    %193 = math.tanh %192 : vector<16x16xf32>
    %194 = vector.shape_cast %193 : vector<16x16xf32> to vector<8x2x16xf32>
    %195 = vector.shape_cast %194 : vector<8x2x16xf32> to vector<8x2x1x16xf32>
    %196 = vector.broadcast %195 : vector<8x2x1x16xf32> to vector<8x2x8x16xf32>
    %197 = arith.mulf %184, %196 : vector<8x2x8x16xf32>
    %cst_29 = arith.constant dense<0.000000e+00> : vector<8x2x8xf32>
    %198 = vector.multi_reduction <add>, %197, %cst_29 [3] : vector<8x2x8x16xf32> to vector<8x2x8xf32>
    %199 = vector.shape_cast %198 : vector<8x2x8xf32> to vector<8x2x8x1xf32>
    %cst_30 = arith.constant 5.000000e-01 : f32
    %200 = vector.broadcast %cst_30 : f32 to vector<8x2x8x1xf32>
    %201 = arith.mulf %200, %199 : vector<8x2x8x1xf32>
    %202 = math.tanh %201 : vector<8x2x8x1xf32>
    %cst_31 = arith.constant 1.000000e+00 : f32
    %203 = vector.broadcast %cst_31 : f32 to vector<8x2x8x1xf32>
    %204 = arith.addf %202, %203 : vector<8x2x8x1xf32>
    %cst_32 = arith.constant 5.000000e-01 : f32
    %205 = vector.broadcast %cst_32 : f32 to vector<8x2x8x1xf32>
    %206 = arith.mulf %205, %204 : vector<8x2x8x1xf32>
    %207 = vector.broadcast %206 : vector<8x2x8x1xf32> to vector<8x2x8x16xf32>
    %208 = arith.mulf %207, %184 : vector<8x2x8x16xf32>
    %cst_33 = arith.constant dense<0.000000e+00> : vector<8x2x16xf32>
    %209 = vector.multi_reduction <add>, %208, %cst_33 [2] : vector<8x2x8x16xf32> to vector<8x2x16xf32>
    %210 = vector.extract_strided_slice %209 {offsets = [0, 0, 0], sizes = [8, 1, 16], strides = [1, 1, 1]} : vector<8x2x16xf32> to vector<8x1x16xf32>
    %211 = vector.shape_cast %210 : vector<8x1x16xf32> to vector<8x16xf32>
    %212 = vector.extract_strided_slice %209 {offsets = [0, 1, 0], sizes = [8, 1, 16], strides = [1, 1, 1]} : vector<8x2x16xf32> to vector<8x1x16xf32>
    %213 = vector.shape_cast %212 : vector<8x1x16xf32> to vector<8x16xf32>
    %214 = tpu.concatenate %211, %213 in 1 : vector<8x16xf32>, vector<8x16xf32> -> vector<8x32xf32>
    %c0_34 = arith.constant 0 : index
    %c0_35 = arith.constant 0 : index
    %215 = vector.load %arg11[%c0_34, %c0_35] : memref<32x272xf32, #tpu.memory_space<vmem>>, vector<32x272xf32>
    %cst_36 = arith.constant dense<0.000000e+00> : vector<8x272xf32>
    %216 = tpu.matmul %214, %215, %cst_36 {dimension_numbers = #tpu.dot_dimension_numbers<[1], [0], [0], [1], [0, 0, 1, 1], [], []>} : vector<8x32xf32>, vector<32x272xf32>, vector<8x272xf32> -> vector<8x272xf32>
    %217 = vector.extract_strided_slice %216 {offsets = [0, 0], sizes = [8, 256], strides = [1, 1]} : vector<8x272xf32> to vector<8x256xf32>
    %218 = vector.extract_strided_slice %216 {offsets = [0, 256], sizes = [8, 16], strides = [1, 1]} : vector<8x272xf32> to vector<8x16xf32>
    %219 = tpu.concatenate %213, %213, %213, %213, %213, %213, %213, %213, %213, %213, %213, %213, %213, %213, %213, %213 in 1 : vector<8x16xf32>, vector<8x16xf32>, vector<8x16xf32>, vector<8x16xf32>, vector<8x16xf32>, vector<8x16xf32>, vector<8x16xf32>, vector<8x16xf32>, vector<8x16xf32>, vector<8x16xf32>, vector<8x16xf32>, vector<8x16xf32>, vector<8x16xf32>, vector<8x16xf32>, vector<8x16xf32>, vector<8x16xf32> -> vector<8x256xf32>
    %220 = arith.mulf %217, %219 : vector<8x256xf32>
    %c0_37 = arith.constant 0 : index
    %c0_38 = arith.constant 0 : index
    %221 = vector.load %arg12[%c0_37, %c0_38] : memref<256x16xf32, #tpu.memory_space<vmem>>, vector<256x16xf32>
    %cst_39 = arith.constant dense<0.000000e+00> : vector<8x16xf32>
    %222 = tpu.matmul %220, %221, %cst_39 {dimension_numbers = #tpu.dot_dimension_numbers<[1], [0], [0], [1], [0, 0, 1, 1], [], []>} : vector<8x256xf32>, vector<256x16xf32>, vector<8x16xf32> -> vector<8x16xf32>
    %223 = arith.addf %222, %218 : vector<8x16xf32>
    %c0_40 = arith.constant 0 : index
    %c0_41 = arith.constant 0 : index
    %224 = vector.load %arg13[%c0_40, %c0_41] : memref<1x16xf32, #tpu.memory_space<vmem>>, vector<1x16xf32>
    %225 = vector.broadcast %224 : vector<1x16xf32> to vector<8x16xf32>
    %226 = arith.addf %223, %225 : vector<8x16xf32>
    %cst_42 = arith.constant 0.000000e+00 : f32
    %227 = vector.broadcast %cst_42 : f32 to vector<8x16xf32>
    %228 = arith.maximumf %226, %227 : vector<8x16xf32>
    %229 = tpu.transpose %228, [1, 0] : vector<8x16xf32> -> vector<16x8xf32>
    %c0_43 = arith.constant 0 : index
    %c0_44 = arith.constant 0 : index
    %230 = vector.load %arg14[%c0_43, %c0_44] : memref<16x16xf32, #tpu.memory_space<vmem>>, vector<16x16xf32>
    %cst_45 = arith.constant dense<0.000000e+00> : vector<16x8xf32>
    %231 = tpu.matmul %230, %229, %cst_45 {dimension_numbers = #tpu.dot_dimension_numbers<[1], [0], [0], [1], [0, 0, 1, 1], [], []>} : vector<16x16xf32>, vector<16x8xf32>, vector<16x8xf32> -> vector<16x8xf32>
    %c0_46 = arith.constant 0 : index
    %c0_47 = arith.constant 0 : index
    %232 = vector.load %arg15[%c0_46, %c0_47] : memref<16x1xf32, #tpu.memory_space<vmem>>, vector<16x1xf32>
    %233 = vector.broadcast %232 : vector<16x1xf32> to vector<16x8xf32>
    %234 = arith.addf %231, %233 : vector<16x8xf32>
    %cst_48 = arith.constant 0.000000e+00 : f32
    %235 = vector.broadcast %cst_48 : f32 to vector<16x8xf32>
    %236 = arith.maximumf %234, %235 : vector<16x8xf32>
    %c0_49 = arith.constant 0 : index
    %c0_50 = arith.constant 0 : index
    %237 = vector.load %arg16[%c0_49, %c0_50] : memref<1x16xf32, #tpu.memory_space<vmem>>, vector<1x16xf32>
    %cst_51 = arith.constant dense<0.000000e+00> : vector<1x8xf32>
    %238 = tpu.matmul %237, %236, %cst_51 {dimension_numbers = #tpu.dot_dimension_numbers<[1], [0], [0], [1], [0, 0, 1, 1], [], []>} : vector<1x16xf32>, vector<16x8xf32>, vector<1x8xf32> -> vector<1x8xf32>
    %c0_52 = arith.constant 0 : index
    %c0_53 = arith.constant 0 : index
    %239 = vector.load %arg17[%c0_52, %c0_53] : memref<1x1xf32, #tpu.memory_space<vmem>>, vector<1x1xf32>
    %240 = vector.broadcast %239 : vector<1x1xf32> to vector<1x8xf32>
    %241 = arith.addf %238, %240 : vector<1x8xf32>
    %cst_54 = arith.constant 5.000000e-01 : f32
    %242 = vector.broadcast %cst_54 : f32 to vector<1x8xf32>
    %243 = arith.mulf %242, %241 : vector<1x8xf32>
    %244 = math.tanh %243 : vector<1x8xf32>
    %cst_55 = arith.constant 1.000000e+00 : f32
    %245 = vector.broadcast %cst_55 : f32 to vector<1x8xf32>
    %246 = arith.addf %244, %245 : vector<1x8xf32>
    %cst_56 = arith.constant 5.000000e-01 : f32
    %247 = vector.broadcast %cst_56 : f32 to vector<1x8xf32>
    %248 = arith.mulf %247, %246 : vector<1x8xf32>
    %c0_57 = arith.constant 0 : index
    %c0_58 = arith.constant 0 : index
    %c0_59 = arith.constant 0 : index
    %249 = vector.load %arg18[%c0_57, %c0_58, %c0_59] : memref<1x1x8xf32, #tpu.memory_space<vmem>>, vector<1x1x8xf32>
    %250 = vector.shape_cast %249 : vector<1x1x8xf32> to vector<1x8xf32>
    %251 = vector.shape_cast %248 : vector<1x8xf32> to vector<1x1x8xf32>
    tpu.vector_store %arg18[%c0_57, %c0_58, %c0_59], %251 {strides = array<i32>} : memref<1x1x8xf32, #tpu.memory_space<vmem>>, vector<1x1x8xf32>,
    return
  }
  func.func @transform_0(%arg0: i32) -> (i32, i32) {
    %c0_i32 = arith.constant 0 : i32
    %c0_i32_0 = arith.constant 0 : i32
    return %arg0, %c0_i32 : i32, i32
  }
  func.func @transform_1(%arg0: i32) -> (i32, i32, i32, i32) {
    %c0_i32 = arith.constant 0 : i32
    %c0_i32_0 = arith.constant 0 : i32
    %c0_i32_1 = arith.constant 0 : i32
    %c0_i32_2 = arith.constant 0 : i32
    return %arg0, %c0_i32, %c0_i32_0, %c0_i32_1 : i32, i32, i32, i32
  }
  func.func @transform_2(%arg0: i32) -> (i32, i32, i32, i32) {
    %c0_i32 = arith.constant 0 : i32
    %c0_i32_0 = arith.constant 0 : i32
    %c0_i32_1 = arith.constant 0 : i32
    %c0_i32_2 = arith.constant 0 : i32
    return %arg0, %c0_i32, %c0_i32_0, %c0_i32_1 : i32, i32, i32, i32
  }
  func.func @transform_3(%arg0: i32) -> (i32, i32) {
    %c0_i32 = arith.constant 0 : i32
    %c0_i32_0 = arith.constant 0 : i32
    %c0_i32_1 = arith.constant 0 : i32
    return %c0_i32, %c0_i32_0 : i32, i32
  }
  func.func @transform_4(%arg0: i32) -> (i32, i32) {
    %c0_i32 = arith.constant 0 : i32
    %c0_i32_0 = arith.constant 0 : i32
    %c0_i32_1 = arith.constant 0 : i32
    return %c0_i32, %c0_i32_0 : i32, i32
  }
  func.func @transform_5(%arg0: i32) -> (i32, i32) {
    %c0_i32 = arith.constant 0 : i32
    %c0_i32_0 = arith.constant 0 : i32
    %c0_i32_1 = arith.constant 0 : i32
    return %c0_i32, %c0_i32_0 : i32, i32
  }
  func.func @transform_6(%arg0: i32) -> (i32, i32) {
    %c0_i32 = arith.constant 0 : i32
    %c0_i32_0 = arith.constant 0 : i32
    %c0_i32_1 = arith.constant 0 : i32
    return %c0_i32, %c0_i32_0 : i32, i32
  }
  func.func @transform_7(%arg0: i32) -> (i32, i32) {
    %c0_i32 = arith.constant 0 : i32
    %c0_i32_0 = arith.constant 0 : i32
    %c0_i32_1 = arith.constant 0 : i32
    return %c0_i32, %c0_i32_0 : i32, i32
  }
  func.func @transform_8(%arg0: i32) -> (i32, i32) {
    %c0_i32 = arith.constant 0 : i32
    %c0_i32_0 = arith.constant 0 : i32
    %c0_i32_1 = arith.constant 0 : i32
    return %c0_i32, %c0_i32_0 : i32, i32
  }
  func.func @transform_9(%arg0: i32) -> (i32, i32) {
    %c0_i32 = arith.constant 0 : i32
    %c0_i32_0 = arith.constant 0 : i32
    %c0_i32_1 = arith.constant 0 : i32
    return %c0_i32, %c0_i32_0 : i32, i32
  }
  func.func @transform_10(%arg0: i32) -> (i32, i32) {
    %c0_i32 = arith.constant 0 : i32
    %c0_i32_0 = arith.constant 0 : i32
    %c0_i32_1 = arith.constant 0 : i32
    return %c0_i32, %c0_i32_0 : i32, i32
  }
  func.func @transform_11(%arg0: i32) -> (i32, i32) {
    %c0_i32 = arith.constant 0 : i32
    %c0_i32_0 = arith.constant 0 : i32
    %c0_i32_1 = arith.constant 0 : i32
    return %c0_i32, %c0_i32_0 : i32, i32
  }
  func.func @transform_12(%arg0: i32) -> (i32, i32) {
    %c0_i32 = arith.constant 0 : i32
    %c0_i32_0 = arith.constant 0 : i32
    %c0_i32_1 = arith.constant 0 : i32
    return %c0_i32, %c0_i32_0 : i32, i32
  }
  func.func @transform_13(%arg0: i32) -> (i32, i32) {
    %c0_i32 = arith.constant 0 : i32
    %c0_i32_0 = arith.constant 0 : i32
    %c0_i32_1 = arith.constant 0 : i32
    return %c0_i32, %c0_i32_0 : i32, i32
  }
  func.func @transform_14(%arg0: i32) -> (i32, i32) {
    %c0_i32 = arith.constant 0 : i32
    %c0_i32_0 = arith.constant 0 : i32
    %c0_i32_1 = arith.constant 0 : i32
    return %c0_i32, %c0_i32_0 : i32, i32
  }
  func.func @transform_15(%arg0: i32) -> (i32, i32) {
    %c0_i32 = arith.constant 0 : i32
    %c0_i32_0 = arith.constant 0 : i32
    %c0_i32_1 = arith.constant 0 : i32
    return %c0_i32, %c0_i32_0 : i32, i32
  }
  func.func @transform_16(%arg0: i32) -> (i32, i32) {
    %c0_i32 = arith.constant 0 : i32
    %c0_i32_0 = arith.constant 0 : i32
    %c0_i32_1 = arith.constant 0 : i32
    return %c0_i32, %c0_i32_0 : i32, i32
  }
  func.func @transform_17(%arg0: i32) -> (i32, i32, i32) {
    %c0_i32 = arith.constant 0 : i32
    %c0_i32_0 = arith.constant 0 : i32
    %c0_i32_1 = arith.constant 0 : i32
    return %arg0, %c0_i32, %c0_i32_0 : i32, i32, i32
  }
}

</mosaic_0001>

<bundles_post_ra>
// kernel: tpu_custom_call.1
= control target key start
LH: loop header
LB: loop body
LE: loop exit
PB: predicated region body
PF: predicated region fallthrough
CT: control target
= control target key end

     0   :  { %s8869_s0 = inlined_call_operand.vmem [shape: f32[8,2], index: 0, kind: input, shape index: {}]   ;;  %s8870_s1 = inlined_call_operand.vmem [shape: bf16[8,2,8,8], index: 1, kind: input, shape index: {}]   ;;  %s8871_s2 = inlined_call_operand.vmem [shape: bf16[8,2,8,16], index: 2, kind: input, shape index: {}]   ;;  %s8872_s3 = inlined_call_operand.vmem [shape: f32[16,32], index: 3, kind: input, shape index: {}]   ;;  %s8873_s4 = inlined_call_operand.vmem [shape: f32[1,32], index: 4, kind: input, shape index: {}]   ;;  %s8874_s5 = inlined_call_operand.vmem [shape: f32[32,32], index: 5, kind: input, shape index: {}]   ;;  %s8875_s6 = inlined_call_operand.vmem [shape: f32[1,32], index: 6, kind: input, shape index: {}]   ;;  %s8876_s7 = inlined_call_operand.vmem [shape: f32[32,16], index: 7, kind: input, shape index: {}]   ;;  %s8877_s8 = inlined_call_operand.vmem [shape: f32[1,16], index: 8, kind: input, shape index: {}]   ;;  %s8878_s9 = inlined_call_operand.vmem [shape: f32[16,16], index: 9, kind: input, shape index: {}]   ;;  %s8879_s10 = inlined_call_operand.vmem [shape: f32[32,272], index: 10, kind: input, shape index: {}]   ;;  %s8880_s11 = inlined_call_operand.vmem [shape: f32[256,16], index: 11, kind: input, shape index: {}]   ;;  %s8881_s12 = inlined_call_operand.vmem [shape: f32[1,16], index: 12, kind: input, shape index: {}]   ;;  %s8882_s13 = inlined_call_operand.vmem [shape: f32[16,16], index: 13, kind: input, shape index: {}]   ;;  %s8883_s14 = inlined_call_operand.vmem [shape: f32[16,1], index: 14, kind: input, shape index: {}]   ;;  %s8884_s15 = inlined_call_operand.vmem [shape: f32[1,16], index: 15, kind: input, shape index: {}]   ;;  %s8885_s16 = inlined_call_operand.<no memory space> [shape: f32[1,1], index: 16, kind: input, shape index: {}]   ;;  %s8886_s17 = inlined_call_operand.hbm [shape: f32[1,1,8], index: 17, kind: output, shape index: {}]  }
   0x1   :  { %9143 = sst [smem:[#allocation136_spill]] %s8869_s0  ;;  %v22_v0 = vstv %s8885_s16 }
   0x2   :  { %9144 = sst [smem:[#allocation137_spill]] %s8870_s1  ;;  %23 = vst [vmem:[#allocation2] sm:$0x1] %v22_v0 }
   0x3   :  { %v295_v1 = vld [vmem:[%s8872_s3] sm:$0xff]  ;;  %v296_v2 = vld [vmem:[%s8872_s3 + $0x8] sm:$0xff]  ;;  %s9145_s18 = sld [smem:[#allocation137_spill]]  ;;  %v6027_v5 = vmov 2   ;;  %vm297_vm0 = vcmask 130048   ;;  %v5261_v17 = vld [vmem:[%s8871_s2 + $0x10] sm:$0xff]  }
   0x4   :  { %v5497_v4 = vpack.c.bf16 %v296_v2, %v295_v1  ;;  %5590 = vset.pattern.permute.xlu1 %v6027_v5  ;;  %v5222_v8 = vld [vmem:[%s8871_s2] sm:$0xff]   ;;  %v5260_v9 = vld [vmem:[%s8871_s2 + $0x8] sm:$0xff]  }
   0x5   :  { %v5223_v11 = vunpack.c.l.bf16 %v5222_v8  ;;  %v5224_v14 = vunpack.c.h.bf16 %v5222_v8  ;;  %v5227_v16 = vunpack.c.l.bf16 %v5260_v9 }
   0x6   :  { %5498 = vmatprep.subr.bf16.mxu0 %v5497_v4 }
   0x7   :  { %5500 = vmatpush3.bf16.msra.mxu0 %v5497_v4  ;;  %5379 = vmatprep.mubr.msk.f32.mxu0 %vm297_vm0, %v5223_v11 }
   0x9   :  { %v5190_v3 = vld [vmem:[%s9145_s18] sm:$0xff]   ;;  %v5253_v10 = vld [vmem:[%s9145_s18 + $0x8] sm:$0xff]   ;;  %v5254_v18 = vld [vmem:[%s9145_s18 + $0x10] sm:$0xff]  }
   0xa   :  { %v5191_v6 = vunpack.c.l.bf16 %v5190_v3  ;;  %v5192_v7 = vunpack.c.h.bf16 %v5190_v3  ;;  %v5195_v12 = vunpack.c.l.bf16 %v5253_v10  ;;  %v5196_v15 = vunpack.c.h.bf16 %v5253_v10 }
   0xc   :  { %v6159_v13 = vpack.i.bf16 %v5192_v7, %v5191_v6  ;;  %v6169_v19 = vpack.i.bf16 %v5196_v15, %v5195_v12 }
   0xe   :  { %5592 = vperm.xlu1 %5590, %v6159_v13  }
   0xf   :  { %24 = vsyncpa [#allocation4], 0  ;;  %5380 = vmatmul.mubr.msk.f32.vlgmr.msra.gmra.mrb[0].mxu0 %vm297_vm0, %v5224_v14  ;;  %v5228_v20 = vunpack.c.h.bf16 %v5260_v9  ;;  %v5231_v21 = vunpack.c.l.bf16 %v5261_v17  ;;  %v5199_v22 = vunpack.c.l.bf16 %v5254_v18  ;;  %v5200_v23 = vunpack.c.h.bf16 %v5254_v18  ;;  %v5262_v25 = vld [vmem:[%s8871_s2 + $0x18] sm:$0xff]   ;;  %v5263_v30 = vld [vmem:[%s8871_s2 + $0x20] sm:$0xff]   ;;  %s6039_s19 = smov 16   ;;  %s6040_s29 = smov 80  }
  0x10   :  { %5382 = vmatprep.mubr.msk.f32.mxu0 %vm297_vm0, %v5227_v16  ;;  %v6028_v24 = vmov 0   ;;  %v6029_v26 = vmov 5   ;;  %v5232_v28 = vunpack.c.h.bf16 %v5261_v17  ;;  %v5235_v29 = vunpack.c.l.bf16 %v5262_v25  ;;  %v5257_v32 = vld [vmem:[%s9145_s18 + $0x28] sm:$0xff]   ;;  %v5255_v34 = vld [vmem:[%s9145_s18 + $0x18] sm:$0xff]   ;;  %v5258_v38 = vld [vmem:[%s9145_s18 + $0x30] sm:$0xff]   ;;  %s6043_s1 = smov 64  }
  0x11   :  { %5632 = vset.pattern.permute.xlu0 %v6029_v26  ;;  %v6180_v27 = vpack.i.bf16 %v5200_v23, %v5199_v22  ;;  %v6030_v31 = vmov 1   ;;  %v5236_v33 = vunpack.c.h.bf16 %v5262_v25  ;;  %v5239_v35 = vunpack.c.l.bf16 %v5263_v30  ;;  %v5264_v37 = vld [vmem:[%s8871_s2 + $0x28] sm:$0xff]   ;;  %v5256_v41 = vld [vmem:[%s9145_s18 + $0x20] sm:$0xff]   ;;  %v5265_v51 = vld [vmem:[%s8871_s2 + $0x30] sm:$0xff]   ;;  %s6044_s25 = smov 96  }
  0x12   :  { %5596 = vset.pattern.permute.xlu1 %v6028_v24  ;;  %5634 = vperm.xlu0 %5632, %v6159_v13   ;;  %v5240_v36 = vunpack.c.h.bf16 %v5263_v30  ;;  %v5211_v39 = vunpack.c.l.bf16 %v5257_v32  ;;  %v5212_v40 = vunpack.c.h.bf16 %v5257_v32  ;;  %v5203_v42 = vunpack.c.l.bf16 %v5255_v34  ;;  %v5266_v57 = vld [vmem:[%s8871_s2 + $0x38] sm:$0xff]   ;;  %v1810_v4 = vld [vmem:[%s8874_s5] sm:$0xff]  ;;  %v1811_v6 = vld [vmem:[%s8874_s5 + $0x8] sm:$0xff]  ;;  %s9343_s2 = sld [smem:[#allocation136_spill]] }
  0x13   :  { %5598 = vperm.xlu1 %5596, %v6169_v19   ;;  %5383 = vmatmul.mubr.msk.f32.gmra.mrb[2].mxu0 %vm297_vm0, %v5228_v20  ;;  %v5204_v43 = vunpack.c.h.bf16 %v5255_v34  ;;  %v5243_v44 = vunpack.c.l.bf16 %v5264_v37  ;;  %v5215_v45 = vunpack.c.l.bf16 %v5258_v38  ;;  %v5216_v46 = vunpack.c.h.bf16 %v5258_v38  ;;  %v5259_v58 = vld [vmem:[%s9145_s18 + $0x38] sm:$0xff]   ;;  %v1812_v8 = vld [vmem:[%s8874_s5 + $0x10] sm:$0xff] }
  0x14   :  { %5385 = vmatprep.mubr.msk.f32.mxu0 %vm297_vm0, %v5231_v21  ;;  %v6210_v47 = vpack.i.bf16 %v5212_v40, %v5211_v39  ;;  %v5207_v48 = vunpack.c.l.bf16 %v5256_v41  ;;  %v5208_v49 = vunpack.c.h.bf16 %v5256_v41  ;;  %v5244_v54 = vunpack.c.h.bf16 %v5264_v37  ;;  %v1813_v9 = vld [vmem:[%s8874_s5 + $0x18] sm:$0xff] }
  0x15   :  { %v6214_v50 = vpack.i.bf16 %v5204_v43, %v5203_v42  ;;  %v6220_v52 = vpack.i.bf16 %v5216_v46, %v5215_v45  ;;  %v6031_v55 = vmov 4   ;;  %v5247_v56 = vunpack.c.l.bf16 %v5265_v51 }
  0x16   :  { %5699 = vperm.xlu0 %5632, %v6180_v27   ;;  %v6222_v53 = vpack.i.bf16 %v5208_v49, %v5207_v48  ;;  %v5248_v59 = vunpack.c.h.bf16 %v5265_v51  ;;  %v5251_v60 = vunpack.c.l.bf16 %v5266_v57  ;;  %v5219_v61 = vunpack.c.l.bf16 %v5259_v58 }
  0x17   :  { %5602 = vset.pattern.permute.xlu1 %v6030_v31  ;;  %5386 = vmatmul.mubr.msk.f32.gmra.mrb[4].mxu0 %vm297_vm0, %v5232_v28  ;;  %v5220_v62 = vunpack.c.h.bf16 %v5259_v58  ;;  %v6032_v63 = vmov 7   ;;  %v5252_v1 = vunpack.c.h.bf16 %v5266_v57  ;;  %v6033_v2 = vmov 3  }
  0x18   :  { %5604 = vperm.xlu1 %5602, %v6169_v19   ;;  %5388 = vmatprep.mubr.msk.f32.mxu0 %vm297_vm0, %v5235_v29  ;;  %v6034_v3 = vmov 6   ;;  %v5501_v7 = vpack.c.bf16 %v1811_v6, %v1810_v4  ;;  %v5505_v10 = vpack.c.bf16 %v1813_v9, %v1812_v8  ;;  %v92_v38 = vlaneseq }
  0x19   :  { %v6241_v0 = vpack.i.bf16 %v5220_v62, %v5219_v61  ;;  %vm1814_vm1 = vcmask 261120   ;;  %vm4023_vm13 = vcmask 1041409  }
  0x1a   :  { %5703 = vset.pattern.permute.xlu0 %v6030_v31  ;;  %5502 = vmatprep.subr.bf16.mxu1 %v5501_v7  ;;  %v6407_v41 = vshrl.u32 %v92_v38, 7 }
  0x1b   :  { %5389 = vmatmul.mubr.msk.f32.gmra.mrb[6].mxu0 %vm297_vm0, %v5236_v33  ;;  %5705 = vperm.xlu0 %5703, %v6159_v13  }
  0x1c   :  { %5608 = vset.pattern.permute.xlu1 %v6027_v5  ;;  %5391 = vmatprep.mubr.msk.f32.mxu0 %vm297_vm0, %v5239_v35  ;;  %9146 = vst [vmem:[#allocation6_spill] sm:$0xff] %v6407_v41  ;;  %v6414_v43 = vsub.s32 0, %v6407_v41  ;;  %v6422_v45 = vsub.s32 2, %v6407_v41  ;;  %v6425_v46 = vsub.s32 3, %v6407_v41  ;;  %v6431_v48 = vsub.s32 5, %v6407_v41 }
  0x1d   :  { %5610 = vperm.xlu1 %5608, %v6169_v19   ;;  %5504 = vmatpush3.bf16.msra.mxu1 %v5501_v7  ;;  %v6440_v51 = vsub.s32 6, %v6407_v41 }
  0x1e   :  { %5506 = vmatprep.subr.bf16.mxu1 %v5505_v10 }
  0x1f   :  { %5392 = vmatmul.mubr.msk.f32.gmra.mrb[8].mxu0 %vm297_vm0, %v5240_v36  ;;  %5734 = vperm.xlu0 %5703, %v6210_v47  }
  0x20   :  { %5394 = vmatprep.mubr.msk.f32.mxu0 %vm297_vm0, %v5243_v44  ;;  %v6417_v44 = vsub.s32 1, %v6407_v41 }
  0x21   :  { %5614 = vset.pattern.permute.xlu1 %v6031_v55  ;;  %5508 = vmatpush3.bf16.msra.mxu1 %v5505_v10 }
  0x22   :  { %5616 = vperm.xlu1 %5614, %v6159_v13  }
  0x23   :  { %5395 = vmatmul.mubr.msk.f32.gmra.mrb[10].mxu0 %vm297_vm0, %v5244_v54  ;;  %5750 = vset.pattern.permute.xlu0 %v6032_v63 }
  0x24   :  { %5397 = vmatprep.mubr.msk.f32.mxu0 %vm297_vm0, %v5247_v56  ;;  %5752 = vperm.xlu0 %5750, %v6180_v27  }
  0x26   :  { %5620 = vset.pattern.permute.xlu1 %v6030_v31 }
  0x27   :  { %5622 = vperm.xlu1 %5620, %v6180_v27   ;;  %5398 = vmatmul.mubr.msk.f32.gmra.mrb[12].mxu0 %vm297_vm0, %v5248_v59 }
  0x28   :  { %5400 = vmatprep.mubr.msk.f32.mxu0 %vm297_vm0, %v5251_v60  ;;  %5756 = vset.pattern.permute.xlu0 %v6034_v3 }
  0x29   :  { %5758 = vperm.xlu0 %5756, %v6159_v13  }
  0x2b   :  { %5626 = vset.pattern.permute.xlu1 %v6033_v2  ;;  %5401 = vmatmul.mubr.msk.f32.gmra.mrb[14].mxu0 %vm297_vm0, %v5252_v1 }
  0x2c   :  { %5628 = vperm.xlu1 %5626, %v6169_v19  }
  0x2d   :  { %5775 = vperm.xlu0 %5756, %v6214_v50  }
  0x30   :  { %5638 = vset.pattern.permute.xlu1 %v6027_v5 }
  0x31   :  { %5640 = vperm.xlu1 %5638, %v6180_v27   ;;  %5779 = vset.pattern.permute.xlu0 %v6033_v2 }
  0x32   :  { %5781 = vperm.xlu0 %5779, %v6159_v13  }
  0x35   :  { %5644 = vset.pattern.permute.xlu1 %v6031_v55 }
  0x36   :  { %5646 = vperm.xlu1 %5644, %v6169_v19   ;;  %5786 = vperm.xlu0 %5779, %v6180_v27  }
  0x3a   :  { %5650 = vset.pattern.permute.xlu1 %v6028_v24  ;;  %5803 = vperm.xlu0 %5779, %v6210_v47  }
  0x3b   :  { %5652 = vperm.xlu1 %5650, %v6214_v50  }
  0x3e   :  { %5807 = vset.pattern.permute.xlu0 %v6027_v5 }
  0x3f   :  { %5656 = vset.pattern.permute.xlu1 %v6030_v31  ;;  %5809 = vperm.xlu0 %5807, %v6214_v50  }
  0x40   :  { %5658 = vperm.xlu1 %5656, %v6214_v50  }
  0x43   :  { %5826 = vperm.xlu0 %5807, %v6220_v52  }
  0x44   :  { %5662 = vset.pattern.permute.xlu1 %v6029_v26 }
  0x45   :  { %5664 = vperm.xlu1 %5662, %v6169_v19  }
  0x47   :  { %5830 = vset.pattern.permute.xlu0 %v6028_v24 }
  0x48   :  { %5832 = vperm.xlu0 %5830, %v6159_v13  }
  0x49   :  { %5668 = vset.pattern.permute.xlu1 %v6032_v63 }
  0x4a   :  { %5670 = vperm.xlu1 %5668, %v6159_v13  }
  0x4c   :  { %5837 = vperm.xlu0 %5830, %v6180_v27  }
  0x4e   :  { %5674 = vset.pattern.permute.xlu1 %v6031_v55 }
  0x4f   :  { %5676 = vperm.xlu1 %5674, %v6180_v27  }
  0x50   :  { %5842 = vperm.xlu0 %5830, %v6222_v53  }
  0x53   :  { %5680 = vset.pattern.permute.xlu1 %v6034_v3 }
  0x54   :  { %5682 = vperm.xlu1 %5680, %v6169_v19   ;;  %5859 = vperm.xlu0 %5830, %v6241_v0  }
  0x58   :  { %5686 = vset.pattern.permute.xlu1 %v6030_v31  ;;  %5863 = vset.pattern.permute.xlu0 %v6031_v55 }
  0x59   :  { %5688 = vperm.xlu1 %5686, %v6222_v53   ;;  %5865 = vperm.xlu0 %5863, %v6214_v50  }
  0x5d   :  { %5692 = vset.pattern.permute.xlu1 %v6033_v2  ;;  %5894 = vperm.xlu0 %5863, %v6220_v52  }
  0x5e   :  { %5694 = vperm.xlu1 %5692, %v6214_v50  }
  0x61   :  { %5898 = vset.pattern.permute.xlu0 %v6029_v26 }
  0x62   :  { %5709 = vset.pattern.permute.xlu1 %v6032_v63  ;;  %5900 = vperm.xlu0 %5898, %v6210_v47  }
  0x63   :  { %5711 = vperm.xlu1 %5709, %v6169_v19  }
  0x66   :  { %5917 = vperm.xlu0 %5898, %v6220_v52  }
  0x67   :  { %5715 = vset.pattern.permute.xlu1 %v6027_v5 }
  0x68   :  { %5717 = vperm.xlu1 %5715, %v6222_v53  }
  0x6a   :  { %5933 = vset.pattern.permute.xlu0 %v6034_v3 }
  0x6b   :  { %5935 = vperm.xlu0 %5933, %v6220_v52  }
  0x6c   :  { %5721 = vset.pattern.permute.xlu1 %v6034_v3 }
  0x6d   :  { %5723 = vperm.xlu1 %5721, %v6180_v27  }
  0x6f   :  { %5952 = vperm.xlu0 %5933, %v6241_v0  }
  0x71   :  { %5727 = vset.pattern.permute.xlu1 %v6028_v24 }
  0x72   :  { %5729 = vperm.xlu1 %5727, %v6210_v47  }
  0x73   :  { %5962 = vset.pattern.permute.xlu0 %v6028_v24 }
  0x76   :  { %5738 = vset.pattern.permute.xlu1 %v6033_v2 }
  0x77   :  { %5740 = vperm.xlu1 %5738, %v6222_v53  }
  0x7b   :  { %5744 = vset.pattern.permute.xlu1 %v6029_v26 }
  0x7c   :  { %5746 = vperm.xlu1 %5744, %v6214_v50  }
  0x80   :  { %5762 = vset.pattern.permute.xlu1 %v6027_v5 }
  0x81   :  { %5764 = vperm.xlu1 %5762, %v6210_v47  }
  0x85   :  { %5768 = vset.pattern.permute.xlu1 %v6031_v55 }
  0x86   :  { %5770 = vperm.xlu1 %5768, %v6222_v53  }
  0x8a   :  { %5790 = vset.pattern.permute.xlu1 %v6028_v24 }
  0x8b   :  { %5792 = vperm.xlu1 %5790, %v6220_v52  }
  0x8d   :  { %v6323_v11 = vpop.permute.xlu1 %5592 }
  0x8e   :  { %v6434_v49 = vunpack.i.h.bf16 %v6323_v11 }
  0x8f   :  { %5796 = vset.pattern.permute.xlu1 %v6030_v31 }
  0x90   :  { %5798 = vperm.xlu1 %5796, %v6220_v52   ;;  %9147 = vst [vmem:[#allocation7_spill] sm:$0xff] %v6434_v49 }
  0x91   :  { %v6329_v13 = vpop.permute.xlu0 %5634 }
  0x92   :  { %v6327_v12 = vpop.permute.xlu1 %5598  ;;  %v6455_v56 = vunpack.i.l.bf16 %v6329_v13 }
  0x93   :  { %v6449_v54 = vunpack.i.l.bf16 %v6327_v12 }
  0x94   :  { %5813 = vset.pattern.permute.xlu1 %v6029_v26  ;;  %9153 = vst [vmem:[#allocation13_spill] sm:$0xff] %v6455_v56 }
  0x95   :  { %5815 = vperm.xlu1 %5813, %v6222_v53   ;;  %v6335_v15 = vpop.permute.xlu0 %5699  ;;  %9151 = vst [vmem:[#allocation11_spill] sm:$0xff] %v6449_v54 }
  0x96   :  { %v6467_v60 = vunpack.i.h.bf16 %v6335_v15  ;;  %v6470_v61 = vunpack.i.l.bf16 %v6335_v15 }
  0x97   :  { %v6333_v14 = vpop.permute.xlu1 %5604 }
  0x98   :  { %v6461_v58 = vunpack.i.h.bf16 %v6333_v14  ;;  %v6464_v59 = vunpack.i.l.bf16 %v6333_v14  ;;  %9156 = vst [vmem:[#allocation16_spill] sm:$0xff] %v6467_v60  ;;  %9157 = vst [vmem:[#allocation17_spill] sm:$0xff] %v6470_v61 }
  0x99   :  { %5819 = vset.pattern.permute.xlu1 %v6032_v63 }
  0x9a   :  { %5821 = vperm.xlu1 %5819, %v6214_v50   ;;  %v6341_v17 = vpop.permute.xlu0 %5705  ;;  %v6437_v50 = vunpack.i.l.bf16 %v6323_v11  ;;  %9154 = vst [vmem:[#allocation14_spill] sm:$0xff] %v6461_v58  ;;  %9155 = vst [vmem:[#allocation15_spill] sm:$0xff] %v6464_v59 }
  0x9b   :  { %v6482_v1 = vunpack.i.l.bf16 %v6341_v17 }
  0x9c   :  { %v6339_v16 = vpop.permute.xlu1 %5610  ;;  %9148 = vst [vmem:[#allocation8_spill] sm:$0xff] %v6437_v50 }
  0x9d   :  { %v6473_v62 = vunpack.i.h.bf16 %v6339_v16  ;;  %9161 = vst [vmem:[#allocation21_spill] sm:$0xff] %v6482_v1 }
  0x9e   :  { %5846 = vset.pattern.permute.xlu1 %v6031_v55  ;;  %v6347_v19 = vpop.permute.xlu0 %5734 }
  0x9f   :  { %5848 = vperm.xlu1 %5846, %v6210_v47   ;;  %9158 = vst [vmem:[#allocation18_spill] sm:$0xff] %v6473_v62  ;;  %v6491_v4 = vunpack.i.h.bf16 %v6347_v19  ;;  %v6494_v6 = vunpack.i.l.bf16 %v6347_v19 }
  0xa1   :  { %v6345_v18 = vpop.permute.xlu1 %5616  ;;  %9164 = vst [vmem:[#allocation24_spill] sm:$0xff] %v6491_v4  ;;  %9165 = vst [vmem:[#allocation25_spill] sm:$0xff] %v6494_v6 }
  0xa3   :  { %5852 = vset.pattern.permute.xlu1 %v6034_v3  ;;  %v6353_v21 = vpop.permute.xlu0 %5752 }
  0xa4   :  { %5854 = vperm.xlu1 %5852, %v6222_v53   ;;  %v6505_v10 = vunpack.i.h.bf16 %v6353_v21  ;;  %v6508_v11 = vunpack.i.l.bf16 %v6353_v21 }
  0xa6   :  { %v6351_v20 = vpop.permute.xlu1 %5622  ;;  %9168 = vst [vmem:[#allocation28_spill] sm:$0xff] %v6505_v10  ;;  %9169 = vst [vmem:[#allocation29_spill] sm:$0xff] %v6508_v11 }
  0xa7   :  { %v6499_v8 = vunpack.i.h.bf16 %v6351_v20  ;;  %v6502_v9 = vunpack.i.l.bf16 %v6351_v20 }
  0xa8   :  { %5869 = vset.pattern.permute.xlu1 %v6030_v31  ;;  %v6359_v23 = vpop.permute.xlu0 %5758 }
  0xa9   :  { %5871 = vperm.xlu1 %5869, %v6241_v0   ;;  %9166 = vst [vmem:[#allocation26_spill] sm:$0xff] %v6499_v8  ;;  %9167 = vst [vmem:[#allocation27_spill] sm:$0xff] %v6502_v9  ;;  %v6518_v14 = vunpack.i.h.bf16 %v6359_v23  ;;  %v6521_v15 = vunpack.i.l.bf16 %v6359_v23 }
  0xab   :  { %v6357_v22 = vpop.permute.xlu1 %5628  ;;  %9172 = vst [vmem:[#allocation32_spill] sm:$0xff] %v6518_v14  ;;  %9173 = vst [vmem:[#allocation33_spill] sm:$0xff] %v6521_v15 }
  0xac   :  { %v6363_v25 = vpop.permute.xlu0 %5775 }
  0xad   :  { %5875 = vset.pattern.permute.xlu1 %v6033_v2 }
  0xae   :  { %5877 = vperm.xlu1 %5875, %v6220_v52  }
  0xb0   :  { %v6365_v27 = vpop.permute.xlu1 %5640 }
  0xb1   :  { %v6369_v28 = vpop.permute.xlu0 %5781 }
  0xb2   :  { %5881 = vset.pattern.permute.xlu1 %v6032_v63  ;;  %v6545_v23 = vunpack.i.l.bf16 %v6369_v28 }
  0xb3   :  { %5883 = vperm.xlu1 %5881, %v6222_v53   ;;  %v6446_v53 = vunpack.i.h.bf16 %v6327_v12  ;;  %v6512_v12 = vunpack.i.h.bf16 %v6357_v22 }
  0xb4   :  { %9181 = vst [vmem:[#allocation41_spill] sm:$0xff] %v6545_v23 }
  0xb5   :  { %v6371_v29 = vpop.permute.xlu1 %5646  ;;  %v6375_v30 = vpop.permute.xlu0 %5786  ;;  %9150 = vst [vmem:[#allocation10_spill] sm:$0xff] %v6446_v53  ;;  %9170 = vst [vmem:[#allocation30_spill] sm:$0xff] %v6512_v12 }
  0xb6   :  { %v6536_v20 = vunpack.i.h.bf16 %v6371_v29  ;;  %v6539_v21 = vunpack.i.l.bf16 %v6371_v29 }
  0xb7   :  { %5887 = vset.pattern.permute.xlu1 %v6027_v5 }
  0xb8   :  { %5889 = vperm.xlu1 %5887, %v6241_v0   ;;  %9178 = vst [vmem:[#allocation38_spill] sm:$0xff] %v6536_v20  ;;  %9179 = vst [vmem:[#allocation39_spill] sm:$0xff] %v6539_v21 }
  0xb9   :  { %v6381_v32 = vpop.permute.xlu0 %5803 }
  0xba   :  { %v6377_v31 = vpop.permute.xlu1 %5652  ;;  %v6569_v4 = vunpack.i.l.bf16 %v6381_v32 }
  0xbb   :  { %v6551_v38 = vunpack.i.l.bf16 %v6377_v31 }
  0xbc   :  { %5904 = vset.pattern.permute.xlu1 %v6034_v3  ;;  %v6488_v3 = vunpack.i.l.bf16 %v6345_v18  ;;  %9189 = vst [vmem:[#allocation49_spill] sm:$0xff] %v6569_v4 }
  0xbd   :  { %5906 = vperm.xlu1 %5904, %v6210_v47   ;;  %9183 = vst [vmem:[#allocation43_spill] sm:$0xff] %v6551_v38 }
  0xbe   :  { %v6389_v5 = vpop.permute.xlu0 %5809  ;;  %9163 = vst [vmem:[#allocation23_spill] sm:$0xff] %v6488_v3 }
  0xbf   :  { %v6383_v33 = vpop.permute.xlu1 %5658  ;;  %v6580_v10 = vunpack.i.h.bf16 %v6389_v5 }
  0xc1   :  { %5910 = vset.pattern.permute.xlu1 %v6033_v2  ;;  %v6485_v2 = vunpack.i.h.bf16 %v6345_v18  ;;  %v6533_v18 = vunpack.i.l.bf16 %v6363_v25  ;;  %9193 = vst [vmem:[#allocation53_spill] sm:$0xff] %v6580_v10 }
  0xc2   :  { %5912 = vperm.xlu1 %5910, %v6241_v0   ;;  %v6395_v36 = vpop.permute.xlu0 %5826 }
  0xc3   :  { %9162 = vst [vmem:[#allocation22_spill] sm:$0xff] %v6485_v2  ;;  %9177 = vst [vmem:[#allocation37_spill] sm:$0xff] %v6533_v18  ;;  %v6563_v18 = vunpack.i.l.bf16 %v6383_v33  ;;  %v6594_v4 = vunpack.i.h.bf16 %v6395_v36 }
  0xc4   :  { %v6387_v34 = vpop.permute.xlu1 %5664 }
  0xc5   :  { %9187 = vst [vmem:[#allocation47_spill] sm:$0xff] %v6563_v18  ;;  %v6574_v6 = vunpack.i.h.bf16 %v6387_v34  ;;  %9198 = vst [vmem:[#allocation58_spill] sm:$0xff] %v6594_v4 }
  0xc6   :  { %5921 = vset.pattern.permute.xlu1 %v6032_v63 }
  0xc7   :  { %5923 = vperm.xlu1 %5921, %v6210_v47   ;;  %v6402_v39 = vpop.permute.xlu0 %5832  ;;  %v6428_v47 = vsub.s32 4, %v6407_v41  ;;  %9191 = vst [vmem:[#allocation51_spill] sm:$0xff] %v6574_v6 }
  0xc8   :  { %v6606_v20 = vunpack.i.h.bf16 %v6402_v39  ;;  %v6609_v12 = vunpack.i.l.bf16 %v6402_v39 }
  0xc9   :  { %v6393_v35 = vpop.permute.xlu1 %5670 }
  0xca   :  { %9202 = vst [vmem:[#allocation62_spill] sm:$0xff] %v6606_v20  ;;  %9203 = vst [vmem:[#allocation63_spill] sm:$0xff] %v6609_v12 }
  0xcb   :  { %5927 = vset.pattern.permute.xlu1 %v6031_v55  ;;  %v6409_v42 = vpop.permute.xlu0 %5837  ;;  %v6452_v55 = vunpack.i.h.bf16 %v6329_v13  ;;  %v6515_v13 = vunpack.i.l.bf16 %v6357_v22  ;;  %v6542_v22 = vunpack.i.h.bf16 %v6369_v28  ;;  %v6566_v28 = vunpack.i.h.bf16 %v6381_v32 }
  0xcc   :  { %5929 = vperm.xlu1 %5927, %v6241_v0   ;;  %v6591_v32 = vunpack.i.l.bf16 %v6393_v35 }
  0xcd   :  { %9152 = vst [vmem:[#allocation12_spill] sm:$0xff] %v6452_v55  ;;  %9171 = vst [vmem:[#allocation31_spill] sm:$0xff] %v6515_v13 }
  0xce   :  { %v6399_v37 = vpop.permute.xlu1 %5676  ;;  %9180 = vst [vmem:[#allocation40_spill] sm:$0xff] %v6542_v22  ;;  %9188 = vst [vmem:[#allocation48_spill] sm:$0xff] %v6566_v28  ;;  %v6588_v28 = vunpack.i.h.bf16 %v6393_v35 }
  0xcf   :  { %v6458_v57 = vpop.permute.xlu0 %5842  ;;  %9197 = vst [vmem:[#allocation57_spill] sm:$0xff] %v6591_v32  ;;  %v6600_v6 = vunpack.i.h.bf16 %v6399_v37 }
  0xd0   :  { %5939 = vset.pattern.permute.xlu1 %v6029_v26  ;;  %9196 = vst [vmem:[#allocation56_spill] sm:$0xff] %v6588_v28  ;;  %v6618_v28 = vunpack.i.h.bf16 %v6409_v42  ;;  %v6632_v13 = vunpack.i.h.bf16 %v6458_v57  ;;  %v6635_v14 = vunpack.i.l.bf16 %v6458_v57 }
  0xd1   :  { %5941 = vperm.xlu1 %5939, %v6241_v0   ;;  %9200 = vst [vmem:[#allocation60_spill] sm:$0xff] %v6600_v6 }
  0xd2   :  { %9205 = vst [vmem:[#allocation65_spill] sm:$0xff] %v6618_v28  ;;  %9209 = vst [vmem:[#allocation69_spill] sm:$0xff] %v6632_v13 }
  0xd3   :  { %v6405_v40 = vpop.permute.xlu1 %5682  ;;  %v5860_v19 = vpop.permute.xlu0 %5859  ;;  %9210 = vst [vmem:[#allocation70_spill] sm:$0xff] %v6635_v14 }
  0xd4   :  { %v6624_v21 = vunpack.i.h.bf16 %v6405_v40  ;;  %v6627_v39 = vunpack.i.l.bf16 %v6405_v40  ;;  %v6643_v15 = vunpack.i.h.bf16 %v5860_v19 }
  0xd5   :  { %5945 = vset.pattern.permute.xlu1 %v6032_v63  ;;  %v6476_v63 = vunpack.i.l.bf16 %v6339_v16  ;;  %v6524_v16 = vunpack.i.h.bf16 %v6365_v27 }
  0xd6   :  { %5947 = vperm.xlu1 %5945, %v6220_v52   ;;  %v6443_v52 = vsub.s32 7, %v6407_v41  ;;  %v6557_v41 = vunpack.i.l.bf16 %v6375_v30  ;;  %9207 = vst [vmem:[#allocation67_spill] sm:$0xff] %v6624_v21  ;;  %9208 = vst [vmem:[#allocation68_spill] sm:$0xff] %v6627_v39  ;;  %v6645_v21 = vunpack.i.l.bf16 %v5860_v19 }
  0xd7   :  { %9159 = vst [vmem:[#allocation19_spill] sm:$0xff] %v6476_v63  ;;  %9174 = vst [vmem:[#allocation34_spill] sm:$0xff] %v6524_v16 }
  0xd8   :  { %v6419_v26 = vpop.permute.xlu1 %5688  ;;  %9149 = vst [vmem:[#allocation9_spill] sm:$0xff] %v6443_v52  ;;  %9185 = vst [vmem:[#allocation45_spill] sm:$0xff] %v6557_v41  ;;  %v5866_v35 = vpop.permute.xlu0 %5865 }
  0xd9   :  { %v6638_v55 = vunpack.i.h.bf16 %v6419_v26  ;;  %9213 = vst [vmem:[#allocation73_spill] sm:$0xff] %v6643_v15  ;;  %9214 = vst [vmem:[#allocation74_spill] sm:$0xff] %v6645_v21  ;;  %v6653_v52 = vunpack.i.h.bf16 %v5866_v35  ;;  %v6661_v21 = vunpack.i.l.bf16 %v5866_v35 }
  0xda   :  { %5957 = vperm.xlu1 %5945, %v6241_v0   ;;  %v6479_v0 = vunpack.i.h.bf16 %v6341_v17  ;;  %v6527_v17 = vunpack.i.l.bf16 %v6365_v27  ;;  %v6548_v27 = vunpack.i.h.bf16 %v6377_v31 }
  0xdb   :  { %9211 = vst [vmem:[#allocation71_spill] sm:$0xff] %v6638_v55  ;;  %9215 = vst [vmem:[#allocation75_spill] sm:$0xff] %v6653_v52 }
  0xdc   :  { %9160 = vst [vmem:[#allocation20_spill] sm:$0xff] %v6479_v0  ;;  %9175 = vst [vmem:[#allocation35_spill] sm:$0xff] %v6527_v17 }
  0xdd   :  { %v6496_v7 = vpop.permute.xlu1 %5694  ;;  %9182 = vst [vmem:[#allocation42_spill] sm:$0xff] %v6548_v27  ;;  %9216 = vst [vmem:[#allocation76_spill] sm:$0xff] %v6661_v21 }
  0xde   :  { %5961 = vset.pattern.permute.xlu1 %v6028_v24  ;;  %v6530_v24 = vunpack.i.h.bf16 %v6363_v25  ;;  %v6554_v25 = vunpack.i.h.bf16 %v6375_v30  ;;  %v6577_v30 = vunpack.i.l.bf16 %v6387_v34  ;;  %v6597_v34 = vunpack.i.l.bf16 %v6395_v36 }
  0xdf   :  { %v6666_v56 = vunpack.i.h.bf16 %v6496_v7 }
  0xe0   :  { %9176 = vst [vmem:[#allocation36_spill] sm:$0xff] %v6530_v24  ;;  %9184 = vst [vmem:[#allocation44_spill] sm:$0xff] %v6554_v25  ;;  %v6560_v24 = vunpack.i.h.bf16 %v6383_v33  ;;  %v6583_v33 = vunpack.i.l.bf16 %v6389_v5  ;;  %v6603_v5 = vunpack.i.l.bf16 %v6399_v37  ;;  %v6621_v37 = vunpack.i.l.bf16 %v6409_v42 }
  0xe1   :  { %9192 = vst [vmem:[#allocation52_spill] sm:$0xff] %v6577_v30  ;;  %9199 = vst [vmem:[#allocation59_spill] sm:$0xff] %v6597_v34  ;;  %v6641_v42 = vunpack.i.l.bf16 %v6419_v26 }
  0xe2   :  { %v5712_v29 = vpop.permute.xlu1 %5711  ;;  %9186 = vst [vmem:[#allocation46_spill] sm:$0xff] %v6560_v24  ;;  %v6571_v31 = vpop.f32.mrb[0].mxu0  ;;  %9194 = vst [vmem:[#allocation54_spill] sm:$0xff] %v6583_v33 }
  0xe3   :  { %9190 = vst [vmem:[#allocation50_spill] sm:$0xff] %v6571_v31  ;;  %v6585_v11 = vpop.f32.mrb[1].mxu0  ;;  %9201 = vst [vmem:[#allocation61_spill] sm:$0xff] %v6603_v5  ;;  %v578_v30 = vrot.slane %v6571_v31, %v6414_v43  ;;  %v722_v36 = vrot.slane %v6571_v31, %v6417_v44  ;;  %v882_v40 = vrot.slane %v6571_v31, %v6422_v45  ;;  %v6679_v35 = vunpack.i.h.bf16 %v5712_v29 }
  0xe4   :  { %9195 = vst [vmem:[#allocation55_spill] sm:$0xff] %v6585_v11  ;;  %9206 = vst [vmem:[#allocation66_spill] sm:$0xff] %v6621_v37  ;;  %v1042_v39 = vrot.slane %v6571_v31, %v6425_v46  ;;  %v1202_v57 = vrot.slane %v6571_v31, %v6428_v47  ;;  %v574_v15 = vrot.slane %v6585_v11, %v6414_v43  ;;  %v6669_v31 = vunpack.i.l.bf16 %v6496_v7 }
  0xe5   :  { %9212 = vst [vmem:[#allocation72_spill] sm:$0xff] %v6641_v42  ;;  %v636_v55 = vmul.f32 %v6606_v20, %v578_v30  ;;  %v780_v26 = vmul.f32 %v6479_v0, %v722_v36  ;;  %v6663_v42 = vpop.permute.xlu0 %5894  ;;  %9218 = vst [vmem:[#allocation78_spill] sm:$0xff] %v6666_v56  ;;  %v718_v30 = vrot.slane %v6585_v11, %v6417_v44  ;;  %v6681_v3 = vunpack.i.l.bf16 %v5712_v29 }
  0xe6   :  { %v6615_v4 = vpop.f32.mrb[2].mxu0  ;;  %9217 = vst [vmem:[#allocation77_spill] sm:$0xff] %v6663_v42  ;;  %9219 = vst [vmem:[#allocation79_spill] sm:$0xff] %v6669_v31  ;;  %v878_v0 = vrot.slane %v6585_v11, %v6422_v45  ;;  %v6686_v7 = vunpack.i.h.bf16 %v6663_v42  ;;  %v940_v14 = vmul.f32 %v6434_v49, %v882_v40  ;;  %v1100_v23 = vmul.f32 %v6542_v22, %v1042_v39 }
  0xe7   :  { %9204 = vst [vmem:[#allocation64_spill] sm:$0xff] %v6615_v4  ;;  %v5718_v34 = vpop.permute.xlu1 %5717  ;;  %v6629_v32 = vpop.f32.mrb[3].mxu0  ;;  %9220 = vst [vmem:[#allocation80_spill] sm:$0xff] %v6679_v35  ;;  %v6691_v21 = vmul.f32 %v6485_v2, %v1202_v57  ;;  %v796_v56 = vadd.f32 %v780_v26, %v636_v55  ;;  %v586_v39 = vrot.slane %v6615_v4, %v6414_v43 }
  0xe8   :  { %9221 = vst [vmem:[#allocation81_spill] sm:$0xff] %v6681_v3  ;;  %9222 = vst [vmem:[#allocation82_spill] sm:$0xff] %v6686_v7  ;;  %v6702_v7 = vmul.f32 %v6609_v12, %v574_v15  ;;  %v730_v40 = vrot.slane %v6615_v4, %v6417_v44  ;;  %v6711_v55 = vmul.f32 %v6482_v1, %v718_v30 }
  0xe9   :  { %v6714_v26 = vmul.f32 %v6437_v50, %v878_v0  ;;  %v890_v2 = vrot.slane %v6615_v4, %v6422_v45  ;;  %v6728_v0 = vunpack.i.h.bf16 %v5718_v34  ;;  %v956_v1 = vadd.f32 %v940_v14, %v796_v56 }
  0xea   :  { %v6659_v19 = vpop.f32.mrb[4].mxu0  ;;  %v6739_v42 = vmul.f32 %v6446_v53, %v586_v39  ;;  %v582_v30 = vrot.slane %v6629_v32, %v6414_v43  ;;  %v6753_v39 = vmul.f32 %v6461_v58, %v730_v40  ;;  %v886_v53 = vrot.slane %v6629_v32, %v6422_v45 }
  0xeb   :  { %v6673_v20 = vpop.f32.mrb[5].mxu0  ;;  %v594_v13 = vrot.slane %v6659_v19, %v6414_v43  ;;  %v738_v29 = vrot.slane %v6659_v19, %v6417_v44  ;;  %9223 = vst [vmem:[#allocation83_spill] sm:$0xff] %v6714_v26  ;;  %9224 = vst [vmem:[#allocation84_spill] sm:$0xff] %v6728_v0  ;;  %v898_v50 = vrot.slane %v6659_v19, %v6422_v45 }
  0xec   :  { %v6675_v36 = vpop.permute.xlu1 %5723  ;;  %v590_v11 = vrot.slane %v6673_v20, %v6414_v43  ;;  %v734_v35 = vrot.slane %v6673_v20, %v6417_v44  ;;  %v894_v15 = vrot.slane %v6673_v20, %v6422_v45  ;;  %v1054_v26 = vrot.slane %v6673_v20, %v6425_v46  ;;  %9225 = vst [vmem:[#allocation85_spill] sm:$0xff] %v6739_v42 }
  0xed   :  { %v640_v22 = vmul.f32 %v6618_v28, %v594_v13  ;;  %v784_v13 = vmul.f32 %v6499_v8, %v738_v29  ;;  %v6741_v28 = vunpack.i.l.bf16 %v5718_v34  ;;  %v1058_v56 = vrot.slane %v6659_v19, %v6425_v46 }
  0xee   :  { %v6699_v3 = vpop.f32.mrb[6].mxu0  ;;  %v639_v12 = vmul.f32 %v6621_v37, %v590_v11  ;;  %v783_v11 = vmul.f32 %v6502_v9, %v734_v35  ;;  %v726_v35 = vrot.slane %v6629_v32, %v6417_v44  ;;  %v943_v8 = vmul.f32 %v6527_v17, %v894_v15 }
  0xef   :  { %v6708_v57 = vpop.f32.mrb[7].mxu0  ;;  %9226 = vst [vmem:[#allocation86_spill] sm:$0xff] %v6741_v28  ;;  %v800_v29 = vadd.f32 %v784_v13, %v640_v22  ;;  %v6756_v34 = vmul.f32 %v6473_v62, %v890_v2  ;;  %v944_v4 = vmul.f32 %v6524_v16, %v898_v50  ;;  %v1116_v0 = vadd.f32 %v1100_v23, %v956_v1 }
  0xf0   :  { %v799_v9 = vadd.f32 %v783_v11, %v639_v12  ;;  %v1103_v22 = vmul.f32 %v6557_v41, %v1054_v26  ;;  %v1104_v40 = vmul.f32 %v6554_v25, %v1058_v56  ;;  %v598_v13 = vrot.slane %v6708_v57, %v6414_v43 }
  0xf1   :  { %v6722_v49 = vpop.permute.xlu1 %5729  ;;  %v960_v2 = vadd.f32 %v944_v4, %v800_v29  ;;  %v742_v50 = vrot.slane %v6708_v57, %v6417_v44  ;;  %v6776_v1 = vmul.f32 %v6449_v54, %v582_v30  ;;  %v6779_v23 = vmul.f32 %v6464_v59, %v726_v35 }
  0xf2   :  { %v6736_v37 = vpop.f32.mrb[8].mxu0  ;;  %v959_v15 = vadd.f32 %v943_v8, %v799_v9  ;;  %v1214_v4 = vrot.slane %v6673_v20, %v6428_v47  ;;  %v6786_v9 = vmul.f32 %v6476_v63, %v886_v53  ;;  %v1218_v26 = vrot.slane %v6659_v19, %v6428_v47 }
  0xf3   :  { %v6747_v14 = vpop.f32.mrb[9].mxu0  ;;  %v602_v56 = vrot.slane %v6699_v3, %v6414_v43  ;;  %v746_v30 = vrot.slane %v6699_v3, %v6417_v44  ;;  %v1374_v35 = vrot.slane %v6673_v20, %v6431_v48  ;;  %v1378_v29 = vrot.slane %v6659_v19, %v6431_v48 }
  0xf4   :  { %v1534_v8 = vrot.slane %v6673_v20, %v6440_v51  ;;  %v1119_v53 = vadd.f32 %v1103_v22, %v959_v15  ;;  %v1120_v41 = vadd.f32 %v1104_v40, %v960_v2  ;;  %v902_v16 = vrot.slane %v6708_v57, %v6422_v45 }
  0xf5   :  { %v641_v63 = vmul.f32 %v6551_v38, %v598_v13  ;;  %v785_v59 = vmul.f32 %v6563_v18, %v742_v50  ;;  %v1538_v62 = vrot.slane %v6659_v19, %v6440_v51  ;;  %v6813_v58 = vunpack.i.h.bf16 %v6675_v36 }
  0xf6   :  { %v6761_v42 = vpop.permute.xlu1 %5740  ;;  %v6766_v11 = vpop.f32.mrb[10].mxu0  ;;  %v6816_v22 = vunpack.i.l.bf16 %v6675_v36  ;;  %v1263_v15 = vmul.f32 %v6603_v5, %v1214_v4  ;;  %v1264_v40 = vmul.f32 %v6600_v6, %v1218_v26  ;;  %v906_v2 = vrot.slane %v6699_v3, %v6422_v45 }
  0xf7   :  { %v6773_v17 = vpop.f32.mrb[11].mxu0  ;;  %9229 = vst [vmem:[#allocation89_spill] sm:$0xff] %v6813_v58  ;;  %v642_v13 = vmul.f32 %v6548_v27, %v602_v56  ;;  %v786_v50 = vmul.f32 %v6560_v24, %v746_v30  ;;  %v1423_v18 = vmul.f32 %v6470_v61, %v1374_v35  ;;  %v1226_v36 = vrot.slane %v6699_v3, %v6428_v47 }
  0xf8   :  { %9230 = vst [vmem:[#allocation90_spill] sm:$0xff] %v6816_v22  ;;  %v1279_v38 = vadd.f32 %v1263_v15, %v1119_v53  ;;  %v1424_v4 = vmul.f32 %v6467_v60, %v1378_v29  ;;  %v1280_v5 = vadd.f32 %v1264_v40, %v1120_v41  ;;  %v801_v26 = vadd.f32 %v785_v59, %v641_v63 }
  0xf9   :  { %v945_v6 = vmul.f32 %v6583_v33, %v902_v16  ;;  %v1276_v30 = vadd.f32 %v6691_v21, %v1116_v0  ;;  %v1584_v35 = vmul.f32 %v6813_v58, %v1538_v62  ;;  %v1066_v53 = vrot.slane %v6699_v3, %v6425_v46 }
  0xfa   :  { %v6802_v25 = vpop.f32.mrb[12].mxu0  ;;  %v1222_v15 = vrot.slane %v6708_v57, %v6428_v47  ;;  %v1583_v41 = vmul.f32 %v6816_v22, %v1534_v8  ;;  %v6845_v59 = vunpack.i.h.bf16 %v6722_v49  ;;  %v802_v63 = vadd.f32 %v786_v50, %v642_v13  ;;  %v9235_v13 = vld [vmem:[#allocation78_spill] sm:$0xff]  ;;  %v9243_v22 = vld [vmem:[#allocation23_spill] sm:$0xff] }
  0xfb   :  { %v6800_v12 = vpop.permute.xlu1 %5746  ;;  %9227 = vst [vmem:[#allocation87_spill] sm:$0xff] %v6802_v25  ;;  %v6808_v54 = vpop.f32.mrb[13].mxu0  ;;  %v1062_v25 = vrot.slane %v6708_v57, %v6425_v46  ;;  %v946_v16 = vmul.f32 %v6580_v10, %v906_v2  ;;  %v1439_v29 = vadd.f32 %v1423_v18, %v1279_v38  ;;  %v6849_v21 = vunpack.i.l.bf16 %v6722_v49  ;;  %v9236_v2 = vld [vmem:[#allocation76_spill] sm:$0xff]  ;;  %v9237_v38 = vld [vmem:[#allocation55_spill] sm:$0xff]  ;;  %v9242_v10 = vld [vmem:[#allocation69_spill] sm:$0xff] }
  0xfc   :  { %9228 = vst [vmem:[#allocation88_spill] sm:$0xff] %v6808_v54  ;;  %9233 = vst [vmem:[#allocation93_spill] sm:$0xff] %v6845_v59  ;;  %v6852_v62 = vmul.f32 %v6653_v52, %v1226_v36  ;;  %v1440_v40 = vadd.f32 %v1424_v4, %v1280_v5  ;;  %v961_v33 = vadd.f32 %v945_v6, %v801_v26 }
  0xfd   :  { %9234 = vst [vmem:[#allocation94_spill] sm:$0xff] %v6849_v21  ;;  %v1105_v0 = vmul.f32 %v6669_v31, %v1062_v25  ;;  %v606_v8 = vrot.slane %v6747_v14, %v6414_v43  ;;  %v610_v27 = vrot.slane %v6736_v37, %v6414_v43  ;;  %v1106_v50 = vmul.f32 %v9235_v13, %v1066_v53 }
  0xfe   :  { %v6833_v56 = vpop.f32.mrb[14].mxu0  ;;  %v1265_v18 = vmul.f32 %v9236_v2, %v1222_v15  ;;  %v795_v49 = vadd.f32 %v6711_v55, %v6702_v7  ;;  %v1038_v36 = vrot.slane %v9237_v38, %v6425_v46  ;;  %v962_v25 = vadd.f32 %v946_v16, %v802_v63  ;;  %v9239_v55 = vld [vmem:[#allocation83_spill] sm:$0xff]  ;;  %v9240_v15 = vld [vmem:[#allocation41_spill] sm:$0xff]  ;;  %v9241_v16 = vld [vmem:[#allocation70_spill] sm:$0xff] }
  0xff   :  { %9231 = vst [vmem:[#allocation91_spill] sm:$0xff] %v6833_v56  ;;  %v6841_v24 = vpop.f32.mrb[15].mxu0  ;;  %v750_v6 = vrot.slane %v6747_v14, %v6417_v44  ;;  %v1198_v5 = vrot.slane %v9237_v38, %v6428_v47  ;;  %v1358_v4 = vrot.slane %v9237_v38, %v6431_v48  ;;  %v6873_v26 = vadd.f32 %v1583_v41, %v1439_v29  ;;  %v9244_v56 = vld [vmem:[#allocation13_spill] sm:$0xff] }
 0x100   :  { %v6831_v54 = vpop.permute.xlu1 %5764  ;;  %9232 = vst [vmem:[#allocation92_spill] sm:$0xff] %v6841_v24  ;;  %v754_v7 = vrot.slane %v6736_v37, %v6417_v44  ;;  %v955_v53 = vadd.f32 %v9239_v55, %v795_v49  ;;  %v1099_v13 = vmul.f32 %v9240_v15, %v1038_v36  ;;  %v6879_v2 = vadd.f32 %v1584_v35, %v1440_v40  ;;  %v9246_v35 = vld [vmem:[#allocation50_spill] sm:$0xff] }
 0x101   :  { %v1121_v63 = vadd.f32 %v1105_v0, %v961_v33  ;;  %v643_v31 = vmul.f32 %v9241_v16, %v606_v8  ;;  %v644_v58 = vmul.f32 %v9242_v10, %v610_v27  ;;  %v1259_v61 = vmul.f32 %v9243_v22, %v1198_v5 }
 0x102   :  { %v1115_v60 = vadd.f32 %v1099_v13, %v955_v53  ;;  %v1419_v41 = vmul.f32 %v9244_v56, %v1358_v4  ;;  %v1518_v29 = vrot.slane %v9237_v38, %v6440_v51  ;;  %v1122_v24 = vadd.f32 %v1106_v50, %v962_v25  ;;  %v9247_v13 = vld [vmem:[#allocation33_spill] sm:$0xff]  ;;  %v9248_v25 = vld [vmem:[#allocation12_spill] sm:$0xff] }
 0x103   :  { %v1362_v40 = vrot.slane %v9246_v35, %v6431_v48  ;;  %v1522_v33 = vrot.slane %v9246_v35, %v6440_v51  ;;  %v910_v27 = vrot.slane %v6747_v14, %v6422_v45  ;;  %v797_v50 = vadd.f32 %v6779_v23, %v6776_v1  ;;  %v9249_v4 = vld [vmem:[#allocation32_spill] sm:$0xff] }
 0x104   :  { %v1275_v8 = vadd.f32 %v1259_v61, %v1115_v60  ;;  %v1579_v36 = vmul.f32 %v9247_v13, %v1518_v29  ;;  %v9250_v60 = vrot.slane %v6629_v32, %v6425_v46  ;;  %v9251_v61 = vld [vmem:[#allocation31_spill] sm:$0xff]  ;;  %v1366_v1 = vrot.slane %v6629_v32, %v6431_v48 }
 0x105   :  { %v6865_v52 = vpop.permute.xlu1 %5770  ;;  %v1420_v5 = vmul.f32 %v9248_v25, %v1362_v40  ;;  %v1580_v55 = vmul.f32 %v9249_v4, %v1522_v33  ;;  %v957_v10 = vadd.f32 %v6786_v9, %v797_v50  ;;  %v9252_v33 = vld [vmem:[#allocation57_spill] sm:$0xff]  ;;  %v9253_v9 = vrot.slane %v6629_v32, %v6428_v47  ;;  %v9254_v50 = vld [vmem:[#allocation39_spill] sm:$0xff]  ;;  %v9256_v4 = vld [vmem:[#allocation72_spill] sm:$0xff] }
 0x106   :  { %9238 = vst [vmem:[#allocation55_spill] sm:$0xff] %v6865_v52  ;;  %v9245_v52 = vld [vmem:[#allocation9_spill] sm:$0xff]  ;;  %v1435_v16 = vadd.f32 %v1419_v41, %v1275_v8  ;;  %v1101_v29 = vmul.f32 %v9251_v61, %v9250_v60  ;;  %v1526_v60 = vrot.slane %v6629_v32, %v6440_v51  ;;  %v6927_v23 = vunpack.i.h.bf16 %v6761_v42 }
 0x107   :  { %v1678_v49 = vrot.slane %v9237_v38, %v9245_v52  ;;  %v914_v38 = vrot.slane %v6736_v37, %v6422_v45  ;;  %v1682_v53 = vrot.slane %v9246_v35, %v9245_v52  ;;  %v1436_v35 = vadd.f32 %v1420_v5, %v1276_v30  ;;  %v6933_v30 = vld [vmem:[%s8873_s4] ss:$0 sm:$0xff] }
 0x108   :  { %v1595_v41 = vadd.f32 %v1579_v36, %v1435_v16  ;;  %v1117_v8 = vadd.f32 %v1101_v29, %v957_v10  ;;  %v1261_v56 = vmul.f32 %v9254_v50, %v9253_v9  ;;  %9255 = vst [vmem:[#allocation83_spill] sm:$0xff] %v6927_v23  ;;  %v787_v40 = vmul.f32 %v9256_v4, %v750_v6  ;;  %v9257_v16 = vld [vmem:[#allocation56_spill] sm:$0xff]  ;;  %v9260_v6 = vld [vmem:[#allocation71_spill] sm:$0xff] }
 0x109   :  { %v1739_v13 = vmul.f32 %v9252_v33, %v1678_v49  ;;  %v1596_v10 = vadd.f32 %v1580_v55, %v1436_v35  ;;  %v1740_v49 = vmul.f32 %v9257_v16, %v1682_v53  ;;  %v9258_v29 = vld [vmem:[#allocation52_spill] sm:$0xff]  ;;  %v1686_v50 = vrot.slane %v6629_v32, %v9245_v52 }
 0x10a   :  { %v6893_v0 = vpop.permute.xlu1 %5792  ;;  %v1277_v5 = vadd.f32 %v1261_v56, %v1117_v8  ;;  %v1421_v9 = vmul.f32 %v9258_v29, %v1366_v1  ;;  %v6939_v33 = vadd.f32 %v1265_v18, %v1121_v63  ;;  %v6942_v22 = vunpack.i.l.bf16 %v6761_v42  ;;  %v9261_v56 = vld [vmem:[#allocation68_spill] sm:$0xff]  ;;  %v9263_v8 = vld [vmem:[#allocation81_spill] sm:$0xff] }
 0x10b   :  { %v1755_v36 = vadd.f32 %v1739_v13, %v1595_v41  ;;  %v788_v4 = vmul.f32 %v9260_v6, %v754_v7  ;;  %v1756_v15 = vadd.f32 %v1740_v49, %v1596_v10  ;;  %v6946_v25 = vadd.f32 %v6852_v62, %v1122_v24  ;;  %v9262_v32 = vld [vmem:[#allocation84_spill] sm:$0xff]  ;;  %v9264_v24 = vld [vmem:[#allocation85_spill] sm:$0xff] }
 0x10c   :  { %9259 = vst [vmem:[#allocation9_spill] sm:$0xff] %v6942_v22  ;;  %v1437_v13 = vadd.f32 %v1421_v9, %v1277_v5  ;;  %v1581_v53 = vmul.f32 %v9261_v56, %v1526_v60  ;;  %v803_v1 = vadd.f32 %v787_v40, %v643_v31  ;;  %v947_v35 = vmul.f32 %v6741_v28, %v910_v27  ;;  %v9265_v40 = vld [vmem:[#allocation64_spill] sm:$0xff] }
 0x10d   :  { %v1778_v55 = vadd.f32 %v6933_v30, %v1755_v36  ;;  %v948_v18 = vmul.f32 %v9262_v32, %v914_v38  ;;  %v1779_v63 = vadd.f32 %v6933_v30, %v1756_v15  ;;  %v1741_v10 = vmul.f32 %v9263_v8, %v1686_v50  ;;  %v9267_v50 = vld [vmem:[#allocation30_spill] sm:$0xff] }
 0x10e   :  { %v1597_v7 = vadd.f32 %v1581_v53, %v1437_v13  ;;  %v798_v62 = vadd.f32 %v6753_v39, %v9264_v24  ;;  %v804_v49 = vadd.f32 %v788_v4, %v644_v58  ;;  %v1382_v60 = vrot.slane %v6708_v57, %v6431_v48 }
 0x10f   :  { %v6924_v61 = vpop.permute.xlu1 %5798  ;;  %v1794_v41 = vmax.f32 %v1778_v55, 0.0  ;;  %v1386_v31 = vrot.slane %v6699_v3, %v6431_v48  ;;  %v1795_v27 = vmax.f32 %v1779_v63, 0.0  ;;  %v9266_v36 = vrot.slane %v9265_v40, %v6425_v46  ;;  %v9271_v55 = vld [vmem:[#allocation38_spill] sm:$0xff] }
 0x110   :  { %v1757_v15 = vadd.f32 %v1741_v10, %v1597_v7  ;;  %v958_v38 = vadd.f32 %v6756_v34, %v798_v62  ;;  %v1370_v58 = vrot.slane %v9265_v40, %v6431_v48  ;;  %v963_v39 = vadd.f32 %v947_v35, %v803_v1 }
 0x111   :  { %5411 = vmatprep.mubr.msk.f32.mxu1 %vm1814_vm1, %v1794_v41  ;;  %v1102_v5 = vmul.f32 %v9267_v50, %v9266_v36  ;;  %v6971_v4 = vunpack.i.h.bf16 %v6800_v12  ;;  %v6974_v9 = vunpack.i.l.bf16 %v6800_v12  ;;  %v9270_v34 = vrot.slane %v9265_v40, %v6428_v47  ;;  %v9273_v36 = vld [vmem:[#allocation29_spill] sm:$0xff] }
 0x112   :  { %5412 = vmatmul.mubr.msk.f32.vlgmr.msra.gmra.mrb[0].mxu1 %vm1814_vm1, %v1795_v27  ;;  %v1780_v53 = vadd.f32 %v6933_v30, %v1757_v15  ;;  %v1530_v41 = vrot.slane %v9265_v40, %v6440_v51  ;;  %v1694_v1 = vrot.slane %v6673_v20, %v9245_v52  ;;  %v614_v12 = vrot.slane %v6773_v17, %v6414_v43  ;;  %v9272_v15 = vld [vmem:[#allocation51_spill] sm:$0xff] }
 0x113   :  { %9268 = vst [vmem:[#allocation50_spill] sm:$0xff] %v6971_v4  ;;  %9269 = vst [vmem:[#allocation85_spill] sm:$0xff] %v6974_v9  ;;  %v1262_v13 = vmul.f32 %v9271_v55, %v9270_v34  ;;  %v1118_v63 = vadd.f32 %v1102_v5, %v958_v38  ;;  %v758_v7 = vrot.slane %v6773_v17, %v6417_v44 }
 0x114   :  { %v6953_v42 = vpop.permute.xlu1 %5815  ;;  %v1690_v10 = vrot.slane %v9265_v40, %v9245_v52  ;;  %v1698_v24 = vrot.slane %v6659_v19, %v9245_v52  ;;  %v1796_v62 = vmax.f32 %v1780_v53, 0.0  ;;  %v1422_v38 = vmul.f32 %v9272_v15, %v1370_v58  ;;  %v9274_v19 = vld [vmem:[#allocation67_spill] sm:$0xff]  ;;  %v9275_v58 = vld [vmem:[#allocation28_spill] sm:$0xff]  ;;  %v9317_v15 = vld [vmem:[#allocation73_spill] sm:$0xff] }
 0x115   :  { %v1278_v27 = vadd.f32 %v1262_v13, %v1118_v63  ;;  %v1743_v5 = vmul.f32 %v9273_v36, %v1694_v1  ;;  %v1426_v20 = vmul.f32 %v6971_v4, %v1386_v31  ;;  %v1425_v34 = vmul.f32 %v6974_v9, %v1382_v60  ;;  %v9276_v1 = vld [vmem:[#allocation25_spill] sm:$0xff] }
 0x116   :  { %v618_v28 = vrot.slane %v6766_v11, %v6414_v43  ;;  %v762_v32 = vrot.slane %v6766_v11, %v6417_v44  ;;  %5414 = vmatprep.mubr.msk.f32.mxu1 %vm1814_vm1, %v1796_v62  ;;  %v1582_v53 = vmul.f32 %v9274_v19, %v1530_v41  ;;  %v1744_v63 = vmul.f32 %v9275_v58, %v1698_v24  ;;  %v9279_v24 = vld [vmem:[#allocation80_spill] sm:$0xff] }
 0x117   :  { %v1438_v40 = vadd.f32 %v1422_v38, %v1278_v27  ;;  %v1759_v13 = vadd.f32 %v1743_v5, %v6873_v26  ;;  %v789_v6 = vmul.f32 %v9276_v1, %v758_v7  ;;  %v918_v60 = vrot.slane %v6773_v17, %v6422_v45  ;;  %v9281_v5 = vld [vmem:[#allocation24_spill] sm:$0xff] }
 0x118   :  { %v922_v31 = vrot.slane %v6766_v11, %v6422_v45  ;;  %v7012_v4 = vunpack.i.h.bf16 %v6831_v54  ;;  %v7017_v62 = vunpack.i.l.bf16 %v6831_v54  ;;  %v645_v26 = vmul.f32 %v6849_v21, %v614_v12 }
 0x119   :  { %v5822_v35 = vpop.permute.xlu1 %5821  ;;  %v1598_v41 = vadd.f32 %v1582_v53, %v1438_v40  ;;  %v1742_v27 = vmul.f32 %v9279_v24, %v1690_v10  ;;  %v9280_v7 = vrot.slane %v6747_v14, %v6425_v46  ;;  %v790_v1 = vmul.f32 %v9281_v5, %v762_v32  ;;  %v9283_v10 = vld [vmem:[#allocation77_spill] sm:$0xff] }
 0x11a   :  { %9277 = vst [vmem:[#allocation64_spill] sm:$0xff] %v7012_v4  ;;  %9278 = vst [vmem:[#allocation95_spill] sm:$0xff] %v7017_v62  ;;  %v646_v58 = vmul.f32 %v6845_v59, %v618_v28  ;;  %v1782_v36 = vadd.f32 %v6933_v30, %v1759_v13  ;;  %v9282_v54 = vrot.slane %v6736_v37, %v6425_v46  ;;  %v7034_v53 = vunpack.i.l.bf16 %v9283_v10 }
 0x11b   :  { %v1107_v38 = vmul.f32 %v6942_v22, %v9280_v7  ;;  %v1758_v12 = vadd.f32 %v1742_v27, %v1598_v41  ;;  %v1760_v40 = vadd.f32 %v1744_v63, %v6879_v2  ;;  %v964_v21 = vadd.f32 %v948_v18, %v804_v49 }
 0x11c   :  { %v1108_v19 = vmul.f32 %v6927_v23, %v9282_v54  ;;  %9284 = vst [vmem:[#allocation77_spill] sm:$0xff] %v7034_v53  ;;  %v1441_v7 = vadd.f32 %v1425_v34, %v6939_v33  ;;  %v1442_v32 = vadd.f32 %v1426_v20, %v6946_v25  ;;  %v950_v28 = vmul.f32 %v7012_v4, %v922_v31  ;;  %v9287_v34 = vld [vmem:[#allocation37_spill] sm:$0xff]  ;;  %v9303_v4 = vld [vmem:[#allocation48_spill] sm:$0xff] }
 0x11d   :  { %v1123_v24 = vadd.f32 %v1107_v38, %v963_v39  ;;  %v805_v13 = vadd.f32 %v789_v6, %v645_v26  ;;  %v949_v5 = vmul.f32 %v7017_v62, %v918_v60  ;;  %v1781_v59 = vadd.f32 %v6933_v30, %v1758_v12  ;;  %v9285_v39 = vld [vmem:[#allocation55_spill] sm:$0xff] }
 0x11e   :  { %v7014_v9 = vpop.permute.xlu1 %5848  ;;  %v806_v41 = vadd.f32 %v790_v1, %v646_v58  ;;  %v1798_v27 = vmax.f32 %v1782_v36, 0.0  ;;  %v1542_v2 = vrot.slane %v6708_v57, %v6440_v51  ;;  %v1546_v18 = vrot.slane %v6699_v3, %v6440_v51  ;;  %v9288_v58 = vld [vmem:[#allocation36_spill] sm:$0xff] }
 0x11f   :  { %v1797_v49 = vmax.f32 %v1781_v59, 0.0  ;;  %v1783_v33 = vadd.f32 %v6933_v30, %v1760_v40  ;;  %v1230_v25 = vrot.slane %v6747_v14, %v6428_v47  ;;  %v1702_v6 = vrot.slane %v6708_v57, %v9245_v52  ;;  %v9293_v40 = vld [vmem:[#allocation87_spill] sm:$0xff] }
 0x120   :  { %v7051_v20 = vunpack.i.l.bf16 %v9285_v39  ;;  %v1585_v36 = vmul.f32 %v9287_v34, %v1542_v2  ;;  %v1586_v63 = vmul.f32 %v9288_v58, %v1546_v18  ;;  %v1706_v1 = vrot.slane %v6699_v3, %v9245_v52  ;;  %v9292_v3 = vld [vmem:[#allocation88_spill] sm:$0xff] }
 0x121   :  { %v1124_v60 = vadd.f32 %v1108_v19, %v964_v21  ;;  %v7057_v59 = vadd.f32 %v949_v5, %v805_v13  ;;  %5415 = vmatmul.mubr.msk.f32.gmra.mrb[2].mxu1 %vm1814_vm1, %v1797_v49  ;;  %v7060_v31 = vunpack.i.h.bf16 %v5822_v35  ;;  %v7062_v26 = vunpack.i.l.bf16 %v5822_v35 }
 0x122   :  { %9286 = vst [vmem:[#allocation55_spill] sm:$0xff] %v7051_v20  ;;  %v7064_v57 = vadd.f32 %v950_v28, %v806_v41  ;;  %5417 = vmatprep.mubr.msk.f32.mxu1 %vm1814_vm1, %v1798_v27  ;;  %v1234_v38 = vrot.slane %v6736_v37, %v6428_v47  ;;  %v7070_v12 = vunpack.i.h.bf16 %v9285_v39  ;;  %v622_v21 = vrot.slane %v9292_v3, %v6414_v43 }
 0x123   :  { %v5855_v54 = vpop.permute.xlu1 %5854  ;;  %9289 = vst [vmem:[#allocation96_spill] sm:$0xff] %v7060_v31  ;;  %9290 = vst [vmem:[#allocation97_spill] sm:$0xff] %v7062_v26  ;;  %v1799_v5 = vmax.f32 %v1783_v33, 0.0  ;;  %v626_v35 = vrot.slane %v9293_v40, %v6414_v43  ;;  %v1746_v10 = vmul.f32 %v7060_v31, %v1706_v1  ;;  %v1745_v28 = vmul.f32 %v7062_v26, %v1702_v6  ;;  %v9316_v26 = vld [vmem:[#allocation74_spill] sm:$0xff] }
 0x124   :  { %9291 = vst [vmem:[#allocation98_spill] sm:$0xff] %v7070_v12  ;;  %v1267_v13 = vmul.f32 %v7051_v20, %v1230_v25  ;;  %v7082_v41 = vunpack.i.h.bf16 %v6893_v0  ;;  %v1601_v27 = vadd.f32 %v1585_v36, %v1441_v7  ;;  %v1602_v2 = vadd.f32 %v1586_v63, %v1442_v32 }
 0x125   :  { %5418 = vmatmul.mubr.msk.f32.gmra.mrb[4].mxu1 %vm1814_vm1, %v1799_v5  ;;  %v766_v18 = vrot.slane %v9292_v3, %v6417_v44  ;;  %v770_v49 = vrot.slane %v9293_v40, %v6417_v44  ;;  %v7090_v33 = vunpack.i.h.bf16 %v6924_v61  ;;  %v7093_v6 = vunpack.i.l.bf16 %v6924_v61 }
 0x126   :  { %9294 = vst [vmem:[#allocation88_spill] sm:$0xff] %v7082_v41  ;;  %v1268_v25 = vmul.f32 %v7070_v12, %v1234_v38  ;;  %v7097_v39 = vunpack.i.l.bf16 %v6893_v0  ;;  %v1761_v7 = vadd.f32 %v1745_v28, %v1601_v27  ;;  %v1762_v32 = vadd.f32 %v1746_v10, %v1602_v2 }
 0x127   :  { %9295 = vst [vmem:[#allocation87_spill] sm:$0xff] %v7090_v33  ;;  %9296 = vst [vmem:[#allocation99_spill] sm:$0xff] %v7093_v6  ;;  %v1390_v36 = vrot.slane %v6747_v14, %v6431_v48  ;;  %v1394_v63 = vrot.slane %v6736_v37, %v6431_v48  ;;  %v7104_v1 = vunpack.i.h.bf16 %v6953_v42  ;;  %v7107_v5 = vunpack.i.l.bf16 %v6953_v42 }
 0x128   :  { %v7074_v19 = vpop.permute.xlu1 %5871  ;;  %9297 = vst [vmem:[#allocation100_spill] sm:$0xff] %v7097_v39  ;;  %v1283_v23 = vadd.f32 %v1267_v13, %v1123_v24  ;;  %v648_v38 = vmul.f32 %v7082_v41, %v626_v35  ;;  %v1078_v0 = vrot.slane %v6773_v17, %v6425_v46  ;;  %v1082_v10 = vrot.slane %v6766_v11, %v6425_v46 }
 0x129   :  { %9298 = vst [vmem:[#allocation101_spill] sm:$0xff] %v7104_v1  ;;  %9299 = vst [vmem:[#allocation102_spill] sm:$0xff] %v7107_v5  ;;  %v792_v28 = vmul.f32 %v7090_v33, %v770_v49  ;;  %v791_v27 = vmul.f32 %v7093_v6, %v766_v18  ;;  %v1550_v2 = vrot.slane %v6747_v14, %v6440_v51  ;;  %v7120_v12 = vunpack.i.h.bf16 %v5855_v54  ;;  %v9302_v6 = vld [vmem:[#allocation49_spill] sm:$0xff] }
 0x12a   :  { %v1554_v42 = vrot.slane %v6736_v37, %v6440_v51  ;;  %v7122_v24 = vunpack.i.l.bf16 %v5855_v54  ;;  %v1784_v35 = vadd.f32 %v6933_v30, %v1761_v7  ;;  %v1785_v13 = vadd.f32 %v6933_v30, %v1762_v32 }
 0x12b   :  { %9300 = vst [vmem:[#allocation103_spill] sm:$0xff] %v7120_v12  ;;  %v1284_v41 = vadd.f32 %v1268_v25, %v1124_v60  ;;  %v647_v62 = vmul.f32 %v7097_v39, %v622_v21  ;;  %v1428_v49 = vmul.f32 %v7104_v1, %v1394_v63  ;;  %v1427_v18 = vmul.f32 %v7107_v5, %v1390_v36  ;;  %v5901_v36 = vpop.permute.xlu0 %5900 }
 0x12c   :  { %9301 = vst [vmem:[#allocation104_spill] sm:$0xff] %v7122_v24  ;;  %v1109_v33 = vmul.f32 %v9302_v6, %v1078_v0  ;;  %v1110_v20 = vmul.f32 %v9303_v4, %v1082_v10  ;;  %v1800_v22 = vmax.f32 %v1784_v35, 0.0  ;;  %v1801_v31 = vmax.f32 %v1785_v13, 0.0 }
 0x12d   :  { %v5878_v61 = vpop.permute.xlu1 %5877  ;;  %v1238_v54 = vrot.slane %v6773_v17, %v6428_v47  ;;  %v1242_v7 = vrot.slane %v6766_v11, %v6428_v47  ;;  %v7136_v60 = vunpack.i.h.bf16 %v7014_v9  ;;  %v7139_v21 = vunpack.i.l.bf16 %v7014_v9 }
 0x12e   :  { %v7141_v25 = vadd.f32 %v791_v27, %v647_v62  ;;  %v7143_v32 = vadd.f32 %v792_v28, %v648_v38  ;;  %v1588_v63 = vmul.f32 %v7120_v12, %v1554_v42  ;;  %v1587_v0 = vmul.f32 %v7122_v24, %v1550_v2  ;;  %5420 = vmatprep.mubr.msk.f32.mxu1 %vm1814_vm1, %v1800_v22 }
 0x12f   :  { %9304 = vst [vmem:[#allocation105_spill] sm:$0xff] %v7136_v60  ;;  %9305 = vst [vmem:[#allocation106_spill] sm:$0xff] %v7139_v21  ;;  %v1443_v10 = vadd.f32 %v1427_v18, %v1283_v23  ;;  %v1444_v35 = vadd.f32 %v1428_v49, %v1284_v41  ;;  %v1246_v13 = vrot.slane %v9292_v3, %v6428_v47  ;;  %5421 = vmatmul.mubr.msk.f32.gmra.mrb[6].mxu1 %vm1814_vm1, %v1801_v31 }
 0x130   :  { %v1250_v9 = vrot.slane %v9293_v40, %v6428_v47  ;;  %v1125_v62 = vadd.f32 %v1109_v33, %v7057_v59  ;;  %v1126_v38 = vadd.f32 %v1110_v20, %v7064_v57  ;;  %v1398_v28 = vrot.slane %v6773_v17, %v6431_v48  ;;  %v9308_v20 = vld [vmem:[#allocation92_spill] sm:$0xff]  ;;  %v9309_v33 = vld [vmem:[#allocation91_spill] sm:$0xff] }
 0x131   :  { %v1402_v22 = vrot.slane %v6766_v11, %v6431_v48  ;;  %v1270_v23 = vmul.f32 %v7136_v60, %v1242_v7  ;;  %v1269_v41 = vmul.f32 %v7139_v21, %v1238_v54  ;;  %v7161_v27 = vunpack.i.h.bf16 %v5901_v36 }
 0x132   :  { %v5884_v58 = vpop.permute.xlu1 %5883  ;;  %v7163_v2 = vunpack.i.l.bf16 %v5901_v36  ;;  %v1603_v31 = vadd.f32 %v1587_v0, %v1443_v10  ;;  %v1604_v59 = vadd.f32 %v1588_v63, %v1444_v35  ;;  %v630_v57 = vrot.slane %v9308_v20, %v6414_v43 }
 0x133   :  { %9306 = vst [vmem:[#allocation107_spill] sm:$0xff] %v7161_v27  ;;  %v634_v49 = vrot.slane %v9309_v33, %v6414_v43  ;;  %v774_v18 = vrot.slane %v9308_v20, %v6417_v44  ;;  %v778_v54 = vrot.slane %v9309_v33, %v6417_v44  ;;  %v7176_v7 = vunpack.i.h.bf16 %v7074_v19 }
 0x134   :  { %9307 = vst [vmem:[#allocation108_spill] sm:$0xff] %v7163_v2  ;;  %v7179_v36 = vunpack.i.l.bf16 %v7074_v19  ;;  %v1710_v63 = vrot.slane %v6747_v14, %v9245_v52  ;;  %v1714_v0 = vrot.slane %v6736_v37, %v9245_v52  ;;  %v7185_v10 = vunpack.i.h.bf16 %v5884_v58 }
 0x135   :  { %9310 = vst [vmem:[#allocation92_spill] sm:$0xff] %v7176_v7  ;;  %v7187_v35 = vunpack.i.l.bf16 %v5884_v58  ;;  %v926_v39 = vrot.slane %v9292_v3, %v6422_v45  ;;  %v930_v60 = vrot.slane %v9293_v40, %v6422_v45  ;;  %v1086_v19 = vrot.slane %v9292_v3, %v6425_v46 }
 0x136   :  { %9311 = vst [vmem:[#allocation91_spill] sm:$0xff] %v7179_v36  ;;  %9312 = vst [vmem:[#allocation109_spill] sm:$0xff] %v7185_v10  ;;  %v1090_v4 = vrot.slane %v9293_v40, %v6425_v46  ;;  %v7197_v14 = vunpack.i.h.bf16 %v5878_v61  ;;  %v7199_v21 = vunpack.i.l.bf16 %v5878_v61  ;;  %v1748_v37 = vmul.f32 %v7185_v10, %v1714_v0  ;;  %v9318_v0 = vld [vmem:[#allocation59_spill] sm:$0xff] }
 0x137   :  { %v7165_v42 = vpop.permute.xlu1 %5889  ;;  %9313 = vst [vmem:[#allocation110_spill] sm:$0xff] %v7187_v35  ;;  %v1747_v58 = vmul.f32 %v7187_v35, %v1710_v63  ;;  %v1285_v6 = vadd.f32 %v1269_v41, %v1125_v62  ;;  %v1286_v1 = vadd.f32 %v1270_v23, %v1126_v38  ;;  %v1430_v24 = vmul.f32 %v7161_v27, %v1402_v22  ;;  %v9319_v63 = vld [vmem:[#allocation58_spill] sm:$0xff]  ;;  %v5918_v23 = vpop.permute.xlu0 %5917 }
 0x138   :  { %9314 = vst [vmem:[#allocation111_spill] sm:$0xff] %v7197_v14  ;;  %9315 = vst [vmem:[#allocation112_spill] sm:$0xff] %v7199_v21  ;;  %v1429_v5 = vmul.f32 %v7163_v2, %v1398_v28  ;;  %v649_v34 = vmul.f32 %v9316_v26, %v630_v57  ;;  %v650_v55 = vmul.f32 %v9317_v15, %v634_v49  ;;  %v7227_v57 = vunpack.i.l.bf16 %v5918_v23 }
 0x139   :  { %v1763_v50 = vadd.f32 %v1747_v58, %v1603_v31  ;;  %v1764_v8 = vadd.f32 %v1748_v37, %v1604_v59  ;;  %v794_v61 = vmul.f32 %v7176_v7, %v778_v54  ;;  %v793_v56 = vmul.f32 %v7179_v36, %v774_v18  ;;  %v9324_v54 = vld [vmem:[#allocation82_spill] sm:$0xff] }
 0x13a   :  { %v951_v10 = vmul.f32 %v9318_v0, %v926_v39  ;;  %v952_v35 = vmul.f32 %v9319_v63, %v930_v60  ;;  %v1112_v62 = vmul.f32 %v7197_v14, %v1090_v4  ;;  %v1111_v38 = vmul.f32 %v7199_v21, %v1086_v19  ;;  %9323 = vst [vmem:[#allocation116_spill] sm:$0xff] %v7227_v57 }
 0x13b   :  { %v1406_v28 = vrot.slane %v9292_v3, %v6431_v48  ;;  %v1410_v22 = vrot.slane %v9293_v40, %v6431_v48  ;;  %v1558_v41 = vrot.slane %v6773_v17, %v6440_v51  ;;  %v1562_v31 = vrot.slane %v6766_v11, %v6440_v51 }
 0x13c   :  { %v5907_v12 = vpop.permute.xlu1 %5906  ;;  %v7225_v59 = vunpack.i.h.bf16 %v5918_v23  ;;  %v1786_v49 = vadd.f32 %v6933_v30, %v1763_v50  ;;  %v1787_v18 = vadd.f32 %v6933_v30, %v1764_v8  ;;  %v1272_v19 = vmul.f32 %v9324_v54, %v1250_v9  ;;  %v9374_v54 = vld [vmem:[#allocation68_spill] sm:$0xff] }
 0x13d   :  { %v7221_v39 = vunpack.i.h.bf16 %v5907_v12  ;;  %v7223_v60 = vunpack.i.l.bf16 %v5907_v12  ;;  %v1271_v37 = vmul.f32 %v7034_v53, %v1246_v13  ;;  %v1445_v58 = vadd.f32 %v1429_v5, %v1285_v6 }
 0x13e   :  { %9322 = vst [vmem:[#allocation115_spill] sm:$0xff] %v7225_v59  ;;  %v1446_v14 = vadd.f32 %v1430_v24, %v1286_v1  ;;  %v967_v21 = vadd.f32 %v951_v10, %v7141_v25  ;;  %v968_v12 = vadd.f32 %v952_v35, %v7143_v32  ;;  %v1802_v27 = vmax.f32 %v1786_v49, 0.0 }
 0x13f   :  { %9320 = vst [vmem:[#allocation113_spill] sm:$0xff] %v7221_v39  ;;  %9321 = vst [vmem:[#allocation114_spill] sm:$0xff] %v7223_v60  ;;  %v1803_v36 = vmax.f32 %v1787_v18, 0.0  ;;  %v810_v26 = vadd.f32 %v794_v61, %v650_v55  ;;  %v809_v7 = vadd.f32 %v793_v56, %v649_v34  ;;  %v1590_v23 = vmul.f32 %v7221_v39, %v1562_v31 }
 0x140   :  { %v1589_v50 = vmul.f32 %v7223_v60, %v1558_v41  ;;  %v1127_v15 = vadd.f32 %v1111_v38, %v967_v21  ;;  %v1128_v8 = vadd.f32 %v1112_v62, %v968_v12  ;;  %v1432_v9 = vmul.f32 %v7225_v59, %v1410_v22  ;;  %5423 = vmatprep.mubr.msk.f32.mxu1 %vm1814_vm1, %v1802_v27 }
 0x141   :  { %v5913_v4 = vpop.permute.xlu1 %5912  ;;  %v1431_v13 = vmul.f32 %v7227_v57, %v1406_v28  ;;  %5424 = vmatmul.mubr.msk.f32.gmra.mrb[8].mxu1 %vm1814_vm1, %v1803_v36  ;;  %v1718_v1 = vrot.slane %v6773_v17, %v9245_v52  ;;  %v1722_v56 = vrot.slane %v6766_v11, %v9245_v52  ;;  %v934_v5 = vrot.slane %v9308_v20, %v6422_v45  ;;  %v9376_v57 = vld [vmem:[#allocation30_spill] sm:$0xff] }
 0x142   :  { %v938_v24 = vrot.slane %v9309_v33, %v6422_v45  ;;  %v7254_v21 = vunpack.i.h.bf16 %v7165_v42  ;;  %v7257_v25 = vunpack.i.l.bf16 %v7165_v42  ;;  %v1605_v17 = vadd.f32 %v1589_v50, %v1445_v58  ;;  %v5936_v42 = vpop.permute.xlu0 %5935 }
 0x143   :  { %v1606_v32 = vadd.f32 %v1590_v23, %v1446_v14  ;;  %v1566_v36 = vrot.slane %v9292_v3, %v6440_v51  ;;  %v1570_v10 = vrot.slane %v9293_v40, %v6440_v51  ;;  %v1094_v35 = vrot.slane %v9308_v20, %v6425_v46 }
 0x144   :  { %9327 = vst [vmem:[#allocation119_spill] sm:$0xff] %v7254_v21  ;;  %9328 = vst [vmem:[#allocation120_spill] sm:$0xff] %v7257_v25  ;;  %v1098_v61 = vrot.slane %v9309_v33, %v6425_v46  ;;  %v7269_v62 = vunpack.i.h.bf16 %v5913_v4  ;;  %v7271_v14 = vunpack.i.l.bf16 %v5913_v4  ;;  %v954_v41 = vmul.f32 %v7254_v21, %v938_v24 }
 0x145   :  { %v953_v31 = vmul.f32 %v7257_v25, %v934_v5  ;;  %v1254_v49 = vrot.slane %v9308_v20, %v6428_v47  ;;  %v1258_v18 = vrot.slane %v9309_v33, %v6428_v47  ;;  %v1287_v50 = vadd.f32 %v1271_v37, %v1127_v15 }
 0x146   :  { %v5924_v6 = vpop.permute.xlu1 %5923  ;;  %9329 = vst [vmem:[#allocation121_spill] sm:$0xff] %v7269_v62  ;;  %9330 = vst [vmem:[#allocation122_spill] sm:$0xff] %v7271_v14  ;;  %v1114_v5 = vmul.f32 %v7269_v62, %v1098_v61  ;;  %v1113_v24 = vmul.f32 %v7271_v14, %v1094_v35  ;;  %v9369_v62 = vld [vmem:[#allocation66_spill] sm:$0xff] }
 0x147   :  { %v7245_v55 = vunpack.i.h.bf16 %v5924_v6  ;;  %v7247_v34 = vunpack.i.l.bf16 %v5924_v6  ;;  %v1288_v6 = vadd.f32 %v1272_v19, %v1128_v8  ;;  %v1447_v35 = vadd.f32 %v1431_v13, %v1287_v50 }
 0x148   :  { %v1578_v13 = vrot.slane %v9309_v33, %v6440_v51 }
 0x149   :  { %9325 = vst [vmem:[#allocation117_spill] sm:$0xff] %v7245_v55  ;;  %9326 = vst [vmem:[#allocation118_spill] sm:$0xff] %v7247_v34  ;;  %v1750_v11 = vmul.f32 %v7245_v55, %v1722_v56  ;;  %v1749_v27 = vmul.f32 %v7247_v34, %v1718_v1  ;;  %v7285_v1 = vunpack.i.h.bf16 %v5936_v42  ;;  %v7287_v56 = vunpack.i.l.bf16 %v5936_v42  ;;  %v9377_v55 = vld [vmem:[#allocation38_spill] sm:$0xff] }
 0x14b   :  { %v1765_v38 = vadd.f32 %v1749_v27, %v1605_v17  ;;  %v1766_v28 = vadd.f32 %v1750_v11, %v1606_v32  ;;  %v5930_v22 = vpop.permute.xlu1 %5929  ;;  %9333 = vst [vmem:[#allocation125_spill] sm:$0xff] %v7285_v1  ;;  %9334 = vst [vmem:[#allocation126_spill] sm:$0xff] %v7287_v56  ;;  %v969_v11 = vadd.f32 %v953_v31, %v809_v7 }
 0x14c   :  { %v7279_v58 = vunpack.i.h.bf16 %v5930_v22  ;;  %v7281_v12 = vunpack.i.l.bf16 %v5930_v22  ;;  %v970_v27 = vadd.f32 %v954_v41, %v810_v26  ;;  %v1414_v22 = vrot.slane %v9308_v20, %v6431_v48  ;;  %v5953_v26 = vpop.permute.xlu0 %5952 }
 0x14d   :  { %v1788_v4 = vadd.f32 %v6933_v30, %v1765_v38  ;;  %v1789_v23 = vadd.f32 %v6933_v30, %v1766_v28  ;;  %v1418_v38 = vrot.slane %v9309_v33, %v6431_v48  ;;  %v1448_v7 = vadd.f32 %v1432_v9, %v1288_v6 }
 0x14e   :  { %9331 = vst [vmem:[#allocation123_spill] sm:$0xff] %v7279_v58  ;;  %9332 = vst [vmem:[#allocation124_spill] sm:$0xff] %v7281_v12  ;;  %v1274_v19 = vmul.f32 %v7279_v58, %v1258_v18  ;;  %v1273_v37 = vmul.f32 %v7281_v12, %v1254_v49  ;;  %v1129_v42 = vadd.f32 %v1113_v24, %v969_v11  ;;  %v7311_v50 = vunpack.i.h.bf16 %v5953_v26  ;;  %v9371_v12 = vld [vmem:[#allocation35_spill] sm:$0xff] }
 0x14f   :  { %v1804_v17 = vmax.f32 %v1788_v4, 0.0  ;;  %v1805_v32 = vmax.f32 %v1789_v23, 0.0  ;;  %v1130_v28 = vadd.f32 %v1114_v5, %v970_v27  ;;  %v1592_v18 = vmul.f32 %v7285_v1, %v1570_v10 }
 0x150   :  { %v5942_v15 = vpop.permute.xlu1 %5941  ;;  %v1591_v49 = vmul.f32 %v7287_v56, %v1566_v36  ;;  %v1574_v4 = vrot.slane %v9308_v20, %v6440_v51  ;;  %v1289_v9 = vadd.f32 %v1273_v37, %v1129_v42  ;;  %9337 = vst [vmem:[#allocation129_spill] sm:$0xff] %v7311_v50  ;;  %v7313_v6 = vunpack.i.l.bf16 %v5953_v26 }
 0x151   :  { %v7297_v8 = vunpack.i.h.bf16 %v5942_v15  ;;  %v7299_v61 = vunpack.i.l.bf16 %v5942_v15  ;;  %5426 = vmatprep.mubr.msk.f32.mxu1 %vm1814_vm1, %v1804_v17  ;;  %v1290_v23 = vadd.f32 %v1274_v19, %v1130_v28  ;;  %v1726_v24 = vrot.slane %v9292_v3, %v9245_v52 }
 0x152   :  { %5427 = vmatmul.mubr.msk.f32.gmra.mrb[10].mxu1 %vm1814_vm1, %v1805_v32  ;;  %9338 = vst [vmem:[#allocation130_spill] sm:$0xff] %v7313_v6  ;;  %v1730_v10 = vrot.slane %v9293_v40, %v9245_v52  ;;  %v1607_v27 = vadd.f32 %v1591_v49, %v1447_v35  ;;  %v1594_v19 = vmul.f32 %v7311_v50, %v1578_v13 }
 0x153   :  { %9335 = vst [vmem:[#allocation127_spill] sm:$0xff] %v7297_v8  ;;  %9336 = vst [vmem:[#allocation128_spill] sm:$0xff] %v7299_v61  ;;  %v1434_v41 = vmul.f32 %v7297_v8, %v1418_v38  ;;  %v1433_v31 = vmul.f32 %v7299_v61, %v1414_v22  ;;  %v1608_v22 = vadd.f32 %v1592_v18, %v1448_v7  ;;  %v9370_v61 = vld [vmem:[#allocation27_spill] sm:$0xff] }
 0x154   :  { %v1593_v37 = vmul.f32 %v7313_v6, %v1574_v4  ;;  %v1734_v3 = vrot.slane %v9308_v20, %v9245_v52  ;;  %v1738_v40 = vrot.slane %v9309_v33, %v9245_v52 }
 0x155   :  { %v5948_v5 = vpop.permute.xlu1 %5947  ;;  %v1449_v32 = vadd.f32 %v1433_v31, %v1289_v9  ;;  %v1450_v11 = vadd.f32 %v1434_v41, %v1290_v23 }
 0x156   :  { %v7319_v36 = vunpack.i.h.bf16 %v5948_v5  ;;  %v7321_v17 = vunpack.i.l.bf16 %v5948_v5 }
 0x157   :  { %v1609_v7 = vadd.f32 %v1593_v37, %v1449_v32  ;;  %v1610_v31 = vadd.f32 %v1594_v19, %v1450_v11  ;;  %v2799_v11 = vld [vmem:[%s8876_s7] sm:$0xff] }
 0x158   :  { %9339 = vst [vmem:[#allocation131_spill] sm:$0xff] %v7319_v36  ;;  %9340 = vst [vmem:[#allocation132_spill] sm:$0xff] %v7321_v17  ;;  %v1752_v38 = vmul.f32 %v7319_v36, %v1730_v10  ;;  %v1751_v15 = vmul.f32 %v7321_v17, %v1726_v24  ;;  %v91_v19 = vld [vmem:[%s9343_s2] sm:$0xff]  ;;  %s6041_s2 = smov 48  }
 0x159   :  { %v5958_v26 = vpop.permute.xlu1 %5957  ;;  %v98_v37 = vrot.slane %v91_v19, %v6414_v43  ;;  %5963 = vrcp.f32 %v91_v19 }
 0x15a   :  { %v1767_v42 = vadd.f32 %v1751_v15, %v1607_v27  ;;  %v1768_v28 = vadd.f32 %v1752_v38, %v1608_v22  ;;  %v7331_v41 = vunpack.i.h.bf16 %v5958_v26  ;;  %v7333_v35 = vunpack.i.l.bf16 %v5958_v26  ;;  %v2800_v27 = vld [vmem:[%s8876_s7 + $0x8] sm:$0xff]  ;;  %v2802_v38 = vld [vmem:[%s8876_s7 + $0x18] sm:$0xff] }
 0x15b   :  { %v5509_v22 = vpack.c.bf16 %v2800_v27, %v2799_v11  ;;  %100 = vbcast.lane.b32.xlu0 %v98_v37, 256  ;;  %v133_v26 = vrot.slane %v91_v19, %v6431_v48  ;;  %v9347_v27 = vld [vmem:[#allocation7_spill] sm:$0xff] }
 0x15c   :  { %9341 = vst [vmem:[#allocation133_spill] sm:$0xff] %v7331_v41  ;;  %9342 = vst [vmem:[#allocation134_spill] sm:$0xff] %v7333_v35  ;;  %v1754_v18 = vmul.f32 %v7331_v41, %v1738_v40  ;;  %v1753_v49 = vmul.f32 %v7333_v35, %v1734_v3  ;;  %v1790_v4 = vadd.f32 %v6933_v30, %v1767_v42  ;;  %v9368_v35 = vld [vmem:[#allocation34_spill] sm:$0xff] }
 0x15d   :  { %v1791_v20 = vadd.f32 %v6933_v30, %v1768_v28  ;;  %5510 = vmatprep.subr.bf16.mxu0 %v5509_v22  ;;  %v105_v3 = vrot.slane %v91_v19, %v6417_v44  ;;  %v126_v40 = vrot.slane %v91_v19, %v6428_v47  ;;  %v112_v42 = vrot.slane %v91_v19, %v6422_v45 }
 0x15e   :  { %v1769_v13 = vadd.f32 %v1753_v49, %v1609_v7  ;;  %v1770_v9 = vadd.f32 %v1754_v18, %v1610_v31  ;;  %v1806_v33 = vmax.f32 %v1790_v4, 0.0  ;;  %5512 = vmatpush3.bf16.msra.mxu0 %v5509_v22  ;;  %v140_v28 = vrot.slane %v91_v19, %v6440_v51 }
 0x15f   :  { %v1807_v23 = vmax.f32 %v1791_v20, 0.0  ;;  %107 = vbcast.lane.b32.xlu1 %v105_v3, 256  ;;  %128 = vbcast.lane.b32.xlu0 %v126_v40, 256  ;;  %v119_v7 = vrot.slane %v91_v19, %v6425_v46  ;;  %v147_v18 = vrot.slane %v91_v19, %v9245_v52  ;;  %v9348_v3 = vld [vmem:[#allocation40_spill] sm:$0xff] }
 0x160   :  { %5429 = vmatprep.mubr.msk.f32.mxu1 %vm1814_vm1, %v1806_v33  ;;  %v1792_v5 = vadd.f32 %v6933_v30, %v1769_v13  ;;  %v1793_v24 = vadd.f32 %v6933_v30, %v1770_v9  ;;  %v2801_v30 = vld [vmem:[%s8876_s7 + $0x10] sm:$0xff] }
 0x161   :  { %5430 = vmatmul.mubr.msk.f32.gmra.mrb[12].mxu1 %vm1814_vm1, %v1807_v23  ;;  %v5513_v15 = vpack.c.bf16 %v2802_v38, %v2801_v30 }
 0x162   :  { %v1808_v10 = vmax.f32 %v1792_v5, 0.0  ;;  %v1809_v32 = vmax.f32 %v1793_v24, 0.0  ;;  %v9345_v5 = vld [vmem:[#allocation62_spill] sm:$0xff] }
 0x163   :  { %5514 = vmatprep.subr.bf16.mxu0 %v5513_v15  ;;  %135 = vbcast.lane.b32.xlu1 %v133_v26, 256  ;;  %v7367_v31 = vpop.eup %5963 }
 0x164   :  { %5432 = vmatprep.mubr.msk.f32.mxu1 %vm1814_vm1, %v1808_v10  ;;  %5516 = vmatpush3.bf16.msra.mxu0 %v5513_v15  ;;  %9344 = vst [vmem:[#allocation135_spill] sm:$0xff] %v7367_v31  ;;  %v3903_v23 = vrot.slane %v7367_v31, %v6414_v43  ;;  %v9346_v10 = vld [vmem:[#allocation20_spill] sm:$0xff]  ;;  %v3931_v11 = vrot.slane %v7367_v31, %v6428_v47 }
 0x165   :  { %5433 = vmatmul.mubr.msk.f32.gmra.mrb[14].mxu1 %vm1814_vm1, %v1809_v32  ;;  %114 = vbcast.lane.b32.xlu0 %v112_v42, 256  ;;  %v3910_v42 = vrot.slane %v7367_v31, %v6417_v44 }
 0x167   :  { %142 = vbcast.lane.b32.xlu1 %v140_v28, 256 }
 0x169   :  { %121 = vbcast.lane.b32.xlu0 %v119_v7, 256  ;;  %v9349_v7 = vld [vmem:[#allocation63_spill] sm:$0xff] }
 0x16b   :  { %149 = vbcast.lane.b32.xlu1 %v147_v18, 256 }
 0x16d   :  { %3905 = vbcast.lane.b32.xlu0 %v3903_v23, 256  ;;  %v9352_v23 = vld [vmem:[#allocation8_spill] sm:$0xff] }
 0x16f   :  { %3933 = vbcast.lane.b32.xlu1 %v3931_v11, 256 }
 0x171   :  { %3912 = vbcast.lane.b32.xlu0 %v3910_v42, 256 }
 0x1e5   :  { %v5413_v49 = vpop.f32.mrb[0].mxu1 }
 0x1e6   :  { %v2015_v4 = vrot.slane %v5413_v49, %v6414_v43  ;;  %v2095_v20 = vrot.slane %v5413_v49, %v6417_v44  ;;  %v2191_v13 = vrot.slane %v5413_v49, %v6422_v45  ;;  %v1929_v9 = vpop.f32.mrb[1].mxu1  ;;  %v2287_v33 = vrot.slane %v5413_v49, %v6425_v46 }
 0x1e7   :  { %v2383_v22 = vrot.slane %v5413_v49, %v6428_v47  ;;  %v2011_v15 = vrot.slane %v1929_v9, %v6414_v43  ;;  %v2091_v19 = vrot.slane %v1929_v9, %v6417_v44  ;;  %v2187_v37 = vrot.slane %v1929_v9, %v6422_v45 }
 0x1e8   :  { %v2073_v24 = vmul.f32 %v9345_v5, %v2015_v4  ;;  %v2153_v32 = vmul.f32 %v9346_v10, %v2095_v20  ;;  %v2249_v30 = vmul.f32 %v9347_v27, %v2191_v13  ;;  %v2345_v40 = vmul.f32 %v9348_v3, %v2287_v33  ;;  %v9350_v4 = vld [vmem:[#allocation21_spill] sm:$0xff] }
 0x1e9   :  { %v2479_v26 = vrot.slane %v5413_v49, %v6431_v48  ;;  %v2072_v18 = vmul.f32 %v9349_v7, %v2011_v15  ;;  %v2152_v20 = vmul.f32 %v9350_v4, %v2091_v19  ;;  %v2283_v13 = vrot.slane %v1929_v9, %v6425_v46  ;;  %v9354_v7 = vld [vmem:[#allocation41_spill] sm:$0xff] }
 0x1ea   :  { %v2169_v38 = vadd.f32 %v2153_v32, %v2073_v24  ;;  %v9351_v24 = vld [vmem:[#allocation22_spill] sm:$0xff]  ;;  %v2575_v27 = vrot.slane %v5413_v49, %v6440_v51  ;;  %v3917_v33 = vrot.slane %v7367_v31, %v6422_v45  ;;  %v2248_v10 = vmul.f32 %v9352_v23, %v2187_v37  ;;  %v9355_v23 = vld [vmem:[#allocation23_spill] sm:$0xff] }
 0x1eb   :  { %v2441_v32 = vmul.f32 %v9351_v24, %v2383_v22  ;;  %v2379_v5 = vrot.slane %v1929_v9, %v6428_v47  ;;  %v2671_v19 = vrot.slane %v5413_v49, %v9245_v52  ;;  %v2475_v4 = vrot.slane %v1929_v9, %v6431_v48 }
 0x1ec   :  { %v2265_v28 = vadd.f32 %v2249_v30, %v2169_v38  ;;  %v2168_v30 = vadd.f32 %v2152_v20, %v2072_v18  ;;  %v9353_v38 = vld [vmem:[#allocation12_spill] sm:$0xff]  ;;  %v2571_v11 = vrot.slane %v1929_v9, %v6440_v51  ;;  %v2344_v41 = vmul.f32 %v9354_v7, %v2283_v13  ;;  %3919 = vbcast.lane.b32.xlu0 %v3917_v33, 256  ;;  %v9358_v13 = vld [vmem:[#allocation33_spill] sm:$0xff] }
 0x1ed   :  { %v2537_v15 = vmul.f32 %v9353_v38, %v2479_v26  ;;  %v2440_v50 = vmul.f32 %v9355_v23, %v2379_v5  ;;  %v9356_v18 = vld [vmem:[#allocation32_spill] sm:$0xff]  ;;  %v2729_v26 = vmul.f32 %v9257_v16, %v2671_v19  ;;  %v3924_v49 = vrot.slane %v7367_v31, %v6425_v46  ;;  %v9362_v16 = vld [vmem:[#allocation18_spill] sm:$0xff]  ;;  %v9365_v23 = vld [vmem:[#allocation19_spill] sm:$0xff] }
 0x1ee   :  { %v2361_v3 = vadd.f32 %v2345_v40, %v2265_v28  ;;  %v2264_v24 = vadd.f32 %v2248_v10, %v2168_v30  ;;  %v2667_v40 = vrot.slane %v1929_v9, %v9245_v52  ;;  %v2633_v20 = vmul.f32 %v9356_v18, %v2575_v27  ;;  %v9357_v10 = vld [vmem:[#allocation13_spill] sm:$0xff] }
 0x1ef   :  { %v2536_v42 = vmul.f32 %v9357_v10, %v2475_v4  ;;  %v9359_v9 = vld [vmem:[#allocation57_spill] sm:$0xff] }
 0x1f0   :  { %v2457_v22 = vadd.f32 %v2441_v32, %v2361_v3  ;;  %v2360_v37 = vadd.f32 %v2344_v41, %v2264_v24  ;;  %v2632_v32 = vmul.f32 %v9358_v13, %v2571_v11  ;;  %v2728_v30 = vmul.f32 %v9359_v9, %v2667_v40  ;;  %v9360_v11 = vld [vmem:[#allocation10_spill] sm:$0xff]  ;;  %3926 = vbcast.lane.b32.xlu0 %v3924_v49, 256  ;;  %v9364_v13 = vld [vmem:[#allocation15_spill] sm:$0xff] }
 0x1f1   :  { %v9361_v40 = vld [vmem:[#allocation14_spill] sm:$0xff] }
 0x1f2   :  { %v2553_v28 = vadd.f32 %v2537_v15, %v2457_v22  ;;  %v2456_v3 = vadd.f32 %v2440_v50, %v2360_v37 }
 0x1f4   :  { %v7409_v38 = vpop.f32.mrb[2].mxu1  ;;  %v2649_v33 = vadd.f32 %v2633_v20, %v2553_v28  ;;  %v9363_v28 = vld [vmem:[#allocation11_spill] sm:$0xff] }
 0x1f5   :  { %v2023_v41 = vrot.slane %v7409_v38, %v6414_v43  ;;  %v2103_v5 = vrot.slane %v7409_v38, %v6417_v44  ;;  %v2199_v27 = vrot.slane %v7409_v38, %v6422_v45  ;;  %v1939_v24 = vpop.f32.mrb[3].mxu1  ;;  %v2295_v50 = vrot.slane %v7409_v38, %v6425_v46 }
 0x1f6   :  { %v2019_v4 = vrot.slane %v1939_v24, %v6414_v43  ;;  %v2099_v15 = vrot.slane %v1939_v24, %v6417_v44  ;;  %v2195_v19 = vrot.slane %v1939_v24, %v6422_v45  ;;  %v2391_v18 = vrot.slane %v7409_v38, %v6428_v47 }
 0x1f7   :  { %v2075_v22 = vmul.f32 %v9360_v11, %v2023_v41  ;;  %v2155_v37 = vmul.f32 %v9361_v40, %v2103_v5  ;;  %v2251_v9 = vmul.f32 %v9362_v16, %v2199_v27  ;;  %v2291_v31 = vrot.slane %v1939_v24, %v6425_v46  ;;  %v9367_v40 = vld [vmem:[#allocation26_spill] sm:$0xff] }
 0x1f8   :  { %v2074_v20 = vmul.f32 %v9363_v28, %v2019_v4  ;;  %v2154_v10 = vmul.f32 %v9364_v13, %v2099_v15  ;;  %v2250_v7 = vmul.f32 %v9365_v23, %v2195_v19  ;;  %v7434_v8 = vpop.f32.mrb[4].mxu1  ;;  %v2387_v41 = vrot.slane %v1939_v24, %v6428_v47  ;;  %v9366_v13 = vld [vmem:[#allocation65_spill] sm:$0xff] }
 0x1f9   :  { %v2031_v5 = vrot.slane %v7434_v8, %v6414_v43  ;;  %v2111_v27 = vrot.slane %v7434_v8, %v6417_v44  ;;  %v2207_v49 = vrot.slane %v7434_v8, %v6422_v45  ;;  %v7443_v4 = vpop.f32.mrb[5].mxu1  ;;  %v2399_v6 = vrot.slane %v7434_v8, %v6428_v47 }
 0x1fa   :  { %v2027_v19 = vrot.slane %v7443_v4, %v6414_v43  ;;  %v2107_v16 = vrot.slane %v7443_v4, %v6417_v44  ;;  %v2203_v23 = vrot.slane %v7443_v4, %v6422_v45  ;;  %v2299_v14 = vrot.slane %v7443_v4, %v6425_v46 }
 0x1fb   :  { %v2077_v28 = vmul.f32 %v9366_v13, %v2031_v5  ;;  %v2157_v11 = vmul.f32 %v9367_v40, %v2111_v27  ;;  %v2253_v58 = vmul.f32 %v9368_v35, %v2207_v49  ;;  %v2395_v17 = vrot.slane %v7443_v4, %v6428_v47  ;;  %v7468_v27 = vld [vmem:[%s8875_s6] ss:$0 sm:$0xff]  ;;  %v9372_v40 = vld [vmem:[#allocation31_spill] sm:$0xff] }
 0x1fc   :  { %v2076_v15 = vmul.f32 %v9369_v62, %v2027_v19  ;;  %v2156_v36 = vmul.f32 %v9370_v61, %v2107_v16  ;;  %v2252_v1 = vmul.f32 %v9371_v12, %v2203_v23  ;;  %v2552_v5 = vadd.f32 %v2536_v42, %v2456_v3  ;;  %v9373_v13 = vld [vmem:[#allocation39_spill] sm:$0xff] }
 0x1fd   :  { %v2745_v49 = vadd.f32 %v2729_v26, %v2649_v33  ;;  %v2170_v35 = vadd.f32 %v2154_v10, %v2074_v20  ;;  %v2346_v19 = vmul.f32 %v9372_v40, %v2291_v31  ;;  %v2483_v16 = vrot.slane %v1939_v24, %v6431_v48  ;;  %v9375_v10 = vld [vmem:[#allocation81_spill] sm:$0xff] }
 0x1fe   :  { %v2579_v23 = vrot.slane %v1939_v24, %v6440_v51  ;;  %v2675_v12 = vrot.slane %v1939_v24, %v9245_v52  ;;  %v2648_v61 = vadd.f32 %v2632_v32, %v2552_v5  ;;  %v2442_v59 = vmul.f32 %v9373_v13, %v2387_v41  ;;  %v9379_v41 = vld [vmem:[#allocation67_spill] sm:$0xff] }
 0x1ff   :  { %v2266_v62 = vadd.f32 %v2250_v7, %v2170_v35  ;;  %v2171_v3 = vadd.f32 %v2155_v37, %v2075_v22  ;;  %v2768_v42 = vadd.f32 %v7468_v27, %v2745_v49  ;;  %v2538_v56 = vmul.f32 %v9258_v29, %v2483_v16  ;;  %v9380_v49 = vld [vmem:[#allocation45_spill] sm:$0xff] }
 0x200   :  { %v2634_v26 = vmul.f32 %v9374_v54, %v2579_v23  ;;  %v2730_v33 = vmul.f32 %v9375_v10, %v2675_v12  ;;  %v2744_v31 = vadd.f32 %v2728_v30, %v2648_v61  ;;  %v2347_v53 = vmul.f32 %v9376_v57, %v2295_v50  ;;  %v9381_v10 = vld [vmem:[#allocation80_spill] sm:$0xff]  ;;  %v9382_v29 = vld [vmem:[#allocation61_spill] sm:$0xff] }
 0x201   :  { %v2362_v20 = vadd.f32 %v2346_v19, %v2266_v62  ;;  %v2267_v40 = vadd.f32 %v2251_v9, %v2171_v3  ;;  %v2443_v24 = vmul.f32 %v9377_v55, %v2391_v18  ;;  %v2487_v35 = vrot.slane %v7409_v38, %v6431_v48  ;;  %v9378_v18 = vld [vmem:[#allocation51_spill] sm:$0xff] }
 0x202   :  { %v2583_v7 = vrot.slane %v7409_v38, %v6440_v51  ;;  %v2679_v32 = vrot.slane %v7409_v38, %v9245_v52  ;;  %v7487_v22 = vpop.f32.mrb[6].mxu1  ;;  %v2767_v12 = vadd.f32 %v7468_v27, %v2744_v31  ;;  %v2172_v9 = vadd.f32 %v2156_v36, %v2076_v15 }
 0x203   :  { %v2458_v61 = vadd.f32 %v2442_v59, %v2362_v20  ;;  %v2363_v62 = vadd.f32 %v2347_v53, %v2267_v40  ;;  %v7490_v30 = vpop.f32.mrb[7].mxu1  ;;  %v2784_v50 = vmax.f32 %v2768_v42, 0.0  ;;  %v2539_v37 = vmul.f32 %v9378_v18, %v2487_v35  ;;  %v9384_v42 = vld [vmem:[#allocation90_spill] sm:$0xff]  ;;  %v9386_v35 = vld [vmem:[#allocation44_spill] sm:$0xff] }
 0x204   :  { %v2635_v5 = vmul.f32 %v9379_v41, %v2583_v7  ;;  %v2348_v19 = vmul.f32 %v9380_v49, %v2299_v14  ;;  %v2783_v16 = vmax.f32 %v2767_v12, 0.0  ;;  %v2268_v38 = vadd.f32 %v2252_v1, %v2172_v9 }
 0x205   :  { %v2554_v23 = vadd.f32 %v2538_v56, %v2458_v61  ;;  %v2459_v3 = vadd.f32 %v2443_v24, %v2363_v62  ;;  %v2731_v54 = vmul.f32 %v9381_v10, %v2679_v32  ;;  %v2444_v31 = vmul.f32 %v9382_v29, %v2395_v17  ;;  %v9383_v56 = vld [vmem:[#allocation17_spill] sm:$0xff]  ;;  %v9387_v62 = vld [vmem:[#allocation60_spill] sm:$0xff] }
 0x206   :  { %v2491_v53 = vrot.slane %v7443_v4, %v6431_v48  ;;  %v2587_v59 = vrot.slane %v7443_v4, %v6440_v51  ;;  %5443 = vmatprep.mubr.msk.f32.mxu0 %vm1814_vm1, %v2783_v16  ;;  %v2364_v15 = vadd.f32 %v2348_v19, %v2268_v38  ;;  %v2173_v14 = vadd.f32 %v2157_v11, %v2077_v28 }
 0x207   :  { %v2650_v36 = vadd.f32 %v2634_v26, %v2554_v23  ;;  %v2555_v40 = vadd.f32 %v2539_v37, %v2459_v3  ;;  %5444 = vmatmul.mubr.msk.f32.vlgmr.msra.gmra.mrb[16].mxu0 %vm1814_vm1, %v2784_v50  ;;  %v2683_v17 = vrot.slane %v7443_v4, %v9245_v52  ;;  %v9385_v24 = vrot.slane %v7434_v8, %v6425_v46  ;;  %v9389_v23 = vld [vmem:[#allocation16_spill] sm:$0xff] }
 0x208   :  { %v2540_v1 = vmul.f32 %v9383_v56, %v2491_v53  ;;  %v2636_v20 = vmul.f32 %v9384_v42, %v2587_v59  ;;  %v2460_v26 = vadd.f32 %v2444_v31, %v2364_v15  ;;  %v2269_v61 = vadd.f32 %v2253_v58, %v2173_v14  ;;  %v9390_v59 = vld [vmem:[#allocation89_spill] sm:$0xff]  ;;  %v9392_v15 = vld [vmem:[#allocation42_spill] sm:$0xff] }
 0x209   :  { %v2349_v7 = vmul.f32 %v9386_v35, %v9385_v24  ;;  %v2746_v32 = vadd.f32 %v2730_v33, %v2650_v36  ;;  %v2651_v12 = vadd.f32 %v2635_v5, %v2555_v40  ;;  %v2445_v11 = vmul.f32 %v9387_v62, %v2399_v6  ;;  %v9388_v33 = vld [vmem:[#allocation29_spill] sm:$0xff]  ;;  %v9421_v62 = vld [vmem:[#allocation95_spill] sm:$0xff] }
 0x20a   :  { %v2495_v28 = vrot.slane %v7434_v8, %v6431_v48  ;;  %v2591_v9 = vrot.slane %v7434_v8, %v6440_v51  ;;  %v2687_v4 = vrot.slane %v7434_v8, %v9245_v52  ;;  %v2556_v19 = vadd.f32 %v2540_v1, %v2460_v26  ;;  %v9391_v8 = vld [vmem:[#allocation28_spill] sm:$0xff] }
 0x20b   :  { %v2769_v50 = vadd.f32 %v7468_v27, %v2746_v32  ;;  %v2747_v37 = vadd.f32 %v2731_v54, %v2651_v12  ;;  %v2365_v16 = vadd.f32 %v2349_v7, %v2269_v61  ;;  %v2732_v5 = vmul.f32 %v9388_v33, %v2683_v17 }
 0x20c   :  { %v2541_v58 = vmul.f32 %v9389_v23, %v2495_v28  ;;  %v2039_v6 = vrot.slane %v7487_v22, %v6414_v43  ;;  %v2652_v31 = vadd.f32 %v2636_v20, %v2556_v19  ;;  %v2637_v36 = vmul.f32 %v9390_v59, %v2591_v9  ;;  %v9393_v9 = vld [vmem:[#allocation43_spill] sm:$0xff]  ;;  %v9403_v59 = vld [vmem:[#allocation69_spill] sm:$0xff] }
 0x20d   :  { %v2785_v3 = vmax.f32 %v2769_v50, 0.0  ;;  %v2770_v38 = vadd.f32 %v7468_v27, %v2747_v37  ;;  %v2461_v53 = vadd.f32 %v2445_v11, %v2365_v16  ;;  %v2733_v40 = vmul.f32 %v9391_v8, %v2687_v4  ;;  %v9394_v50 = vld [vmem:[#allocation47_spill] sm:$0xff]  ;;  %v9402_v8 = vld [vmem:[#allocation97_spill] sm:$0xff] }
 0x20e   :  { %v2079_v54 = vmul.f32 %v9392_v15, %v2039_v6  ;;  %v2748_v1 = vadd.f32 %v2732_v5, %v2652_v31  ;;  %v2119_v24 = vrot.slane %v7487_v22, %v6417_v44  ;;  %v2215_v7 = vrot.slane %v7487_v22, %v6422_v45  ;;  %v9395_v6 = vld [vmem:[#allocation46_spill] sm:$0xff]  ;;  %v9396_v31 = vld [vmem:[#allocation53_spill] sm:$0xff] }
 0x20f   :  { %5446 = vmatprep.mubr.msk.f32.mxu0 %vm1814_vm1, %v2785_v3  ;;  %v2786_v14 = vmax.f32 %v2770_v38, 0.0  ;;  %v2557_v17 = vadd.f32 %v2541_v58, %v2461_v53  ;;  %v2311_v20 = vrot.slane %v7487_v22, %v6425_v46  ;;  %v2035_v32 = vrot.slane %v7490_v30, %v6414_v43 }
 0x210   :  { %v2115_v12 = vrot.slane %v7490_v30, %v6417_v44  ;;  %v2771_v26 = vadd.f32 %v7468_v27, %v2748_v1  ;;  %v2211_v11 = vrot.slane %v7490_v30, %v6422_v45  ;;  %v2307_v28 = vrot.slane %v7490_v30, %v6425_v46 }
 0x211   :  { %5447 = vmatmul.mubr.msk.f32.gmra.mrb[18].mxu0 %vm1814_vm1, %v2786_v14  ;;  %v2653_v61 = vadd.f32 %v2637_v36, %v2557_v17  ;;  %v2078_v4 = vmul.f32 %v9393_v9, %v2035_v32  ;;  %v2403_v19 = vrot.slane %v7490_v30, %v6428_v47  ;;  %v2499_v16 = vrot.slane %v7490_v30, %v6431_v48  ;;  %v9397_v36 = vld [vmem:[#allocation54_spill] sm:$0xff] }
 0x212   :  { %v2158_v37 = vmul.f32 %v9394_v50, %v2115_v12  ;;  %v2787_v5 = vmax.f32 %v2771_v26, 0.0  ;;  %v2159_v3 = vmul.f32 %v9395_v6, %v2119_v24  ;;  %v2407_v38 = vrot.slane %v7487_v22, %v6428_v47  ;;  %v9400_v50 = vld [vmem:[#allocation85_spill] sm:$0xff] }
 0x213   :  { %v2749_v58 = vadd.f32 %v2733_v40, %v2653_v61  ;;  %v2255_v53 = vmul.f32 %v9396_v31, %v2215_v7  ;;  %v2254_v14 = vmul.f32 %v9397_v36, %v2211_v11  ;;  %v2595_v17 = vrot.slane %v7490_v30, %v6440_v51  ;;  %v9398_v11 = vld [vmem:[#allocation79_spill] sm:$0xff] }
 0x214   :  { %v2174_v1 = vadd.f32 %v2158_v37, %v2078_v4  ;;  %v7557_v32 = vpop.f32.mrb[8].mxu1  ;;  %5449 = vmatprep.mubr.msk.f32.mxu0 %vm1814_vm1, %v2787_v5  ;;  %v2691_v40 = vrot.slane %v7490_v30, %v9245_v52  ;;  %v2350_v4 = vmul.f32 %v9398_v11, %v2307_v28  ;;  %v9399_v37 = vld [vmem:[#allocation76_spill] sm:$0xff]  ;;  %v2542_v5 = vmul.f32 %v9400_v50, %v2499_v16  ;;  %v9404_v28 = vld [vmem:[#allocation71_spill] sm:$0xff]  ;;  %v9405_v16 = vld [vmem:[#allocation78_spill] sm:$0xff] }
 0x215   :  { %v2772_v12 = vadd.f32 %v7468_v27, %v2749_v58  ;;  %v2047_v24 = vrot.slane %v7557_v32, %v6414_v43  ;;  %v2127_v7 = vrot.slane %v7557_v32, %v6417_v44  ;;  %v7567_v26 = vpop.f32.mrb[9].mxu1  ;;  %v2446_v36 = vmul.f32 %v9399_v37, %v2403_v19  ;;  %v9401_v58 = vld [vmem:[#allocation37_spill] sm:$0xff]  ;;  %v9410_v37 = vld [vmem:[#allocation72_spill] sm:$0xff] }
 0x216   :  { %v2270_v61 = vadd.f32 %v2254_v14, %v2174_v1  ;;  %v2638_v31 = vmul.f32 %v9401_v58, %v2595_v17  ;;  %v2223_v30 = vrot.slane %v7557_v32, %v6422_v45  ;;  %v2734_v33 = vmul.f32 %v9402_v8, %v2691_v40 }
 0x217   :  { %v2788_v9 = vmax.f32 %v2772_v12, 0.0  ;;  %v2081_v14 = vmul.f32 %v9403_v59, %v2047_v24  ;;  %v2175_v1 = vadd.f32 %v2159_v3, %v2079_v54  ;;  %v2161_v19 = vmul.f32 %v9404_v28, %v2127_v7  ;;  %v9406_v3 = vld [vmem:[#allocation84_spill] sm:$0xff] }
 0x218   :  { %v2366_v15 = vadd.f32 %v2350_v4, %v2270_v61  ;;  %v2351_v12 = vmul.f32 %v9405_v16, %v2311_v20  ;;  %v2503_v17 = vrot.slane %v7487_v22, %v6431_v48  ;;  %v2599_v58 = vrot.slane %v7487_v22, %v6440_v51  ;;  %v9408_v4 = vld [vmem:[#allocation70_spill] sm:$0xff]  ;;  %v9411_v59 = vld [vmem:[#allocation36_spill] sm:$0xff] }
 0x219   :  { %5450 = vmatmul.mubr.msk.f32.gmra.mrb[20].mxu0 %vm1814_vm1, %v2788_v9  ;;  %v2271_v6 = vadd.f32 %v2255_v53, %v2175_v1  ;;  %v2695_v40 = vrot.slane %v7487_v22, %v9245_v52  ;;  %v2043_v54 = vrot.slane %v7567_v26, %v6414_v43  ;;  %v2257_v9 = vmul.f32 %v9406_v3, %v2223_v30  ;;  %v9407_v53 = vld [vmem:[#allocation75_spill] sm:$0xff]  ;;  %v9409_v1 = vld [vmem:[#allocation50_spill] sm:$0xff] }
 0x21a   :  { %v2462_v50 = vadd.f32 %v2446_v36, %v2366_v15  ;;  %v2123_v20 = vrot.slane %v7567_v26, %v6417_v44  ;;  %v2219_v7 = vrot.slane %v7567_v26, %v6422_v45  ;;  %v2447_v36 = vmul.f32 %v9407_v53, %v2407_v38  ;;  %v9419_v53 = vld [vmem:[#allocation94_spill] sm:$0xff] }
 0x21b   :  { %v2367_v15 = vadd.f32 %v2351_v12, %v2271_v6  ;;  %v2080_v22 = vmul.f32 %v9408_v4, %v2043_v54  ;;  %v2543_v8 = vmul.f32 %v9409_v1, %v2503_v17  ;;  %v2315_v30 = vrot.slane %v7567_v26, %v6425_v46 }
 0x21c   :  { %v2558_v61 = vadd.f32 %v2542_v5, %v2462_v50  ;;  %v2160_v11 = vmul.f32 %v9410_v37, %v2123_v20  ;;  %v2411_v24 = vrot.slane %v7567_v26, %v6428_v47  ;;  %v2639_v16 = vmul.f32 %v9411_v59, %v2599_v58  ;;  %v9412_v50 = vld [vmem:[#allocation96_spill] sm:$0xff]  ;;  %v9413_v5 = vld [vmem:[#allocation86_spill] sm:$0xff] }
 0x21d   :  { %v2463_v28 = vadd.f32 %v2447_v36, %v2367_v15  ;;  %v2735_v6 = vmul.f32 %v9412_v50, %v2695_v40  ;;  %v2256_v38 = vmul.f32 %v9413_v5, %v2219_v7  ;;  %v2507_v17 = vrot.slane %v7567_v26, %v6431_v48  ;;  %v9415_v36 = vld [vmem:[#allocation55_spill] sm:$0xff]  ;;  %v9416_v5 = vld [vmem:[#allocation93_spill] sm:$0xff] }
 0x21e   :  { %v2654_v3 = vadd.f32 %v2638_v31, %v2558_v61  ;;  %v2176_v54 = vadd.f32 %v2160_v11, %v2080_v22  ;;  %v2603_v20 = vrot.slane %v7567_v26, %v6440_v51  ;;  %v9414_v61 = vld [vmem:[#allocation9_spill] sm:$0xff]  ;;  %v2448_v22 = vmul.f32 %v9415_v36, %v2411_v24  ;;  %v9418_v36 = vld [vmem:[#allocation64_spill] sm:$0xff] }
 0x21f   :  { %v2559_v4 = vadd.f32 %v2543_v8, %v2463_v28  ;;  %v2352_v15 = vmul.f32 %v9414_v61, %v2315_v30 }
 0x220   :  { %v2750_v37 = vadd.f32 %v2734_v33, %v2654_v3  ;;  %v2699_v3 = vrot.slane %v7567_v26, %v9245_v52  ;;  %v9420_v26 = vld [vmem:[#allocation25_spill] sm:$0xff] }
 0x221   :  { %v2655_v8 = vadd.f32 %v2639_v16, %v2559_v4  ;;  %v9417_v16 = vld [vmem:[#allocation24_spill] sm:$0xff] }
 0x222   :  { %v2773_v33 = vadd.f32 %v7468_v27, %v2750_v37 }
 0x223   :  { %v2751_v37 = vadd.f32 %v2735_v6, %v2655_v8 }
 0x224   :  { %v2789_v30 = vmax.f32 %v2773_v33, 0.0 }
 0x225   :  { %v7608_v12 = vpop.f32.mrb[10].mxu1  ;;  %v2774_v56 = vadd.f32 %v7468_v27, %v2751_v37 }
 0x226   :  { %v2055_v31 = vrot.slane %v7608_v12, %v6414_v43  ;;  %v2135_v58 = vrot.slane %v7608_v12, %v6417_v44  ;;  %v7618_v40 = vpop.f32.mrb[11].mxu1  ;;  %v2231_v7 = vrot.slane %v7608_v12, %v6422_v45  ;;  %v2327_v28 = vrot.slane %v7608_v12, %v6425_v46  ;;  %5452 = vmatprep.mubr.msk.f32.mxu0 %vm1814_vm1, %v2789_v30  ;;  %v9425_v30 = vld [vmem:[#allocation83_spill] sm:$0xff] }
 0x227   :  { %v2051_v11 = vrot.slane %v7618_v40, %v6414_v43  ;;  %v2423_v59 = vrot.slane %v7608_v12, %v6428_v47  ;;  %v2131_v1 = vrot.slane %v7618_v40, %v6417_v44  ;;  %v2227_v24 = vrot.slane %v7618_v40, %v6422_v45 }
 0x228   :  { %v2083_v50 = vmul.f32 %v9416_v5, %v2055_v31  ;;  %v2163_v4 = vmul.f32 %v9417_v16, %v2135_v58  ;;  %v2259_v61 = vmul.f32 %v9418_v36, %v2231_v7  ;;  %v2323_v31 = vrot.slane %v7618_v40, %v6425_v46  ;;  %v9422_v7 = vld [vmem:[#allocation102_spill] sm:$0xff] }
 0x229   :  { %v2082_v42 = vmul.f32 %v9419_v53, %v2051_v11  ;;  %v2162_v23 = vmul.f32 %v9420_v26, %v2131_v1  ;;  %v2272_v5 = vadd.f32 %v2256_v38, %v2176_v54  ;;  %v2258_v29 = vmul.f32 %v9421_v62, %v2227_v24  ;;  %v9423_v11 = vld [vmem:[#allocation104_spill] sm:$0xff] }
 0x22a   :  { %v2419_v6 = vrot.slane %v7618_v40, %v6428_v47  ;;  %v2177_v58 = vadd.f32 %v2161_v19, %v2081_v14  ;;  %v2544_v8 = vmul.f32 %v9422_v7, %v2507_v17  ;;  %v2640_v53 = vmul.f32 %v9423_v11, %v2603_v20  ;;  %v9426_v14 = vld [vmem:[#allocation110_spill] sm:$0xff]  ;;  %v9430_v11 = vld [vmem:[#allocation49_spill] sm:$0xff] }
 0x22b   :  { %v2368_v33 = vadd.f32 %v2352_v15, %v2272_v5  ;;  %v2511_v1 = vrot.slane %v7557_v32, %v6431_v48  ;;  %v2790_v26 = vmax.f32 %v2774_v56, 0.0  ;;  %v9424_v54 = vrot.slane %v7557_v32, %v6425_v46 }
 0x22c   :  { %v2273_v38 = vadd.f32 %v2257_v9, %v2177_v58  ;;  %v2607_v24 = vrot.slane %v7557_v32, %v6440_v51  ;;  %v2736_v19 = vmul.f32 %v9426_v14, %v2699_v3  ;;  %v2703_v5 = vrot.slane %v7557_v32, %v9245_v52  ;;  %v9428_v9 = vld [vmem:[#allocation98_spill] sm:$0xff]  ;;  %v9429_v58 = vld [vmem:[#allocation101_spill] sm:$0xff] }
 0x22d   :  { %v2353_v37 = vmul.f32 %v9425_v30, %v9424_v54  ;;  %v2464_v62 = vadd.f32 %v2448_v22, %v2368_v33  ;;  %v2178_v17 = vadd.f32 %v2162_v23, %v2082_v42  ;;  %5453 = vmatmul.mubr.msk.f32.gmra.mrb[22].mxu0 %vm1814_vm1, %v2790_v26  ;;  %v9427_v56 = vrot.slane %v7557_v32, %v6428_v47  ;;  %v9431_v26 = vld [vmem:[#allocation103_spill] sm:$0xff]  ;;  %v9433_v14 = vld [vmem:[#allocation106_spill] sm:$0xff] }
 0x22e   :  { %v2545_v54 = vmul.f32 %v9429_v58, %v2511_v1  ;;  %v2354_v7 = vmul.f32 %v9430_v11, %v2323_v31  ;;  %v2515_v3 = vrot.slane %v7618_v40, %v6431_v48  ;;  %v2611_v42 = vrot.slane %v7618_v40, %v6440_v51 }
 0x22f   :  { %v2369_v20 = vadd.f32 %v2353_v37, %v2273_v38  ;;  %v2449_v15 = vmul.f32 %v9428_v9, %v9427_v56  ;;  %v2560_v36 = vadd.f32 %v2544_v8, %v2464_v62  ;;  %v2274_v22 = vadd.f32 %v2258_v29, %v2178_v17  ;;  %v9432_v56 = vld [vmem:[#allocation109_spill] sm:$0xff]  ;;  %v9434_v62 = vld [vmem:[#allocation48_spill] sm:$0xff] }
 0x230   :  { %v2641_v33 = vmul.f32 %v9431_v26, %v2607_v24  ;;  %v2707_v32 = vrot.slane %v7618_v40, %v9245_v52  ;;  %v2179_v38 = vadd.f32 %v2163_v4, %v2083_v50  ;;  %v2737_v1 = vmul.f32 %v9432_v56, %v2703_v5  ;;  %v9445_v26 = vld [vmem:[#allocation112_spill] sm:$0xff] }
 0x231   :  { %v2465_v23 = vadd.f32 %v2449_v15, %v2369_v20  ;;  %v2656_v37 = vadd.f32 %v2640_v53, %v2560_v36  ;;  %v2450_v31 = vmul.f32 %v9433_v14, %v2419_v6  ;;  %v2355_v29 = vmul.f32 %v9434_v62, %v2327_v28  ;;  %v9443_v62 = vld [vmem:[#allocation91_spill] sm:$0xff] }
 0x232   :  { %v2370_v11 = vadd.f32 %v2354_v7, %v2274_v22  ;;  %v2546_v16 = vmul.f32 %v7163_v2, %v2515_v3  ;;  %v2642_v20 = vmul.f32 %v7223_v60, %v2611_v42  ;;  %v2738_v6 = vmul.f32 %v7247_v34, %v2707_v32  ;;  %v9436_v42 = vld [vmem:[#allocation88_spill] sm:$0xff] }
 0x233   :  { %v2561_v8 = vadd.f32 %v2545_v54, %v2465_v23  ;;  %v2752_v24 = vadd.f32 %v2736_v19, %v2656_v37  ;;  %v2275_v7 = vadd.f32 %v2259_v61, %v2179_v38  ;;  %v9435_v54 = vld [vmem:[#allocation105_spill] sm:$0xff]  ;;  %v9437_v37 = vld [vmem:[#allocation87_spill] sm:$0xff] }
 0x234   :  { %v7679_v17 = vpop.f32.mrb[12].mxu1  ;;  %v2451_v22 = vmul.f32 %v9435_v54, %v2423_v59 }
 0x235   :  { %v2063_v40 = vrot.slane %v7679_v17, %v6414_v43  ;;  %v2143_v53 = vrot.slane %v7679_v17, %v6417_v44  ;;  %v2239_v50 = vrot.slane %v7679_v17, %v6422_v45  ;;  %v7689_v36 = vpop.f32.mrb[13].mxu1  ;;  %v2657_v28 = vadd.f32 %v2641_v33, %v2561_v8 }
 0x236   :  { %v2059_v4 = vrot.slane %v7689_v36, %v6414_v43  ;;  %v2775_v19 = vadd.f32 %v7468_v27, %v2752_v24  ;;  %v2335_v5 = vrot.slane %v7679_v17, %v6425_v46  ;;  %v2139_v33 = vrot.slane %v7689_v36, %v6417_v44 }
 0x237   :  { %v2753_v3 = vadd.f32 %v2737_v1, %v2657_v28  ;;  %v2085_v23 = vmul.f32 %v9436_v42, %v2063_v40  ;;  %v2235_v32 = vrot.slane %v7689_v36, %v6422_v45  ;;  %v2165_v8 = vmul.f32 %v9437_v37, %v2143_v53  ;;  %v9438_v40 = vld [vmem:[#allocation100_spill] sm:$0xff]  ;;  %v9439_v53 = vld [vmem:[#allocation99_spill] sm:$0xff]  ;;  %v9442_v42 = vld [vmem:[#allocation74_spill] sm:$0xff] }
 0x238   :  { %v7705_v61 = vpop.f32.mrb[14].mxu1  ;;  %v2791_v38 = vmax.f32 %v2775_v19, 0.0  ;;  %v2261_v24 = vmul.f32 %v9319_v63, %v2239_v50  ;;  %v2084_v28 = vmul.f32 %v9438_v40, %v2059_v4  ;;  %v2331_v34 = vrot.slane %v7689_v36, %v6425_v46  ;;  %v9440_v4 = vld [vmem:[#allocation73_spill] sm:$0xff]  ;;  %v9441_v37 = vld [vmem:[#allocation92_spill] sm:$0xff] }
 0x239   :  { %v2071_v15 = vrot.slane %v7705_v61, %v6414_v43  ;;  %v7711_v59 = vpop.f32.mrb[15].mxu1  ;;  %v2776_v1 = vadd.f32 %v7468_v27, %v2753_v3  ;;  %v2151_v60 = vrot.slane %v7705_v61, %v6417_v44  ;;  %v2164_v19 = vmul.f32 %v9439_v53, %v2139_v33 }
 0x23a   :  { %5455 = vmatprep.mubr.msk.f32.mxu0 %vm1814_vm1, %v2791_v38  ;;  %v2260_v50 = vmul.f32 %v9318_v0, %v2235_v32  ;;  %v2427_v2 = vrot.slane %v7689_v36, %v6428_v47  ;;  %v2247_v3 = vrot.slane %v7705_v61, %v6422_v45  ;;  %v2067_v38 = vrot.slane %v7711_v59, %v6414_v43 }
 0x23b   :  { %v2792_v14 = vmax.f32 %v2776_v1, 0.0  ;;  %v7727_v40 = vmul.f32 %v9440_v4, %v2071_v15  ;;  %v7734_v33 = vmul.f32 %v9441_v37, %v2151_v60  ;;  %v2147_v0 = vrot.slane %v7711_v59, %v6417_v44 }
 0x23c   :  { %v2243_v1 = vrot.slane %v7711_v59, %v6422_v45  ;;  %v7744_v15 = vmul.f32 %v7254_v21, %v2247_v3  ;;  %v2339_v63 = vrot.slane %v7711_v59, %v6425_v46  ;;  %v2466_v4 = vadd.f32 %v2450_v31, %v2370_v11 }
 0x23d   :  { %5456 = vmatmul.mubr.msk.f32.gmra.mrb[24].mxu0 %vm1814_vm1, %v2792_v14  ;;  %v2371_v60 = vadd.f32 %v2355_v29, %v2275_v7  ;;  %v2435_v37 = vrot.slane %v7711_v59, %v6428_v47  ;;  %v2519_v32 = vrot.slane %v7608_v12, %v6431_v48  ;;  %v2615_v53 = vrot.slane %v7608_v12, %v6440_v51  ;;  %v9444_v29 = vld [vmem:[#allocation107_spill] sm:$0xff] }
 0x23e   :  { %v2711_v14 = vrot.slane %v7608_v12, %v9245_v52  ;;  %v2086_v3 = vmul.f32 %v9442_v42, %v2067_v38  ;;  %v2562_v21 = vadd.f32 %v2546_v16, %v2466_v4  ;;  %v2180_v54 = vadd.f32 %v2164_v19, %v2084_v28  ;;  %v9446_v38 = vld [vmem:[#allocation117_spill] sm:$0xff] }
 0x23f   :  { %v2467_v56 = vadd.f32 %v2451_v22, %v2371_v60  ;;  %v2166_v11 = vmul.f32 %v9443_v62, %v2147_v0  ;;  %v2262_v31 = vmul.f32 %v7257_v25, %v2243_v1  ;;  %v2547_v7 = vmul.f32 %v9444_v29, %v2519_v32  ;;  %v9447_v22 = vld [vmem:[#allocation77_spill] sm:$0xff]  ;;  %v9483_v62 = vld [vmem:[#allocation40_spill] sm:$0xff] }
 0x240   :  { %v2356_v58 = vmul.f32 %v9445_v26, %v2331_v34  ;;  %v2658_v9 = vadd.f32 %v2642_v20, %v2562_v21  ;;  %v2643_v30 = vmul.f32 %v7221_v39, %v2615_v53  ;;  %v2276_v35 = vadd.f32 %v2260_v50, %v2180_v54  ;;  %v9448_v20 = vld [vmem:[#allocation116_spill] sm:$0xff]  ;;  %v9449_v50 = vld [vmem:[#allocation111_spill] sm:$0xff]  ;;  %v9481_v25 = vld [vmem:[#allocation21_spill] sm:$0xff] }
 0x241   :  { %v2523_v12 = vrot.slane %v7689_v36, %v6431_v48  ;;  %v2563_v49 = vadd.f32 %v2547_v7, %v2467_v56  ;;  %v2739_v16 = vmul.f32 %v9446_v38, %v2711_v14  ;;  %v2452_v28 = vmul.f32 %v9447_v22, %v2427_v2  ;;  %v9488_v22 = vld [vmem:[#allocation13_spill] sm:$0xff] }
 0x242   :  { %v2181_v19 = vadd.f32 %v2165_v8, %v2085_v23  ;;  %v2754_v0 = vadd.f32 %v2738_v6, %v2658_v9  ;;  %v2372_v4 = vadd.f32 %v2356_v58, %v2276_v35  ;;  %v2619_v32 = vrot.slane %v7689_v36, %v6440_v51  ;;  %v9451_v9 = vld [vmem:[#allocation82_spill] sm:$0xff] }
 0x243   :  { %v2715_v34 = vrot.slane %v7689_v36, %v9245_v52  ;;  %v2659_v21 = vadd.f32 %v2643_v30, %v2563_v49  ;;  %v2548_v54 = vmul.f32 %v9448_v20, %v2523_v12  ;;  %v2357_v1 = vmul.f32 %v9449_v50, %v2335_v5  ;;  %v9452_v5 = vld [vmem:[#allocation126_spill] sm:$0xff]  ;;  %v9495_v50 = vld [vmem:[#allocation32_spill] sm:$0xff] }
 0x244   :  { %v2277_v53 = vadd.f32 %v2261_v24, %v2181_v19  ;;  %v2777_v56 = vadd.f32 %v7468_v27, %v2754_v0  ;;  %v2468_v60 = vadd.f32 %v2452_v28, %v2372_v4  ;;  %v9450_v2 = vrot.slane %v7679_v17, %v6428_v47  ;;  %v9453_v28 = vld [vmem:[#allocation115_spill] sm:$0xff]  ;;  %v9454_v4 = vld [vmem:[#allocation132_spill] sm:$0xff] }
 0x245   :  { %v2527_v58 = vrot.slane %v7679_v17, %v6431_v48  ;;  %v2755_v6 = vadd.f32 %v2739_v16, %v2659_v21  ;;  %v2623_v49 = vrot.slane %v7679_v17, %v6440_v51  ;;  %v2182_v30 = vadd.f32 %v2166_v11, %v2086_v3 }
 0x246   :  { %v2453_v35 = vmul.f32 %v9451_v9, %v9450_v2  ;;  %v2373_v23 = vadd.f32 %v2357_v1, %v2277_v53  ;;  %v2793_v36 = vmax.f32 %v2777_v56, 0.0  ;;  %v2564_v8 = vadd.f32 %v2548_v54, %v2468_v60  ;;  %v9455_v53 = vld [vmem:[#allocation122_spill] sm:$0xff]  ;;  %v9456_v1 = vld [vmem:[#allocation125_spill] sm:$0xff] }
 0x247   :  { %v2644_v24 = vmul.f32 %v9452_v5, %v2619_v32  ;;  %v2719_v14 = vrot.slane %v7679_v17, %v9245_v52  ;;  %v2778_v7 = vadd.f32 %v7468_v27, %v2755_v6  ;;  %v2549_v19 = vmul.f32 %v9453_v28, %v2527_v58 }
 0x248   :  { %v2469_v12 = vadd.f32 %v2453_v35, %v2373_v23  ;;  %v2278_v0 = vadd.f32 %v2262_v31, %v2182_v30  ;;  %5458 = vmatprep.mubr.msk.f32.mxu0 %vm1814_vm1, %v2793_v36  ;;  %v2740_v21 = vmul.f32 %v9454_v4, %v2715_v34  ;;  %v2358_v3 = vmul.f32 %v9455_v53, %v2339_v63  ;;  %v9457_v31 = vld [vmem:[#allocation124_spill] sm:$0xff]  ;;  %v9458_v34 = vld [vmem:[#allocation131_spill] sm:$0xff] }
 0x249   :  { %v2660_v16 = vadd.f32 %v2644_v24, %v2564_v8  ;;  %v2531_v11 = vrot.slane %v7711_v59, %v6431_v48  ;;  %v2794_v32 = vmax.f32 %v2778_v7, 0.0  ;;  %v2645_v17 = vmul.f32 %v9456_v1, %v2623_v49  ;;  %v9459_v23 = vld [vmem:[#allocation128_spill] sm:$0xff]  ;;  %v9461_v7 = vld [vmem:[#allocation121_spill] sm:$0xff] }
 0x24a   :  { %v2565_v54 = vadd.f32 %v2549_v19, %v2469_v12  ;;  %v2627_v56 = vrot.slane %v7711_v59, %v6440_v51  ;;  %v2374_v2 = vadd.f32 %v2358_v3, %v2278_v0  ;;  %v2454_v35 = vmul.f32 %v9457_v31, %v2435_v37  ;;  %v9462_v12 = vld [vmem:[#allocation130_spill] sm:$0xff]  ;;  %v9464_v0 = vld [vmem:[#allocation123_spill] sm:$0xff]  ;;  %v9479_v4 = vld [vmem:[#allocation20_spill] sm:$0xff] }
 0x24b   :  { %v2756_v60 = vadd.f32 %v2740_v21, %v2660_v16  ;;  %v2183_v58 = vadd.f32 %v7734_v33, %v7727_v40  ;;  %5459 = vmatmul.mubr.msk.f32.gmra.mrb[26].mxu0 %vm1814_vm1, %v2794_v32  ;;  %v2741_v6 = vmul.f32 %v9458_v34, %v2719_v14  ;;  %v2550_v30 = vmul.f32 %v9459_v23, %v2531_v11  ;;  %v9480_v31 = vld [vmem:[#allocation63_spill] sm:$0xff]  ;;  %v9490_v1 = vld [vmem:[#allocation33_spill] sm:$0xff] }
 0x24c   :  { %v2661_v63 = vadd.f32 %v2645_v17, %v2565_v54  ;;  %v2723_v49 = vrot.slane %v7711_v59, %v9245_v52  ;;  %v2470_v8 = vadd.f32 %v2454_v35, %v2374_v2  ;;  %v9460_v37 = vrot.slane %v7705_v61, %v6425_v46  ;;  %v9465_v54 = vld [vmem:[#allocation134_spill] sm:$0xff]  ;;  %v9466_v2 = vld [vmem:[#allocation127_spill] sm:$0xff] }
 0x24d   :  { %v2779_v36 = vadd.f32 %v7468_v27, %v2756_v60  ;;  %v2279_v24 = vadd.f32 %v7744_v15, %v2183_v58  ;;  %v2646_v19 = vmul.f32 %v9462_v12, %v2627_v56  ;;  %v9463_v14 = vrot.slane %v7705_v61, %v6428_v47 }
 0x24e   :  { %v2359_v40 = vmul.f32 %v9461_v7, %v9460_v37  ;;  %v2757_v33 = vadd.f32 %v2741_v6, %v2661_v63  ;;  %v2535_v59 = vrot.slane %v7705_v61, %v6431_v48  ;;  %v2566_v3 = vadd.f32 %v2550_v30, %v2470_v8 }
 0x24f   :  { %v2455_v16 = vmul.f32 %v9464_v0, %v9463_v14  ;;  %v2795_v21 = vmax.f32 %v2779_v36, 0.0  ;;  %v2631_v15 = vrot.slane %v7705_v61, %v6440_v51  ;;  %v2742_v17 = vmul.f32 %v9465_v54, %v2723_v49  ;;  %v9467_v36 = vld [vmem:[#allocation129_spill] sm:$0xff] }
 0x250   :  { %v2375_v11 = vadd.f32 %v2359_v40, %v2279_v24  ;;  %v2780_v32 = vadd.f32 %v7468_v27, %v2757_v33  ;;  %v2662_v56 = vadd.f32 %v2646_v19, %v2566_v3  ;;  %v2551_v35 = vmul.f32 %v9466_v2, %v2535_v59  ;;  %v9468_v49 = vld [vmem:[#allocation133_spill] sm:$0xff]  ;;  %v9482_v2 = vld [vmem:[#allocation7_spill] sm:$0xff] }
 0x251   :  { %5461 = vmatprep.mubr.msk.f32.mxu0 %vm1814_vm1, %v2795_v21  ;;  %v2727_v58 = vrot.slane %v7705_v61, %v9245_v52  ;;  %v2647_v8 = vmul.f32 %v9467_v36, %v2631_v15  ;;  %v9469_v61 = vld [vmem:[#allocation135_spill] sm:$0xff] }
 0x252   :  { %v2471_v60 = vadd.f32 %v2455_v16, %v2375_v11  ;;  %v2796_v63 = vmax.f32 %v2780_v32, 0.0  ;;  %v2758_v6 = vadd.f32 %v2742_v17, %v2662_v56  ;;  %v3938_v59 = vrot.slane %v9469_v61, %v6431_v48  ;;  %v101_v11 = vpop.permute.xlu0 %100  ;;  %v108_v56 = vpop.permute.xlu1 %107 }
 0x253   :  { %v2743_v40 = vmul.f32 %v9468_v49, %v2727_v58  ;;  %v3945_v21 = vrot.slane %v9469_v61, %v6440_v51  ;;  %v3952_v3 = vrot.slane %v9469_v61, %v9245_v52  ;;  %v154_v58 = vrot.slane %v101_v11, %v6414_v43  ;;  %v9478_v49 = vld [vmem:[#allocation62_spill] sm:$0xff] }
 0x254   :  { %v2567_v30 = vadd.f32 %v2551_v35, %v2471_v60  ;;  %5462 = vmatmul.mubr.msk.f32.gmra.mrb[28].mxu0 %vm1814_vm1, %v2796_v63  ;;  %v2781_v24 = vadd.f32 %v7468_v27, %v2758_v6  ;;  %3940 = vbcast.lane.b32.xlu1 %v3938_v59, 256  ;;  %v9471_v60 = vld [vmem:[#allocation6_spill] sm:$0xff]  ;;  %v158_v63 = vrot.slane %v101_v11, %v6417_v44 }
 0x255   :  { %v7839_v35 = vcvt.s32.f32 %v9471_v60 }
 0x256   :  { %v2663_v37 = vadd.f32 %v2647_v8, %v2567_v30  ;;  %v2797_v33 = vmax.f32 %v2781_v24, 0.0  ;;  %v129_v15 = vpop.permute.xlu0 %128  ;;  %v162_v8 = vrot.slane %v108_v56, %v6414_v43  ;;  %v4004_v24 = vld [vmem:[%s8878_s9] sm:$0xff]  ;;  %v7917_v54 = vpop.permute.xlu1 %135 }
 0x257   :  { %v186_v6 = vrot.slane %v129_v15, %v6414_v43  ;;  %v190_v30 = vrot.slane %v129_v15, %v6417_v44  ;;  %vm215_vm2 = vcmp.lt.f32.partialorder %v7839_v35, %v154_v58  ;;  %vm216_vm3 = vcmp.lt.f32.partialorder %v7839_v35, %v158_v63 }
 0x258   :  { %v2759_v19 = vadd.f32 %v2743_v40, %v2663_v37  ;;  %5464 = vmatprep.mubr.msk.f32.mxu0 %vm1814_vm1, %v2797_v33  ;;  %3947 = vbcast.lane.b32.xlu1 %v3945_v21, 256  ;;  %v4005_v37 = vld [vmem:[%s8878_s9 + $0x8] sm:$0xff]  ;;  %v166_v40 = vrot.slane %v108_v56, %v6417_v44  ;;  %vm217_vm6 = vcmp.lt.f32.partialorder %v7839_v35, %v162_v8  ;;  %v9119_v21 = vmov 0.0   ;;  %s6038_s9 = smov 32  }
 0x259   :  { %vm223_vm4 = vcmp.lt.f32.partialorder %v7839_v35, %v186_v6  ;;  %vm224_vm5 = vcmp.lt.f32.partialorder %v7839_v35, %v190_v30  ;;  %v7873_v11 = vsel %vm216_vm3, 1.0, %v9119_v21 }
 0x25a   :  { %v2782_v14 = vadd.f32 %v7468_v27, %v2759_v19  ;;  %v115_v32 = vpop.permute.xlu0 %114  ;;  %vm218_vm7 = vcmp.lt.f32.partialorder %v7839_v35, %v166_v40  ;;  %v7876_v15 = vsel %vm223_vm4, 1.0, %v9119_v21  ;;  %vm4029_vm4 = vcmask 1043459  }
 0x25b   :  { %v170_v33 = vrot.slane %v115_v32, %v6414_v43  ;;  %v174_v19 = vrot.slane %v115_v32, %v6417_v44  ;;  %9473 = vst [vmem:[#allocation38_spill] sm:$0xff] %v7876_v15  ;;  %v7879_v32 = vsel %vm224_vm5, 1.0, %v9119_v21  ;;  %v7885_v56 = vsel %vm218_vm7, 1.0, %v9119_v21 }
 0x25c   :  { %v2798_v16 = vmax.f32 %v2782_v14, 0.0  ;;  %3954 = vbcast.lane.b32.xlu1 %v3952_v3, 256  ;;  %v5517_v14 = vpack.c.bf16 %v4005_v37, %v4004_v24  ;;  %v7870_v3 = vsel %vm215_vm2, 1.0, %v9119_v21  ;;  %9474 = vst [vmem:[#allocation51_spill] sm:$0xff] %v7879_v32  ;;  %v9496_v32 = vld [vmem:[#allocation57_spill] sm:$0xff]  ;;  %vm4026_vm2 = vcmask 1042434  }
 0x25d   :  { %vm219_vm8 = vcmp.lt.f32.partialorder %v7839_v35, %v170_v33  ;;  %vm220_vm9 = vcmp.lt.f32.partialorder %v7839_v35, %v174_v19  ;;  %vm4032_vm5 = vcmask 1044484   ;;  %vm4038_vm7 = vcmask 1046534  }
 0x25e   :  { %5465 = vmatmul.mubr.msk.f32.gmra.mrb[30].mxu0 %vm1814_vm1, %v2798_v16  ;;  %v122_v17 = vpop.permute.xlu0 %121  ;;  %5518 = vmatprep.subr.bf16.mxu1 %v5517_v14  ;;  %v7888_v58 = vsel %vm219_vm8, 1.0, %v9119_v21  ;;  %v7891_v63 = vsel %vm220_vm9, 1.0, %v9119_v21  ;;  %vm4041_vm8 = vcmask 1047559  }
 0x25f   :  { %v178_v16 = vrot.slane %v122_v17, %v6414_v43  ;;  %v182_v61 = vrot.slane %v122_v17, %v6417_v44  ;;  %5520 = vmatpush3.bf16.msra.mxu1 %v5517_v14  ;;  %v7882_v17 = vsel %vm217_vm6, 1.0, %v9119_v21  ;;  %vm4035_vm6 = vcmask 1045509  }
 0x261   :  { %vm221_vm10 = vcmp.lt.f32.partialorder %v7839_v35, %v178_v16  ;;  %vm222_vm11 = vcmp.lt.f32.partialorder %v7839_v35, %v182_v61 }
 0x262   :  { %v7836_v27 = vpop.permute.xlu0 %3905  ;;  %v7898_v8 = vsel %vm221_vm10, 1.0, %v9119_v21  ;;  %v7901_v24 = vsel %vm222_vm11, 1.0, %v9119_v21  ;;  %vm6045_vm11 = vmmov 0  }
 0x263   :  { %9470 = vst [vmem:[#allocation39_spill] sm:$0xff] %v7836_v27  ;;  %9476 = vst [vmem:[#allocation80_spill] sm:$0xff] %v7898_v8  ;;  %v9497_v8 = vld [vmem:[#allocation56_spill] sm:$0xff]  ;;  %v9498_v27 = vld [vmem:[#allocation19_spill] sm:$0xff] }
 0x264   :  { %9477 = vst [vmem:[#allocation135_spill] sm:$0xff] %v7901_v24 }
 0x266   :  { %v7857_v59 = vpop.permute.xlu0 %3912 }
 0x267   :  { %9472 = vst [vmem:[#allocation30_spill] sm:$0xff] %v7857_v59 }
 0x26a   :  { %v7893_v6 = vpop.permute.xlu0 %3919 }
 0x26b   :  { %9475 = vst [vmem:[#allocation67_spill] sm:$0xff] %v7893_v6 }
 0x2da   :  { %v7895_v30 = vpop.f32.mrb[16].mxu0 }
 0x2db   :  { %v3003_v33 = vrot.slane %v7895_v30, %v6414_v43  ;;  %v3083_v19 = vrot.slane %v7895_v30, %v6417_v44  ;;  %v3179_v14 = vrot.slane %v7895_v30, %v6422_v45  ;;  %v3275_v16 = vrot.slane %v7895_v30, %v6425_v46  ;;  %v2917_v61 = vpop.f32.mrb[17].mxu0 }
 0x2dc   :  { %v2999_v21 = vrot.slane %v2917_v61, %v6414_v43  ;;  %v3079_v60 = vrot.slane %v2917_v61, %v6417_v44  ;;  %v3175_v37 = vrot.slane %v2917_v61, %v6422_v45  ;;  %v3271_v34 = vrot.slane %v2917_v61, %v6425_v46 }
 0x2dd   :  { %v3061_v12 = vmul.f32 %v9478_v49, %v3003_v33  ;;  %v3141_v23 = vmul.f32 %v9479_v4, %v3083_v19  ;;  %v3237_v0 = vmul.f32 %v9482_v2, %v3179_v14  ;;  %v3333_v42 = vmul.f32 %v9483_v62, %v3275_v16  ;;  %v9484_v19 = vld [vmem:[#allocation8_spill] sm:$0xff]  ;;  %v9485_v2 = vld [vmem:[#allocation41_spill] sm:$0xff]  ;;  %v9486_v62 = vld [vmem:[#allocation23_spill] sm:$0xff] }
 0x2de   :  { %v3060_v53 = vmul.f32 %v9480_v31, %v2999_v21  ;;  %v3140_v36 = vmul.f32 %v9481_v25, %v3079_v60  ;;  %v3367_v20 = vrot.slane %v2917_v61, %v6428_v47  ;;  %v3371_v49 = vrot.slane %v7895_v30, %v6428_v47  ;;  %v9487_v16 = vld [vmem:[#allocation22_spill] sm:$0xff] }
 0x2df   :  { %v3157_v40 = vadd.f32 %v3141_v23, %v3061_v12  ;;  %v3463_v4 = vrot.slane %v2917_v61, %v6431_v48  ;;  %v3236_v7 = vmul.f32 %v9484_v19, %v3175_v37  ;;  %v3467_v31 = vrot.slane %v7895_v30, %v6431_v48 }
 0x2e0   :  { %v3156_v33 = vadd.f32 %v3140_v36, %v3060_v53  ;;  %v3559_v25 = vrot.slane %v2917_v61, %v6440_v51  ;;  %v3332_v21 = vmul.f32 %v9485_v2, %v3271_v34  ;;  %v3428_v23 = vmul.f32 %v9486_v62, %v3367_v20  ;;  %v9489_v36 = vld [vmem:[#allocation12_spill] sm:$0xff]  ;;  %v9493_v62 = vld [vmem:[#allocation11_spill] sm:$0xff] }
 0x2e1   :  { %v3253_v60 = vadd.f32 %v3237_v0, %v3157_v40  ;;  %v3563_v12 = vrot.slane %v7895_v30, %v6440_v51  ;;  %v3429_v5 = vmul.f32 %v9487_v16, %v3371_v49  ;;  %v3524_v53 = vmul.f32 %v9488_v22, %v3463_v4  ;;  %v9491_v4 = vld [vmem:[#allocation10_spill] sm:$0xff] }
 0x2e2   :  { %v3252_v14 = vadd.f32 %v3236_v7, %v3156_v33  ;;  %v3525_v37 = vmul.f32 %v9489_v36, %v3467_v31  ;;  %v3620_v28 = vmul.f32 %v9490_v1, %v3559_v25  ;;  %v3655_v0 = vrot.slane %v2917_v61, %v9245_v52  ;;  %v9492_v31 = vld [vmem:[#allocation14_spill] sm:$0xff]  ;;  %v9494_v36 = vld [vmem:[#allocation15_spill] sm:$0xff] }
 0x2e3   :  { %v3349_v26 = vadd.f32 %v3333_v42, %v3253_v60  ;;  %v3659_v20 = vrot.slane %v7895_v30, %v9245_v52  ;;  %v3621_v15 = vmul.f32 %v9495_v50, %v3563_v12 }
 0x2e4   :  { %v7943_v19 = vpop.f32.mrb[18].mxu0  ;;  %v3348_v60 = vadd.f32 %v3332_v21, %v3252_v14  ;;  %v3716_v38 = vmul.f32 %v9496_v32, %v3655_v0  ;;  %v9500_v21 = vld [vmem:[#allocation31_spill] sm:$0xff]  ;;  %v8007_v0 = vld [vmem:[%s8877_s8] ss:$0 sm:$0xff]  ;;  %s6042_s8 = smov 112  }
 0x2e5   :  { %v3011_v34 = vrot.slane %v7943_v19, %v6414_v43  ;;  %v3091_v7 = vrot.slane %v7943_v19, %v6417_v44  ;;  %v3187_v22 = vrot.slane %v7943_v19, %v6422_v45  ;;  %v3283_v40 = vrot.slane %v7943_v19, %v6425_v46  ;;  %v7957_v42 = vpop.f32.mrb[19].mxu0 }
 0x2e6   :  { %v3007_v1 = vrot.slane %v7957_v42, %v6414_v43  ;;  %v3087_v30 = vrot.slane %v7957_v42, %v6417_v44  ;;  %v3183_v61 = vrot.slane %v7957_v42, %v6422_v45  ;;  %v3279_v49 = vrot.slane %v7957_v42, %v6425_v46 }
 0x2e7   :  { %v3063_v33 = vmul.f32 %v9491_v4, %v3011_v34  ;;  %v3143_v25 = vmul.f32 %v9492_v31, %v3091_v7  ;;  %v3445_v2 = vadd.f32 %v3429_v5, %v3349_v26  ;;  %v3444_v39 = vadd.f32 %v3428_v23, %v3348_v60  ;;  %v9499_v4 = vld [vmem:[#allocation18_spill] sm:$0xff] }
 0x2e8   :  { %v3062_v16 = vmul.f32 %v9493_v62, %v3007_v1  ;;  %v3142_v9 = vmul.f32 %v9494_v36, %v3087_v30  ;;  %v3717_v24 = vmul.f32 %v9497_v8, %v3659_v20  ;;  %v3238_v34 = vmul.f32 %v9498_v27, %v3183_v61  ;;  %v9501_v20 = vld [vmem:[#allocation65_spill] sm:$0xff] }
 0x2e9   :  { %v3541_v29 = vadd.f32 %v3525_v37, %v3445_v2  ;;  %v3159_v6 = vadd.f32 %v3143_v25, %v3063_v33  ;;  %v3239_v7 = vmul.f32 %v9499_v4, %v3187_v22  ;;  %v3334_v26 = vmul.f32 %v9500_v21, %v3279_v49  ;;  %v9503_v33 = vld [vmem:[#allocation66_spill] sm:$0xff]  ;;  %v9504_v25 = vld [vmem:[#allocation27_spill] sm:$0xff] }
 0x2ea   :  { %v3158_v59 = vadd.f32 %v3142_v9, %v3062_v16  ;;  %v3540_v5 = vadd.f32 %v3524_v53, %v3444_v39  ;;  %v3335_v1 = vmul.f32 %v9376_v57, %v3283_v40  ;;  %v3375_v50 = vrot.slane %v7957_v42, %v6428_v47  ;;  %v9502_v40 = vld [vmem:[#allocation26_spill] sm:$0xff] }
 0x2eb   :  { %v3637_v14 = vadd.f32 %v3621_v15, %v3541_v29  ;;  %v3255_v12 = vadd.f32 %v3239_v7, %v3159_v6  ;;  %v3379_v9 = vrot.slane %v7943_v19, %v6428_v47  ;;  %v3471_v27 = vrot.slane %v7957_v42, %v6431_v48  ;;  %v9505_v7 = vld [vmem:[#allocation52_spill] sm:$0xff] }
 0x2ec   :  { %v7980_v32 = vpop.f32.mrb[20].mxu0  ;;  %v3254_v23 = vadd.f32 %v3238_v34, %v3158_v59  ;;  %v3475_v59 = vrot.slane %v7943_v19, %v6431_v48  ;;  %v3636_v61 = vadd.f32 %v3620_v28, %v3540_v5  ;;  %v3430_v34 = vmul.f32 %v9373_v13, %v3375_v50  ;;  %v9506_v13 = vld [vmem:[#allocation68_spill] sm:$0xff] }
 0x2ed   :  { %v3019_v8 = vrot.slane %v7980_v32, %v6414_v43  ;;  %v3099_v39 = vrot.slane %v7980_v32, %v6417_v44  ;;  %v3195_v57 = vrot.slane %v7980_v32, %v6422_v45  ;;  %v7992_v29 = vpop.f32.mrb[21].mxu0  ;;  %v3291_v15 = vrot.slane %v7980_v32, %v6425_v46 }
 0x2ee   :  { %v3015_v6 = vrot.slane %v7992_v29, %v6414_v43  ;;  %v3095_v53 = vrot.slane %v7992_v29, %v6417_v44  ;;  %v3191_v37 = vrot.slane %v7992_v29, %v6422_v45  ;;  %v3733_v49 = vadd.f32 %v3717_v24, %v3637_v14 }
 0x2ef   :  { %v3065_v22 = vmul.f32 %v9501_v20, %v3019_v8  ;;  %v3145_v30 = vmul.f32 %v9502_v40, %v3099_v39  ;;  %v3350_v2 = vadd.f32 %v3334_v26, %v3254_v23  ;;  %v3351_v62 = vadd.f32 %v3335_v1, %v3255_v12  ;;  %v9508_v39 = vld [vmem:[#allocation81_spill] sm:$0xff] }
 0x2f0   :  { %v3064_v31 = vmul.f32 %v9503_v33, %v3015_v6  ;;  %v3144_v60 = vmul.f32 %v9504_v25, %v3095_v53  ;;  %v3732_v16 = vadd.f32 %v3716_v38, %v3636_v61  ;;  %v3756_v36 = vadd.f32 %v8007_v0, %v3733_v49  ;;  %v9509_v61 = vld [vmem:[#allocation35_spill] sm:$0xff]  ;;  %v9510_v33 = vld [vmem:[#allocation34_spill] sm:$0xff] }
 0x2f1   :  { %v3431_v4 = vmul.f32 %v9377_v55, %v3379_v9  ;;  %v3526_v21 = vmul.f32 %v9505_v7, %v3471_v27  ;;  %v3527_v8 = vmul.f32 %v9378_v18, %v3475_v59  ;;  %v3567_v28 = vrot.slane %v7957_v42, %v6440_v51  ;;  %v9513_v7 = vld [vmem:[#allocation61_spill] sm:$0xff] }
 0x2f2   :  { %v3571_v24 = vrot.slane %v7943_v19, %v6440_v51  ;;  %v3755_v26 = vadd.f32 %v8007_v0, %v3732_v16  ;;  %v8024_v38 = vmul.f32 %v7873_v11, %v3756_v36  ;;  %v3446_v5 = vadd.f32 %v3430_v34, %v3350_v2  ;;  %v9511_v2 = vld [vmem:[#allocation45_spill] sm:$0xff] }
 0x2f3   :  { %v3447_v14 = vadd.f32 %v3431_v4, %v3351_v62  ;;  %v3287_v55 = vrot.slane %v7992_v29, %v6425_v46  ;;  %v3622_v1 = vmul.f32 %v9506_v13, %v3567_v28  ;;  %v3663_v18 = vrot.slane %v7957_v42, %v9245_v52  ;;  %v9514_v28 = vld [vmem:[#allocation60_spill] sm:$0xff] }
 0x2f4   :  { %v3667_v50 = vrot.slane %v7943_v19, %v9245_v52  ;;  %v3795_v23 = vsel %vm297_vm0, %v8024_v38, 0.0  ;;  %v3542_v12 = vadd.f32 %v3526_v21, %v3446_v5  ;;  %v3623_v11 = vmul.f32 %v9379_v41, %v3571_v24 }
 0x2f5   :  { %v3543_v9 = vadd.f32 %v3527_v8, %v3447_v14  ;;  %v8037_v27 = vmul.f32 %v7870_v3, %v3755_v26  ;;  %v3718_v59 = vmul.f32 %v9508_v39, %v3663_v18  ;;  %v3160_v53 = vadd.f32 %v3144_v60, %v3064_v31  ;;  %v9512_v60 = vld [vmem:[#allocation44_spill] sm:$0xff]  ;;  %v9515_v26 = vld [vmem:[#allocation17_spill] sm:$0xff] }
 0x2f6   :  { %v3719_v6 = vmul.f32 %v9381_v10, %v3667_v50  ;;  %v3638_v20 = vadd.f32 %v3622_v1, %v3542_v12  ;;  %v3161_v40 = vadd.f32 %v3145_v30, %v3065_v22  ;;  %v3240_v19 = vmul.f32 %v9509_v61, %v3191_v37  ;;  %v9518_v12 = vld [vmem:[#allocation16_spill] sm:$0xff]  ;;  %v9520_v61 = vld [vmem:[#allocation89_spill] sm:$0xff] }
 0x2f7   :  { %9507 = vst [vmem:[#allocation62_spill] sm:$0xff] %v8037_v27  ;;  %v3639_v42 = vadd.f32 %v3623_v11, %v3543_v9  ;;  %v3796_v49 = vrot.slane %v3795_v23, 4  ;;  %v3241_v25 = vmul.f32 %v9510_v33, %v3195_v57  ;;  %v3336_v62 = vmul.f32 %v9511_v2, %v3287_v55  ;;  %v9521_v33 = vld [vmem:[#allocation29_spill] sm:$0xff] }
 0x2f8   :  { %v3383_v41 = vrot.slane %v7992_v29, %v6428_v47  ;;  %v3734_v3 = vadd.f32 %v3718_v59, %v3638_v20  ;;  %v3256_v36 = vadd.f32 %v3240_v19, %v3160_v53  ;;  %v3387_v10 = vrot.slane %v7980_v32, %v6428_v47 }
 0x2f9   :  { %v3735_v16 = vadd.f32 %v3719_v6, %v3639_v42  ;;  %v3257_v31 = vadd.f32 %v3241_v25, %v3161_v40  ;;  %v3337_v34 = vmul.f32 %v9512_v60, %v3291_v15  ;;  %v3479_v37 = vrot.slane %v7992_v29, %v6431_v48  ;;  %v9519_v6 = vld [vmem:[#allocation90_spill] sm:$0xff] }
 0x2fa   :  { %v3483_v57 = vrot.slane %v7980_v32, %v6431_v48  ;;  %v3757_v22 = vadd.f32 %v8007_v0, %v3734_v3  ;;  %v3352_v4 = vadd.f32 %v3336_v62, %v3256_v36  ;;  %v3432_v21 = vmul.f32 %v9513_v7, %v3383_v41  ;;  %v9522_v3 = vld [vmem:[#allocation28_spill] sm:$0xff] }
 0x2fb   :  { %v3758_v30 = vadd.f32 %v8007_v0, %v3735_v16  ;;  %v3353_v8 = vadd.f32 %v3337_v34, %v3257_v31  ;;  %v3433_v24 = vmul.f32 %v9514_v28, %v3387_v10  ;;  %v3528_v5 = vmul.f32 %v9515_v26, %v3479_v37 }
 0x2fc   :  { %v3575_v15 = vrot.slane %v7992_v29, %v6440_v51  ;;  %v8061_v14 = vmul.f32 %v7882_v17, %v3757_v22  ;;  %v3448_v13 = vadd.f32 %v3432_v21, %v3352_v4  ;;  %v3579_v1 = vrot.slane %v7980_v32, %v6440_v51 }
 0x2fd   :  { %v8064_v55 = vmul.f32 %v7885_v56, %v3758_v30  ;;  %v3449_v50 = vadd.f32 %v3433_v24, %v3353_v8  ;;  %v3529_v9 = vmul.f32 %v9518_v12, %v3483_v57  ;;  %v3671_v11 = vrot.slane %v7992_v29, %v9245_v52  ;;  %v143_v8 = vpop.permute.xlu1 %142 }
 0x2fe   :  { %9516 = vst [vmem:[#allocation20_spill] sm:$0xff] %v8061_v14  ;;  %v3675_v39 = vrot.slane %v7980_v32, %v9245_v52  ;;  %v3544_v59 = vadd.f32 %v3528_v5, %v3448_v13  ;;  %v3624_v53 = vmul.f32 %v9519_v6, %v3575_v15  ;;  %v3788_v20 = vsel %vm297_vm0, %v8037_v27, 0.0 }
 0x2ff   :  { %9517 = vst [vmem:[#allocation63_spill] sm:$0xff] %v8064_v55  ;;  %v3809_v56 = vsel %vm297_vm0, %v8064_v55, 0.0  ;;  %v3545_v40 = vadd.f32 %v3529_v9, %v3449_v50  ;;  %v3625_v19 = vmul.f32 %v9520_v61, %v3579_v1  ;;  %v3720_v29 = vmul.f32 %v9521_v33, %v3671_v11  ;;  %v9524_v50 = vld [vmem:[#allocation42_spill] sm:$0xff]  ;;  %v8118_v33 = vpop.permute.xlu0 %3926 }
 0x300   :  { %v8068_v18 = vpop.f32.mrb[22].mxu0  ;;  %v3810_v42 = vrot.slane %v3809_v56, 4  ;;  %v3640_v25 = vadd.f32 %v3624_v53, %v3544_v59  ;;  %v3789_v2 = vrot.slane %v3788_v20, 4  ;;  %v3797_v32 = vadd.f32 %v3796_v49, %v3795_v23 }
 0x301   :  { %v8075_v17 = vpop.f32.mrb[23].mxu0  ;;  %v3802_v62 = vsel %vm297_vm0, %v8061_v14, 0.0  ;;  %v3641_v41 = vadd.f32 %v3625_v19, %v3545_v40  ;;  %v3721_v16 = vmul.f32 %v9522_v3, %v3675_v39  ;;  %v3027_v37 = vrot.slane %v8068_v18, %v6414_v43  ;;  %v9574_v14 = vld [vmem:[#allocation48_spill] sm:$0xff] }
 0x302   :  { %v3803_v36 = vrot.slane %v3802_v62, 4  ;;  %v3811_v10 = vadd.f32 %v3810_v42, %v3809_v56  ;;  %v3736_v31 = vadd.f32 %v3720_v29, %v3640_v25  ;;  %v3790_v60 = vadd.f32 %v3789_v2, %v3788_v20  ;;  %v9526_v56 = vld [vmem:[#allocation46_spill] sm:$0xff] }
 0x303   :  { %v3798_v34 = vrot.slane %v3797_v32, 2  ;;  %v3737_v57 = vadd.f32 %v3721_v16, %v3641_v41  ;;  %v3107_v23 = vrot.slane %v8068_v18, %v6417_v44  ;;  %v198_v21 = vrot.slane %v7917_v54, %v6417_v44 }
 0x304   :  { %v3804_v22 = vadd.f32 %v3803_v36, %v3802_v62  ;;  %v3812_v30 = vrot.slane %v3811_v10, 2  ;;  %v3759_v49 = vadd.f32 %v8007_v0, %v3736_v31  ;;  %v3791_v4 = vrot.slane %v3790_v60, 2 }
 0x305   :  { %v3799_v7 = vadd.f32 %v3798_v34, %v3797_v32  ;;  %v3760_v28 = vadd.f32 %v8007_v0, %v3737_v57  ;;  %v202_v5 = vrot.slane %v143_v8, %v6414_v43  ;;  %v3067_v12 = vmul.f32 %v9524_v50, %v3027_v37  ;;  %v9534_v37 = vld [vmem:[#allocation39_spill] sm:$0xff]  ;;  %v9561_v34 = vld [vmem:[#allocation101_spill] sm:$0xff] }
 0x306   :  { %v3805_v24 = vrot.slane %v3804_v22, 2  ;;  %v3813_v26 = vadd.f32 %v3812_v30, %v3811_v10  ;;  %v8097_v15 = vmul.f32 %v7888_v58, %v3759_v49  ;;  %v3792_v13 = vadd.f32 %v3791_v4, %v3790_v60 }
 0x307   :  { %v3800_v1 = vrot.slane %v3799_v7, 1  ;;  %v8101_v9 = vmul.f32 %v7891_v63, %v3760_v28  ;;  %v3147_v59 = vmul.f32 %v9526_v56, %v3107_v23  ;;  %v3203_v20 = vrot.slane %v8068_v18, %v6422_v45  ;;  %v9536_v23 = vld [vmem:[#allocation53_spill] sm:$0xff] }
 0x308   :  { %9523 = vst [vmem:[#allocation21_spill] sm:$0xff] %v8097_v15  ;;  %v3806_v11 = vadd.f32 %v3805_v24, %v3804_v22  ;;  %v3814_v39 = vrot.slane %v3813_v26, 1  ;;  %v3793_v6 = vrot.slane %v3792_v13, 1  ;;  %v3816_v53 = vsel %vm297_vm0, %v8097_v15, 0.0 }
 0x309   :  { %9525 = vst [vmem:[#allocation7_spill] sm:$0xff] %v8101_v9  ;;  %v9527_v58 = vrot.slane %v7917_v54, %v6414_v43  ;;  %v3823_v63 = vsel %vm297_vm0, %v8101_v9, 0.0  ;;  %v3801_v40 = vadd.f32 %v3800_v1, %v3799_v7  ;;  %v3817_v19 = vrot.slane %v3816_v53, 4  ;;  %v8180_v54 = vpop.permute.xlu1 %149  ;;  %v9583_v9 = vld [vmem:[#allocation25_spill] sm:$0xff] }
 0x30a   :  { %v3807_v61 = vrot.slane %v3806_v11, 1  ;;  %v3824_v29 = vrot.slane %v3823_v63, 4  ;;  %vm8123_vm14 = vcmp.lt.f32.partialorder %v7839_v35, %v198_v21  ;;  %v206_v2 = vrot.slane %v143_v8, %v6417_v44 }
 0x30b   :  { %vm8112_vm12 = vcmp.lt.f32.partialorder %v7839_v35, %v9527_v58  ;;  %vm8129_vm15 = vcmp.lt.f32.partialorder %v7839_v35, %v202_v5  ;;  %v3815_v62 = vadd.f32 %v3814_v39, %v3813_v26  ;;  %v3818_v41 = vadd.f32 %v3817_v19, %v3816_v53  ;;  %v9540_v26 = vld [vmem:[#allocation30_spill] sm:$0xff] }
 0x30c   :  { %v3163_v3 = vadd.f32 %v3147_v59, %v3067_v12  ;;  %v3299_v16 = vrot.slane %v8068_v18, %v6425_v46  ;;  %v3794_v10 = vadd.f32 %v3793_v6, %v3792_v13  ;;  %v3808_v31 = vadd.f32 %v3807_v61, %v3806_v11  ;;  %v9542_v12 = vld [vmem:[#allocation78_spill] sm:$0xff] }
 0x30d   :  { %v3825_v60 = vadd.f32 %v3824_v29, %v3823_v63  ;;  %v9535_v57 = vrot.slane %v9534_v37, 1  ;;  %v3819_v30 = vrot.slane %v3818_v41, 2  ;;  %v3243_v49 = vmul.f32 %v9536_v23, %v3203_v20 }
 0x30e   :  { %v9537_v4 = vmov 0.0   ;;  %vm8152_vm3 = vcmp.lt.f32.partialorder %v7839_v35, %v206_v2  ;;  %v9541_v5 = vrot.slane %v9540_v26, 1  ;;  %v3339_v11 = vmul.f32 %v9542_v12, %v3299_v16 }
 0x30f   :  { %v3989_v22 = vmul.f32 %v9535_v57, %v3801_v40  ;;  %v8144_v7 = vsel %vm8112_vm12, 1.0, %v9537_v4  ;;  %v3826_v21 = vrot.slane %v3825_v60, 2  ;;  %v8149_v8 = vsel %vm8123_vm14, 1.0, %v9537_v4  ;;  %v9543_v40 = vld [vmem:[#allocation43_spill] sm:$0xff] }
 0x310   :  { %v8120_v25 = vpop.f32.mrb[24].mxu0  ;;  %v8159_v24 = vsel %vm8129_vm15, 1.0, %v9537_v4  ;;  %v3991_v13 = vmul.f32 %v9541_v5, %v3815_v62  ;;  %v3820_v1 = vadd.f32 %v3819_v30, %v3818_v41  ;;  %v3259_v50 = vadd.f32 %v3243_v49, %v3163_v3  ;;  %v9544_v62 = vld [vmem:[#allocation47_spill] sm:$0xff] }
 0x311   :  { %v8135_v36 = vpop.f32.mrb[25].mxu0  ;;  %v3988_v39 = vmul.f32 %v9534_v37, %v3794_v10  ;;  %v3990_v56 = vmul.f32 %v9540_v26, %v3808_v31  ;;  %v3827_v59 = vadd.f32 %v3826_v21, %v3825_v60  ;;  %v3023_v6 = vrot.slane %v8075_v17, %v6414_v43  ;;  %v9546_v21 = vld [vmem:[#allocation54_spill] sm:$0xff] }
 0x312   :  { %v4022_v53 = vrot.slane %v3989_v22, 7  ;;  %v3821_v20 = vrot.slane %v3820_v1, 1  ;;  %v3395_v58 = vrot.slane %v8068_v18, %v6428_v47  ;;  %v3103_v42 = vrot.slane %v8075_v17, %v6417_v44  ;;  %v9545_v22 = vld [vmem:[#allocation75_spill] sm:$0xff] }
 0x313   :  { %v3828_v63 = vrot.slane %v3827_v59, 1  ;;  %v3066_v61 = vmul.f32 %v9543_v40, %v3023_v6  ;;  %v3199_v19 = vrot.slane %v8075_v17, %v6422_v45  ;;  %v8178_v29 = vsel %vm8152_vm3, 1.0, %v9537_v4 }
 0x314   :  { %v3355_v2 = vadd.f32 %v3339_v11, %v3259_v50  ;;  %v3491_v32 = vrot.slane %v8068_v18, %v6431_v48  ;;  %v3146_v41 = vmul.f32 %v9544_v62, %v3103_v42  ;;  %v4025_v16 = vrot.slane %v3990_v56, 6  ;;  %v9547_v50 = vld [vmem:[#allocation50_spill] sm:$0xff]  ;;  %v9548_v56 = vld [vmem:[#allocation36_spill] sm:$0xff]  ;;  %v9553_v62 = vld [vmem:[#allocation79_spill] sm:$0xff] }
 0x315   :  { %v4028_v10 = vrot.slane %v3991_v13, 5  ;;  %v3587_v31 = vrot.slane %v8068_v18, %v6440_v51  ;;  %v4024_v37 = vsel %vm4023_vm13, %v4022_v53, %v3988_v39  ;;  %v3822_v57 = vadd.f32 %v3821_v20, %v3820_v1  ;;  %v9549_v20 = vld [vmem:[#allocation67_spill] sm:$0xff] }
 0x316   :  { %v3435_v30 = vmul.f32 %v9545_v22, %v3395_v58  ;;  %v3162_v23 = vadd.f32 %v3146_v41, %v3066_v61  ;;  %v3829_v49 = vadd.f32 %v3828_v63, %v3827_v59  ;;  %v3242_v28 = vmul.f32 %v9546_v21, %v3199_v19  ;;  %v9550_v63 = vld [vmem:[#allocation69_spill] sm:$0xff] }
 0x317   :  { %v3295_v26 = vrot.slane %v8075_v17, %v6425_v46  ;;  %v3035_v5 = vrot.slane %v8120_v25, %v6414_v43  ;;  %v3531_v12 = vmul.f32 %v9547_v50, %v3491_v32  ;;  %v3683_v11 = vrot.slane %v8068_v18, %v9245_v52  ;;  %v9551_v18 = vld [vmem:[#allocation71_spill] sm:$0xff]  ;;  %v9555_v50 = vld [vmem:[#allocation85_spill] sm:$0xff] }
 0x318   :  { %v3451_v13 = vadd.f32 %v3435_v30, %v3355_v2  ;;  %v3115_v1 = vrot.slane %v8120_v25, %v6417_v44  ;;  %v4027_v39 = vsel %vm4026_vm2, %v4025_v16, %v4024_v37  ;;  %v3627_v59 = vmul.f32 %v9548_v56, %v3587_v31 }
 0x319   :  { %v3258_v6 = vadd.f32 %v3242_v28, %v3162_v23  ;;  %v3391_v53 = vrot.slane %v8075_v17, %v6428_v47  ;;  %v8208_v58 = vmul.f32 %v9549_v20, %v3822_v57  ;;  %v3487_v42 = vrot.slane %v8075_v17, %v6431_v48 }
 0x31a   :  { %v3069_v40 = vmul.f32 %v9550_v63, %v3035_v5  ;;  %v3149_v61 = vmul.f32 %v9551_v18, %v3115_v1  ;;  %v9552_v2 = vrot.slane %v9549_v20, 1  ;;  %v3338_v41 = vmul.f32 %v9553_v62, %v3295_v26  ;;  %v9554_v26 = vld [vmem:[#allocation76_spill] sm:$0xff] }
 0x31b   :  { %v3211_v16 = vrot.slane %v8120_v25, %v6422_v45  ;;  %v3307_v31 = vrot.slane %v8120_v25, %v6425_v46  ;;  %v8228_v57 = vsel %vm4029_vm4, %v4028_v10, %v4027_v39  ;;  %v3403_v22 = vrot.slane %v8120_v25, %v6428_v47  ;;  %v9556_v63 = vld [vmem:[#allocation84_spill] sm:$0xff] }
 0x31c   :  { %v8218_v32 = vmul.f32 %v9552_v2, %v3829_v49  ;;  %v3031_v30 = vrot.slane %v8135_v36, %v6414_v43  ;;  %v3111_v23 = vrot.slane %v8135_v36, %v6417_v44  ;;  %v3354_v49 = vadd.f32 %v3338_v41, %v3258_v6  ;;  %v9557_v2 = vld [vmem:[#allocation83_spill] sm:$0xff]  ;;  %v9558_v41 = vld [vmem:[#allocation98_spill] sm:$0xff] }
 0x31d   :  { %v3583_v21 = vrot.slane %v8075_v17, %v6440_v51  ;;  %v3499_v28 = vrot.slane %v8120_v25, %v6431_v48  ;;  %v3595_v10 = vrot.slane %v8120_v25, %v6440_v51  ;;  %v3434_v5 = vmul.f32 %v9554_v26, %v3391_v53  ;;  %v9559_v53 = vld [vmem:[#allocation70_spill] sm:$0xff] }
 0x31e   :  { %v8214_v19 = vpop.f32.mrb[26].mxu0  ;;  %v3530_v1 = vmul.f32 %v9555_v50, %v3487_v42  ;;  %v3679_v39 = vrot.slane %v8075_v17, %v9245_v52  ;;  %v3165_v56 = vadd.f32 %v3149_v61, %v3069_v40  ;;  %v3245_v18 = vmul.f32 %v9556_v63, %v3211_v16  ;;  %v9560_v42 = vld [vmem:[#allocation72_spill] sm:$0xff]  ;;  %v9562_v40 = vld [vmem:[#allocation103_spill] sm:$0xff]  ;;  %v9563_v63 = vld [vmem:[#allocation37_spill] sm:$0xff] }
 0x31f   :  { %v8225_v37 = vpop.f32.mrb[27].mxu0  ;;  %v3341_v62 = vmul.f32 %v9557_v2, %v3307_v31  ;;  %v3437_v60 = vmul.f32 %v9558_v41, %v3403_v22  ;;  %v3068_v26 = vmul.f32 %v9559_v53, %v3031_v30  ;;  %v3148_v50 = vmul.f32 %v9560_v42, %v3111_v23  ;;  %v9568_v42 = vld [vmem:[#allocation9_spill] sm:$0xff] }
 0x320   :  { %v8256_v17 = vmul.f32 %v9561_v34, %v3499_v28  ;;  %v8259_v61 = vmul.f32 %v9562_v40, %v3595_v10  ;;  %v3450_v6 = vadd.f32 %v3434_v5, %v3354_v49  ;;  %v3547_v20 = vadd.f32 %v3531_v12, %v3451_v13  ;;  %v9564_v34 = vld [vmem:[#allocation96_spill] sm:$0xff] }
 0x321   :  { %v3261_v16 = vadd.f32 %v3245_v18, %v3165_v56  ;;  %v3207_v31 = vrot.slane %v8135_v36, %v6422_v45  ;;  %v3303_v22 = vrot.slane %v8135_v36, %v6425_v46  ;;  %v3626_v2 = vmul.f32 %v9563_v63, %v3583_v21  ;;  %v9567_v18 = vld [vmem:[#allocation86_spill] sm:$0xff] }
 0x322   :  { %v3546_v23 = vadd.f32 %v3530_v1, %v3450_v6  ;;  %v3643_v41 = vadd.f32 %v3627_v59, %v3547_v20  ;;  %v3723_v28 = vmul.f32 %v9564_v34, %v3683_v11  ;;  %v3043_v10 = vrot.slane %v8214_v19, %v6414_v43  ;;  %v9565_v1 = vld [vmem:[#allocation97_spill] sm:$0xff] }
 0x323   :  { %v3164_v13 = vadd.f32 %v3148_v50, %v3068_v26  ;;  %v3399_v12 = vrot.slane %v8135_v36, %v6428_v47  ;;  %v3123_v5 = vrot.slane %v8214_v19, %v6417_v44  ;;  %v3219_v21 = vrot.slane %v8214_v19, %v6422_v45  ;;  %v9566_v11 = vld [vmem:[#allocation93_spill] sm:$0xff]  ;;  %v9569_v26 = vld [vmem:[#allocation24_spill] sm:$0xff] }
 0x324   :  { %v3642_v56 = vadd.f32 %v3626_v2, %v3546_v23  ;;  %v3722_v59 = vmul.f32 %v9565_v1, %v3679_v39  ;;  %v3739_v20 = vadd.f32 %v3723_v28, %v3643_v41  ;;  %v3071_v6 = vmul.f32 %v9566_v11, %v3043_v10  ;;  %v9570_v10 = vld [vmem:[#allocation64_spill] sm:$0xff]  ;;  %v9571_v1 = vld [vmem:[#allocation55_spill] sm:$0xff] }
 0x325   :  { %v3244_v53 = vmul.f32 %v9567_v18, %v3207_v31  ;;  %v3340_v40 = vmul.f32 %v9568_v42, %v3303_v22  ;;  %v3151_v50 = vmul.f32 %v9569_v26, %v3123_v5  ;;  %v3315_v63 = vrot.slane %v8214_v19, %v6425_v46  ;;  %v9572_v42 = vld [vmem:[#allocation135_spill] sm:$0xff] }
 0x326   :  { %v3495_v34 = vrot.slane %v8135_v36, %v6431_v48  ;;  %v3591_v2 = vrot.slane %v8135_v36, %v6440_v51  ;;  %v3738_v23 = vadd.f32 %v3722_v59, %v3642_v56  ;;  %v3762_v39 = vadd.f32 %v8007_v0, %v3739_v20  ;;  %v9575_v59 = vld [vmem:[#allocation80_spill] sm:$0xff] }
 0x327   :  { %v8266_v30 = vpop.f32.mrb[28].mxu0  ;;  %v3260_v41 = vadd.f32 %v3244_v53, %v3164_v13  ;;  %v3167_v28 = vadd.f32 %v3151_v50, %v3071_v6  ;;  %v3247_v31 = vmul.f32 %v9570_v10, %v3219_v21  ;;  %v3411_v22 = vrot.slane %v8214_v19, %v6428_v47 }
 0x328   :  { %v8271_v49 = vpop.f32.mrb[29].mxu0  ;;  %v3357_v5 = vadd.f32 %v3341_v62, %v3261_v16  ;;  %v3436_v11 = vmul.f32 %v9571_v1, %v3399_v12  ;;  %v3761_v18 = vadd.f32 %v8007_v0, %v3738_v23  ;;  %v8297_v26 = vmul.f32 %v9572_v42, %v3762_v39 }
 0x329   :  { %v3263_v3 = vadd.f32 %v3247_v31, %v3167_v28  ;;  %v3343_v56 = vmul.f32 %v9574_v14, %v3315_v63  ;;  %v3507_v13 = vrot.slane %v8214_v19, %v6431_v48  ;;  %v3603_v21 = vrot.slane %v8214_v19, %v6440_v51  ;;  %v9577_v63 = vld [vmem:[#allocation105_spill] sm:$0xff] }
 0x32a   :  { %9573 = vst [vmem:[#allocation40_spill] sm:$0xff] %v8297_v26  ;;  %v8305_v20 = vmul.f32 %v9575_v59, %v3761_v18  ;;  %v3837_v62 = vsel %vm297_vm0, %v8297_v26, 0.0  ;;  %v3699_v16 = vrot.slane %v8214_v19, %v9245_v52  ;;  %v3039_v12 = vrot.slane %v8225_v37, %v6414_v43 }
 0x32b   :  { %v3356_v14 = vadd.f32 %v3340_v40, %v3260_v41  ;;  %v3838_v53 = vrot.slane %v3837_v62, 4  ;;  %v3359_v50 = vadd.f32 %v3343_v56, %v3263_v3  ;;  %v3439_v23 = vmul.f32 %v9577_v63, %v3411_v22  ;;  %v9578_v40 = vld [vmem:[#allocation107_spill] sm:$0xff]  ;;  %v9579_v3 = vld [vmem:[#allocation102_spill] sm:$0xff]  ;;  %v9580_v22 = vld [vmem:[#allocation113_spill] sm:$0xff] }
 0x32c   :  { %9576 = vst [vmem:[#allocation8_spill] sm:$0xff] %v8305_v20  ;;  %v3453_v28 = vadd.f32 %v3437_v60, %v3357_v5  ;;  %v3687_v10 = vrot.slane %v8135_v36, %v9245_v52  ;;  %v3830_v19 = vsel %vm297_vm0, %v8305_v20, 0.0  ;;  %v3119_v31 = vrot.slane %v8225_v37, %v6417_v44  ;;  %v9581_v63 = vld [vmem:[#allocation117_spill] sm:$0xff]  ;;  %v9582_v5 = vld [vmem:[#allocation94_spill] sm:$0xff] }
 0x32d   :  { %v3831_v1 = vrot.slane %v3830_v19, 4  ;;  %v3839_v18 = vadd.f32 %v3838_v53, %v3837_v62  ;;  %v3455_v42 = vadd.f32 %v3439_v23, %v3359_v50  ;;  %v3535_v41 = vmul.f32 %v9578_v40, %v3507_v13  ;;  %v9584_v53 = vld [vmem:[#allocation104_spill] sm:$0xff]  ;;  %v9585_v13 = vld [vmem:[#allocation110_spill] sm:$0xff] }
 0x32e   :  { %v3532_v56 = vmul.f32 %v9579_v3, %v3495_v34  ;;  %v3631_v59 = vmul.f32 %v9580_v22, %v3603_v21  ;;  %v3727_v60 = vmul.f32 %v9581_v63, %v3699_v16  ;;  %v3070_v15 = vmul.f32 %v9582_v5, %v3039_v12 }
 0x32f   :  { %v3832_v36 = vadd.f32 %v3831_v1, %v3830_v19  ;;  %v3840_v27 = vrot.slane %v3839_v18, 2  ;;  %v3551_v20 = vadd.f32 %v3535_v41, %v3455_v42  ;;  %v3452_v26 = vadd.f32 %v3436_v11, %v3356_v14  ;;  %v9587_v19 = vld [vmem:[#allocation109_spill] sm:$0xff] }
 0x330   :  { %v3150_v55 = vmul.f32 %v9583_v9, %v3119_v31  ;;  %v3549_v62 = vadd.f32 %v8256_v17, %v3453_v28  ;;  %v3628_v50 = vmul.f32 %v9584_v53, %v3591_v2  ;;  %v3724_v23 = vmul.f32 %v9585_v13, %v3687_v10  ;;  %v9588_v28 = vld [vmem:[#allocation88_spill] sm:$0xff] }
 0x331   :  { %v8313_v6 = vpop.f32.mrb[30].mxu0  ;;  %v3833_v34 = vrot.slane %v3832_v36, 2  ;;  %v3841_v40 = vadd.f32 %v3840_v27, %v3839_v18  ;;  %v3647_v21 = vadd.f32 %v3631_v59, %v3551_v20  ;;  %v3548_v3 = vadd.f32 %v3532_v56, %v3452_v26 }
 0x332   :  { %v8316_v39 = vpop.f32.mrb[31].mxu0  ;;  %v3645_v16 = vadd.f32 %v8259_v61, %v3549_v62  ;;  %v9586_v12 = vrot.slane %v8120_v25, %v9245_v52  ;;  %v3051_v9 = vrot.slane %v8266_v30, %v6414_v43  ;;  %v3131_v17 = vrot.slane %v8266_v30, %v6417_v44  ;;  %v9589_v61 = vld [vmem:[#allocation87_spill] sm:$0xff]  ;;  %v9591_v62 = vld [vmem:[#allocation58_spill] sm:$0xff] }
 0x333   :  { %v3834_v2 = vadd.f32 %v3833_v34, %v3832_v36  ;;  %v3842_v14 = vrot.slane %v3841_v40, 1  ;;  %v3743_v27 = vadd.f32 %v3727_v60, %v3647_v21  ;;  %v3644_v20 = vadd.f32 %v3628_v50, %v3548_v3  ;;  %v9593_v34 = vld [vmem:[#allocation51_spill] sm:$0xff] }
 0x334   :  { %v3725_v11 = vmul.f32 %v9587_v19, %v9586_v12  ;;  %v3073_v10 = vmul.f32 %v9588_v28, %v3051_v9  ;;  %v3153_v31 = vmul.f32 %v9589_v61, %v3131_v17  ;;  %v3227_v25 = vrot.slane %v8266_v30, %v6422_v45  ;;  %v9598_v28 = vld [vmem:[#allocation49_spill] sm:$0xff] }
 0x335   :  { %v3835_v1 = vrot.slane %v3834_v2, 1  ;;  %v3843_v18 = vadd.f32 %v3842_v14, %v3841_v40  ;;  %v3766_v42 = vadd.f32 %v8007_v0, %v3743_v27  ;;  %v3740_v41 = vadd.f32 %v3724_v23, %v3644_v20  ;;  %v9597_v27 = vld [vmem:[#allocation111_spill] sm:$0xff] }
 0x336   :  { %v3741_v26 = vadd.f32 %v3725_v11, %v3645_v16  ;;  %v9590_v56 = vrot.slane %v8208_v58, 4  ;;  %v3215_v59 = vrot.slane %v8225_v37, %v6422_v45  ;;  %v3169_v60 = vadd.f32 %v3153_v31, %v3073_v10  ;;  %v9594_v16 = vld [vmem:[#allocation38_spill] sm:$0xff] }
 0x337   :  { %v3836_v5 = vadd.f32 %v3835_v1, %v3834_v2  ;;  %v3763_v36 = vadd.f32 %v8007_v0, %v3740_v41  ;;  %v3249_v53 = vmul.f32 %v9591_v62, %v3227_v25  ;;  %v3323_v50 = vrot.slane %v8266_v30, %v6425_v46  ;;  %v9601_v62 = vld [vmem:[#allocation100_spill] sm:$0xff] }
 0x338   :  { %v4033_v22 = vsel %vm4032_vm5, %v9590_v56, %v8228_v57  ;;  %v3764_v63 = vadd.f32 %v8007_v0, %v3741_v26  ;;  %v9592_v13 = vrot.slane %v8118_v33, 1  ;;  %v3166_v58 = vadd.f32 %v3150_v55, %v3070_v15  ;;  %v9596_v55 = vld [vmem:[#allocation95_spill] sm:$0xff] }
 0x339   :  { %v3311_v57 = vrot.slane %v8225_v37, %v6425_v46  ;;  %v3994_v21 = vmul.f32 %v8118_v33, %v3836_v5  ;;  %v8367_v3 = vmul.f32 %v8149_v8, %v3766_v42  ;;  %v8370_v12 = vmul.f32 %v9594_v16, %v3763_v36 }
 0x33a   :  { %v3995_v23 = vmul.f32 %v9592_v13, %v3843_v18  ;;  %v8363_v40 = vmul.f32 %v9593_v34, %v3764_v63  ;;  %v3265_v19 = vadd.f32 %v3249_v53, %v3169_v60  ;;  %v9595_v11 = vrot.slane %v8218_v32, 3  ;;  %v9600_v60 = vld [vmem:[#allocation108_spill] sm:$0xff] }
 0x33b   :  { %v3246_v15 = vmul.f32 %v9596_v55, %v3215_v59  ;;  %v3407_v17 = vrot.slane %v8225_v37, %v6428_v47  ;;  %v3503_v2 = vrot.slane %v8225_v37, %v6431_v48  ;;  %v4037_v33 = vrot.slane %v3994_v21, 2  ;;  %v9599_v59 = vld [vmem:[#allocation106_spill] sm:$0xff] }
 0x33c   :  { %v4036_v9 = vsel %vm4035_vm6, %v9595_v11, %v4033_v22  ;;  %v3844_v8 = vsel %vm297_vm0, %v8370_v12, 0.0  ;;  %v3851_v14 = vsel %vm297_vm0, %v8363_v40, 0.0  ;;  %v3345_v20 = vmul.f32 %v9597_v27, %v3323_v50  ;;  %v9602_v50 = vld [vmem:[#allocation82_spill] sm:$0xff] }
 0x33d   :  { %v4040_v32 = vrot.slane %v3995_v23, 1  ;;  %v3262_v26 = vadd.f32 %v3246_v15, %v3166_v58  ;;  %v3342_v10 = vmul.f32 %v9598_v28, %v3311_v57  ;;  %v3419_v61 = vrot.slane %v8266_v30, %v6428_v47  ;;  %v9603_v57 = vld [vmem:[#allocation99_spill] sm:$0xff] }
 0x33e   :  { %v4039_v31 = vsel %vm4038_vm7, %v4037_v33, %v4036_v9  ;;  %v8391_v25 = vsel %vm297_vm0, %v8367_v3, 0.0  ;;  %v3361_v1 = vadd.f32 %v3345_v20, %v3265_v19  ;;  %v3047_v18 = vrot.slane %v8271_v49, %v6414_v43 }
 0x33f   :  { %v4042_v42 = vsel %vm4041_vm8, %v4040_v32, %v4039_v31  ;;  %v3845_v41 = vrot.slane %v3844_v8, 4  ;;  %v3852_v56 = vrot.slane %v3851_v14, 4  ;;  %v3127_v22 = vrot.slane %v8271_v49, %v6417_v44  ;;  %v9604_v32 = vld [vmem:[#allocation115_spill] sm:$0xff] }
 0x340   :  { %5471 = vmatprep.mubr.msk.f32.mxu1 %vm297_vm0, %v4042_v42  ;;  %v8400_v63 = vmul.f32 %v9599_v59, %v3407_v17  ;;  %v8403_v5 = vmul.f32 %v9600_v60, %v3503_v2  ;;  %v3599_v36 = vrot.slane %v8225_v37, %v6440_v51  ;;  %v3072_v53 = vmul.f32 %v9601_v62, %v3047_v18  ;;  %v9608_v42 = vld [vmem:[#allocation92_spill] sm:$0xff] }
 0x341   :  { %v3441_v13 = vmul.f32 %v9602_v50, %v3419_v61  ;;  %v3515_v23 = vrot.slane %v8266_v30, %v6431_v48  ;;  %v3611_v58 = vrot.slane %v8266_v30, %v6440_v51  ;;  %v3152_v34 = vmul.f32 %v9603_v57, %v3127_v22  ;;  %v9606_v61 = vld [vmem:[#allocation59_spill] sm:$0xff]  ;;  %v9609_v60 = vld [vmem:[#allocation112_spill] sm:$0xff] }
 0x342   :  { %v3866_v21 = vrot.slane %v8391_v25, 4  ;;  %v3358_v16 = vadd.f32 %v3342_v10, %v3262_v26  ;;  %v3695_v19 = vrot.slane %v8225_v37, %v9245_v52  ;;  %v3223_v11 = vrot.slane %v8271_v49, %v6422_v45 }
 0x343   :  { %v8419_v9 = vadd.f32 %v3845_v41, %v3844_v8  ;;  %v8421_v55 = vadd.f32 %v3852_v56, %v3851_v14  ;;  %v3457_v15 = vadd.f32 %v3441_v13, %v3361_v1  ;;  %v3319_v17 = vrot.slane %v8271_v49, %v6425_v46  ;;  %v9605_v8 = vld [vmem:[#allocation125_spill] sm:$0xff] }
 0x344   :  { %v3707_v2 = vrot.slane %v8266_v30, %v9245_v52  ;;  %v3168_v33 = vadd.f32 %v3152_v34, %v3072_v53  ;;  %v3059_v27 = vrot.slane %v8313_v6, %v6414_v43  ;;  %v3139_v20 = vrot.slane %v8313_v6, %v6417_v44  ;;  %v9607_v1 = vld [vmem:[#allocation73_spill] sm:$0xff] }
 0x345   :  { %v3537_v26 = vmul.f32 %v9604_v32, %v3515_v23  ;;  %v3633_v28 = vmul.f32 %v9605_v8, %v3611_v58  ;;  %v3415_v14 = vrot.slane %v8271_v49, %v6428_v47  ;;  %v3235_v10 = vrot.slane %v8313_v6, %v6422_v45  ;;  %v9610_v58 = vld [vmem:[#allocation119_spill] sm:$0xff]  ;;  %v9611_v34 = vld [vmem:[#allocation77_spill] sm:$0xff] }
 0x346   :  { %v3248_v31 = vmul.f32 %v9606_v61, %v3223_v11  ;;  %v3075_v18 = vmul.f32 %v9607_v1, %v3059_v27  ;;  %v3155_v41 = vmul.f32 %v9608_v42, %v3139_v20  ;;  %v3331_v56 = vrot.slane %v8313_v6, %v6425_v46  ;;  %v9612_v8 = vld [vmem:[#allocation121_spill] sm:$0xff]  ;;  %v9614_v1 = vld [vmem:[#allocation74_spill] sm:$0xff] }
 0x347   :  { %v3847_v22 = vrot.slane %v8419_v9, 2  ;;  %v3854_v59 = vrot.slane %v8421_v55, 2  ;;  %v3344_v62 = vmul.f32 %v9609_v60, %v3319_v17  ;;  %v3511_v53 = vrot.slane %v8271_v49, %v6431_v48 }
 0x348   :  { %v3264_v50 = vadd.f32 %v3248_v31, %v3168_v33  ;;  %v3607_v13 = vrot.slane %v8271_v49, %v6440_v51  ;;  %v3171_v23 = vadd.f32 %v3155_v41, %v3075_v18  ;;  %v3251_v57 = vmul.f32 %v9610_v58, %v3235_v10  ;;  %v9613_v31 = vld [vmem:[#allocation116_spill] sm:$0xff]  ;;  %v9615_v58 = vld [vmem:[#allocation91_spill] sm:$0xff] }
 0x349   :  { %v3440_v11 = vmul.f32 %v9611_v34, %v3415_v14  ;;  %v3427_v27 = vrot.slane %v8313_v6, %v6428_v47  ;;  %v3523_v20 = vrot.slane %v8313_v6, %v6431_v48  ;;  %v3055_v17 = vrot.slane %v8316_v39, %v6414_v43 }
 0x34a   :  { %v3267_v32 = vadd.f32 %v3251_v57, %v3171_v23  ;;  %v3347_v33 = vmul.f32 %v9612_v8, %v3331_v56  ;;  %v3619_v61 = vrot.slane %v8313_v6, %v6440_v51  ;;  %v3135_v10 = vrot.slane %v8316_v39, %v6417_v44  ;;  %v9616_v8 = vld [vmem:[#allocation123_spill] sm:$0xff] }
 0x34b   :  { %v3536_v14 = vmul.f32 %v9613_v31, %v3511_v53  ;;  %v3074_v18 = vmul.f32 %v9614_v1, %v3055_v17  ;;  %v3231_v42 = vrot.slane %v8316_v39, %v6422_v45  ;;  %v3327_v41 = vrot.slane %v8316_v39, %v6425_v46  ;;  %v9617_v31 = vld [vmem:[#allocation127_spill] sm:$0xff] }
 0x34c   :  { %v3360_v60 = vadd.f32 %v3344_v62, %v3264_v50  ;;  %v3363_v23 = vadd.f32 %v3347_v33, %v3267_v32  ;;  %v3154_v56 = vmul.f32 %v9615_v58, %v3135_v10  ;;  %v3423_v57 = vrot.slane %v8316_v39, %v6428_v47  ;;  %v9621_v50 = vld [vmem:[#allocation129_spill] sm:$0xff]  ;;  %v9622_v33 = vld [vmem:[#allocation120_spill] sm:$0xff]  ;;  %v9623_v10 = vld [vmem:[#allocation122_spill] sm:$0xff] }
 0x34d   :  { %v3703_v34 = vrot.slane %v8271_v49, %v9245_v52  ;;  %v3443_v53 = vmul.f32 %v9616_v8, %v3427_v27  ;;  %v3539_v17 = vmul.f32 %v9617_v31, %v3523_v20  ;;  %v3715_v45 = vrot.slane %v8313_v6, %v9245_v52 }
 0x34e   :  { %v9618_v46 = vrot.slane %v8180_v54, %v6414_v43  ;;  %v3635_v47 = vmul.f32 %v9621_v50, %v3619_v61  ;;  %v3170_v32 = vadd.f32 %v3154_v56, %v3074_v18  ;;  %v3250_v49 = vmul.f32 %v9622_v33, %v3231_v42  ;;  %v9627_v56 = vld [vmem:[#allocation124_spill] sm:$0xff] }
 0x34f   :  { %v3346_v27 = vmul.f32 %v9623_v10, %v3327_v41  ;;  %v9624_v20 = vrot.slane %v8180_v54, %v6417_v44  ;;  %v3459_v1 = vadd.f32 %v3443_v53, %v3363_v23  ;;  %v3519_v58 = vrot.slane %v8316_v39, %v6431_v48  ;;  %v9628_v23 = vld [vmem:[#allocation114_spill] sm:$0xff] }
 0x350   :  { %vm8481_vm9 = vcmp.lt.f32.partialorder %v7839_v35, %v9618_v46  ;;  %v3615_v61 = vrot.slane %v8316_v39, %v6440_v51  ;;  %v3454_v18 = vadd.f32 %v8400_v63, %v3358_v16  ;;  %v3266_v42 = vadd.f32 %v3250_v49, %v3170_v32  ;;  %v9629_v48 = vld [vmem:[#allocation118_spill] sm:$0xff] }
 0x351   :  { %vm8492_vm10 = vcmp.lt.f32.partialorder %v7839_v35, %v9624_v20  ;;  %v3442_v41 = vmul.f32 %v9627_v56, %v3423_v57  ;;  %v3711_v44 = vrot.slane %v8316_v39, %v9245_v52  ;;  %v3456_v54 = vadd.f32 %v3440_v11, %v3360_v60  ;;  %v9630_v57 = vld [vmem:[#allocation126_spill] sm:$0xff]  ;;  %v3934_v20 = vpop.permute.xlu1 %3933 }
 0x352   :  { %v3550_v35 = vadd.f32 %v8403_v5, %v3454_v18  ;;  %v3630_v8 = vmul.f32 %v9628_v23, %v3599_v36  ;;  %v3726_v53 = vmul.f32 %v9629_v48, %v3695_v19  ;;  %v3553_v31 = vadd.f32 %v3537_v26, %v3457_v15  ;;  %v9631_v5 = vld [vmem:[#allocation131_spill] sm:$0xff]  ;;  %v9632_v36 = vld [vmem:[#allocation128_spill] sm:$0xff] }
 0x353   :  { %v3362_v46 = vadd.f32 %v3346_v27, %v3266_v42  ;;  %v3867_v63 = vadd.f32 %v3866_v21, %v8391_v25  ;;  %v3552_v16 = vadd.f32 %v3536_v14, %v3456_v54  ;;  %v3632_v50 = vmul.f32 %v9630_v57, %v3607_v13  ;;  %v9633_v15 = vld [vmem:[#allocation132_spill] sm:$0xff]  ;;  %v9635_v27 = vld [vmem:[#allocation133_spill] sm:$0xff] }
 0x354   :  { %v3646_v39 = vadd.f32 %v3630_v8, %v3550_v35  ;;  %v3649_v11 = vadd.f32 %v3633_v28, %v3553_v31  ;;  %v3729_v51 = vmul.f32 %v9631_v5, %v3707_v2  ;;  %v3555_v37 = vadd.f32 %v3539_v17, %v3459_v1  ;;  %v9634_v28 = vld [vmem:[#allocation130_spill] sm:$0xff] }
 0x355   :  { %v3538_v60 = vmul.f32 %v9632_v36, %v3519_v58  ;;  %v3648_v19 = vadd.f32 %v3632_v50, %v3552_v16  ;;  %v3728_v26 = vmul.f32 %v9633_v15, %v3703_v34  ;;  %v3458_v32 = vadd.f32 %v3442_v41, %v3362_v46  ;;  %v3941_v35 = vpop.permute.xlu1 %3940 }
 0x356   :  { %v3855_v33 = vadd.f32 %v3854_v59, %v8421_v55  ;;  %v3742_v25 = vadd.f32 %v3726_v53, %v3646_v39  ;;  %v3745_v21 = vadd.f32 %v3729_v51, %v3649_v11  ;;  %v3651_v14 = vadd.f32 %v3635_v47, %v3555_v37  ;;  %v9636_v47 = vld [vmem:[#allocation134_spill] sm:$0xff] }
 0x357   :  { %v3744_v13 = vadd.f32 %v3728_v26, %v3648_v19  ;;  %v3554_v49 = vadd.f32 %v3538_v60, %v3458_v32  ;;  %v3634_v10 = vmul.f32 %v9634_v28, %v3615_v61  ;;  %v3731_v52 = vmul.f32 %v9635_v27, %v3715_v45 }
 0x358   :  { %v3848_v30 = vadd.f32 %v3847_v22, %v8419_v9  ;;  %v3765_v2 = vadd.f32 %v8007_v0, %v3742_v25  ;;  %v3868_v17 = vrot.slane %v3867_v63, 2  ;;  %v3768_v34 = vadd.f32 %v8007_v0, %v3745_v21 }
 0x359   :  { %v3767_v55 = vadd.f32 %v8007_v0, %v3744_v13  ;;  %v3650_v59 = vadd.f32 %v3634_v10, %v3554_v49  ;;  %v3730_v1 = vmul.f32 %v9636_v47, %v3711_v44  ;;  %v3747_v58 = vadd.f32 %v3731_v52, %v3651_v14  ;;  %v3948_v5 = vpop.permute.xlu1 %3947 }
 0x35a   :  { %v5127_v45 = vsel %vm8481_vm9, 1.0, %v9537_v4  ;;  %v3856_v61 = vrot.slane %v3855_v33, 1  ;;  %v8534_v18 = vmul.f32 %v8144_v7, %v3765_v2  ;;  %v8537_v9 = vmul.f32 %v8178_v29, %v3768_v34 }
 0x35b   :  { %v5128_v22 = vsel %vm8492_vm10, 1.0, %v9537_v4  ;;  %v8543_v42 = vmul.f32 %v8159_v24, %v3767_v55  ;;  %v3746_v56 = vadd.f32 %v3730_v1, %v3650_v59  ;;  %v3770_v41 = vadd.f32 %v8007_v0, %v3747_v58 }
 0x35c   :  { %v3968_v44 = vrot.slane %v3934_v20, 1  ;;  %v3858_v62 = vsel %vm297_vm0, %v8534_v18, 0.0  ;;  %v3869_v54 = vadd.f32 %v3868_v17, %v3867_v63  ;;  %v3879_v7 = vsel %vm297_vm0, %v8537_v9, 0.0 }
 0x35d   :  { %v3849_v29 = vrot.slane %v3848_v30, 1  ;;  %v3859_v23 = vrot.slane %v3858_v62, 4  ;;  %v3872_v6 = vsel %vm297_vm0, %v8543_v42, 0.0  ;;  %v3880_v8 = vrot.slane %v3879_v7, 4  ;;  %v3955_v17 = vpop.permute.xlu1 %3954 }
 0x35e   :  { %v3857_v24 = vadd.f32 %v3856_v61, %v3855_v33  ;;  %v3873_v48 = vrot.slane %v3872_v6, 4  ;;  %v3769_v53 = vadd.f32 %v8007_v0, %v3746_v56  ;;  %v8553_v31 = vmul.f32 %v5128_v22, %v3770_v41 }
 0x35f   :  { %v3860_v46 = vadd.f32 %v3859_v23, %v3858_v62  ;;  %v3881_v16 = vadd.f32 %v3880_v8, %v3879_v7  ;;  %v3870_v57 = vrot.slane %v3869_v54, 1  ;;  %v3850_v36 = vadd.f32 %v3849_v29, %v3848_v30 }
 0x360   :  { %v3874_v63 = vadd.f32 %v3873_v48, %v3872_v6  ;;  %v8555_v50 = vmul.f32 %v5127_v45, %v3769_v53  ;;  %v3893_v39 = vsel %vm297_vm0, %v8553_v31, 0.0  ;;  %v3997_v60 = vmul.f32 %v3968_v44, %v3857_v24 }
 0x361   :  { %v3861_v11 = vrot.slane %v3860_v46, 2  ;;  %v3882_v51 = vrot.slane %v3881_v16, 2  ;;  %v3894_v37 = vrot.slane %v3893_v39, 4  ;;  %v3871_v25 = vadd.f32 %v3870_v57, %v3869_v54 }
 0x362   :  { %v3875_v19 = vrot.slane %v3874_v63, 2  ;;  %v3886_v0 = vsel %vm297_vm0, %v8555_v50, 0.0  ;;  %v3969_v21 = vrot.slane %v3941_v35, 1  ;;  %v3996_v27 = vmul.f32 %v3934_v20, %v3850_v36 }
 0x363   :  { %v3862_v15 = vadd.f32 %v3861_v11, %v3860_v46  ;;  %v3883_v26 = vadd.f32 %v3882_v51, %v3881_v16  ;;  %v3887_v32 = vrot.slane %v3886_v0, 4  ;;  %v3895_v33 = vadd.f32 %v3894_v37, %v3893_v39 }
 0x364   :  { %v3876_v14 = vadd.f32 %v3875_v19, %v3874_v63  ;;  %v4043_v2 = vrot.slane %v3997_v60, 7  ;;  %v3999_v59 = vmul.f32 %v3969_v21, %v3871_v25  ;;  %v3970_v58 = vrot.slane %v3948_v5, 1  ;;  %v9637_v19 = vld [vmem:[#allocation6_spill] sm:$0xff] }
 0x365   :  { %v3863_v13 = vrot.slane %v3862_v15, 1  ;;  %v3884_v49 = vrot.slane %v3883_v26, 1  ;;  %v3888_v28 = vadd.f32 %v3887_v32, %v3886_v0  ;;  %v3896_v10 = vrot.slane %v3895_v33, 2 }
 0x366   :  { %v3877_v52 = vrot.slane %v3876_v14, 1  ;;  %v3971_v41 = vrot.slane %v3955_v17, 1  ;;  %v4044_v20 = vsel %vm4023_vm13, %v4043_v2, %v3996_v27  ;;  %v4047_v7 = vrot.slane %v3999_v59, 5 }
 0x367   :  { %v3864_v30 = vadd.f32 %v3863_v13, %v3862_v15  ;;  %v3889_v34 = vrot.slane %v3888_v28, 2  ;;  %v3897_v55 = vadd.f32 %v3896_v10, %v3895_v33  ;;  %v3885_v1 = vadd.f32 %v3884_v49, %v3883_v26 }
 0x368   :  { %v3878_v47 = vadd.f32 %v3877_v52, %v3876_v14  ;;  %v6036_v51 = vmov 1966171168   ;;  %vm4786_vm12 = vcmask 392192   ;;  %vm4790_vm14 = vcmask 654336  }
 0x369   :  { %v3998_v45 = vmul.f32 %v3941_v35, %v3864_v30  ;;  %v3890_v61 = vadd.f32 %v3889_v34, %v3888_v28  ;;  %v3898_v22 = vrot.slane %v3897_v55, 1  ;;  %v4001_v29 = vmul.f32 %v3970_v58, %v3885_v1 }
 0x36a   :  { %v4000_v56 = vmul.f32 %v3948_v5, %v3878_v47  ;;  %v4142_v37 = vunpack.c.l.s4 %v6036_v51  ;;  %vm4792_vm15 = vcmask 785408  }
 0x36b   :  { %v4045_v44 = vrot.slane %v3998_v45, 6  ;;  %v3891_v62 = vrot.slane %v3890_v61, 1  ;;  %v3899_v54 = vadd.f32 %v3898_v22, %v3897_v55  ;;  %v4051_v46 = vrot.slane %v4001_v29, 3 }
 0x36c   :  { %v4049_v23 = vrot.slane %v4000_v56, 4  ;;  %v4143_v60 = vunpack.c.0.s8 %v4142_v37  ;;  %v9638_v56 = vld [vmem:[#allocation63_spill] sm:$0xff]  ;;  %v9641_v37 = vld [vmem:[#allocation62_spill] sm:$0xff] }
 0x36d   :  { %v4046_v6 = vsel %vm4026_vm2, %v4045_v44, %v4044_v20  ;;  %v3892_v8 = vadd.f32 %v3891_v62, %v3890_v61  ;;  %v4003_v48 = vmul.f32 %v3971_v41, %v3899_v54 }
 0x36e   :  { %v4048_v24 = vsel %vm4029_vm4, %v4047_v7, %v4046_v6  ;;  %v8571_v0 = vsub.s32 %v4143_v60, %v9637_v19  ;;  %v9639_v6 = vld [vmem:[#allocation7_spill] sm:$0xff] }
 0x36f   :  { %v4050_v35 = vsel %vm4032_vm5, %v4049_v23, %v4048_v24  ;;  %v4002_v53 = vmul.f32 %v3955_v17, %v3892_v8  ;;  %v4055_v63 = vrot.slane %v4003_v48, 1 }
 0x370   :  { %v4052_v57 = vsel %vm4035_vm6, %v4051_v46, %v4050_v35 }
 0x371   :  { %v4053_v16 = vrot.slane %v4002_v53, 2 }
 0x373   :  { %v4054_v39 = vsel %vm4038_vm7, %v4053_v16, %v4052_v57 }
 0x374   :  { %v4056_v11 = vsel %vm4041_vm8, %v4055_v63, %v4054_v39  ;;  %v9640_v63 = vld [vmem:[#allocation40_spill] sm:$0xff] }
 0x375   :  { %5472 = vmatmul.mubr.msk.f32.vlgmr.msra.gmra.mrb[16].mxu1 %vm297_vm0, %v4056_v11 }
 0x376   :  { %4688 = vmatprep.mubr.f32.mxu1 %v9537_v4 }
 0x448   :  { %v5473_v5 = vpop.f32.mrb[16].mxu1 }
 0x449   :  { %5965 = vtanh.f32 %v5473_v5  ;;  %v4127_v36 = vpop.f32.mrb[17].mxu1 }
 0x44a   :  { %5967 = vtanh.f32 %v4127_v36 }
 0x453   :  { %v5966_v15 = vpop.eup %5965 }
 0x454   :  { %v5968_v26 = vpop.eup %5967  ;;  %v4189_v32 = vcombine.high %v5966_v15, %v5966_v15  ;;  %v4196_v33 = vrot.slane %v5966_v15, %v8571_v0 }
 0x455   :  { %v4140_v25 = vcombine.high %v5968_v26, %v5968_v26  ;;  %v4147_v21 = vrot.slane %v5968_v26, %v8571_v0 }
 0x456   :  { %v4204_v14 = vcombine.high %v4196_v33, %v4196_v33  ;;  %v4203_v13 = vrot.slane %v4189_v32, %v8571_v0  ;;  %v4212_v19 = vrot.slane %v4196_v33, %v8571_v0 }
 0x457   :  { %v4155_v49 = vcombine.high %v4147_v21, %v4147_v21  ;;  %v4154_v28 = vrot.slane %v4140_v25, %v8571_v0  ;;  %v4163_v29 = vrot.slane %v4147_v21, %v8571_v0 }
 0x458   :  { %v4226_v10 = vrot.slane %v4204_v14, %v8571_v0  ;;  %v4205_v2 = vcombine.high %v4203_v13, %v4203_v13  ;;  %v9642_v14 = vld [vmem:[#allocation21_spill] sm:$0xff] }
 0x459   :  { %v4177_v27 = vrot.slane %v4155_v49, %v8571_v0  ;;  %v4156_v52 = vcombine.high %v4154_v28, %v4154_v28  ;;  %v4241_v46 = vrot.slane %v4163_v29, %v6414_v43  ;;  %v4170_v16 = vrot.slane %v4154_v28, %v8571_v0 }
 0x45a   :  { %v4236_v30 = vcombine.high %v4226_v10, %v4226_v10  ;;  %v4277_v58 = vrot.slane %v4226_v10, %v6414_v43  ;;  %v4233_v45 = vrot.slane %v4205_v2, %v8571_v0  ;;  %v4185_v5 = vcombine.high %v4163_v29, %v4163_v29  ;;  %v4613_v29 = vld [vmem:[%s8879_s10 + $0x20] sm:$0xff] }
 0x45b   :  { %v4245_v17 = vrot.slane %v4177_v27, %v6414_v43  ;;  %v4187_v34 = vcombine.high %v4177_v27, %v4177_v27  ;;  %v4184_v55 = vrot.slane %v4156_v52, %v8571_v0  ;;  %v4318_v36 = vmul.f32 %v4241_v46, %v9641_v37  ;;  %v9643_v27 = vld [vmem:[#allocation20_spill] sm:$0xff] }
 0x45c   :  { %v4285_v59 = vrot.slane %v4236_v30, %v6414_v43  ;;  %v4327_v20 = vmul.f32 %v4277_v58, %v8363_v40  ;;  %v4293_v7 = vrot.slane %v4233_v45, %v6414_v43  ;;  %v4237_v48 = vcombine.high %v4233_v45, %v4233_v45 }
 0x45d   :  { %v4319_v47 = vmul.f32 %v4245_v17, %v8024_v38  ;;  %v4253_v1 = vrot.slane %v4187_v34, %v6414_v43  ;;  %v4261_v61 = vrot.slane %v4184_v55, %v6414_v43  ;;  %v4188_v62 = vcombine.high %v4184_v55, %v4184_v55 }
 0x45e   :  { %v4329_v44 = vmul.f32 %v4285_v59, %v8367_v3  ;;  %v4361_v35 = vsel %vm297_vm0, %v4327_v20, 0.0  ;;  %v4331_v53 = vmul.f32 %v4293_v7, %v8537_v9  ;;  %v4301_v11 = vrot.slane %v4237_v48, %v6414_v43  ;;  %v4610_v7 = vld [vmem:[%s8879_s10 + $0x8] sm:$0xff]  ;;  %v4616_v48 = vld [vmem:[%s8879_s10 + $0x38] sm:$0xff] }
 0x45f   :  { %v4337_v22 = vsel %vm297_vm0, %v4319_v47, 0.0  ;;  %v4321_v41 = vmul.f32 %v4253_v1, %v9638_v56  ;;  %v4323_v8 = vmul.f32 %v4261_v61, %v9639_v6  ;;  %v4269_v24 = vrot.slane %v4188_v62, %v6414_v43  ;;  %v9644_v47 = vld [vmem:[#allocation8_spill] sm:$0xff] }
 0x460   :  { %4338 = vadd.xlane.f32.xlu0 %v4337_v22  ;;  %v4367_v23 = vsel %vm297_vm0, %v4329_v44, 0.0  ;;  %v4373_v51 = vsel %vm297_vm0, %v4331_v53, 0.0  ;;  %v4257_v60 = vrot.slane %v4170_v16, %v6414_v43  ;;  %v4333_v26 = vmul.f32 %v4301_v11, %v8553_v31 }
 0x461   :  { %v4343_v54 = vsel %vm297_vm0, %v4321_v41, 0.0  ;;  %v4349_v57 = vsel %vm297_vm0, %v4323_v8, 0.0  ;;  %v4325_v39 = vmul.f32 %v4269_v24, %v9640_v63  ;;  %v4249_v32 = vrot.slane %v4185_v5, %v6414_v43  ;;  %v4612_v24 = vld [vmem:[%s8879_s10 + $0x18] sm:$0xff] }
 0x462   :  { %4344 = vadd.xlane.f32.xlu1 %v4343_v54  ;;  %v4186_v25 = vcombine.high %v4170_v16, %v4170_v16  ;;  %v4334_v21 = vsel %vm297_vm0, %v4318_v36, 0.0  ;;  %v4322_v49 = vmul.f32 %v4257_v60, %v9642_v14  ;;  %v4273_v28 = vrot.slane %v4212_v19, %v6414_v43  ;;  %v4615_v16 = vld [vmem:[%s8879_s10 + $0x30] sm:$0xff] }
 0x463   :  { %v4355_v15 = vsel %vm297_vm0, %v4325_v39, 0.0  ;;  %v4219_v10 = vrot.slane %v4203_v13, %v8571_v0  ;;  %v4379_v33 = vsel %vm297_vm0, %v4333_v26, 0.0  ;;  %v4320_v52 = vmul.f32 %v4249_v32, %v9643_v27 }
 0x464   :  { %4368 = vadd.xlane.f32.xlu0 %v4367_v23  ;;  %v4265_v2 = vrot.slane %v4186_v25, %v6414_v43  ;;  %v4234_v30 = vcombine.high %v4212_v19, %v4212_v19  ;;  %v4346_v17 = vsel %vm297_vm0, %v4322_v49, 0.0  ;;  %v4326_v34 = vmul.f32 %v4273_v28, %v8370_v12  ;;  %v4609_v23 = vld [vmem:[%s8879_s10] sm:$0xff] }
 0x465   :  { %v4289_v55 = vrot.slane %v4219_v10, %v6414_v43  ;;  %v4340_v59 = vsel %vm297_vm0, %v4320_v52, 0.0  ;;  %v4235_v1 = vcombine.high %v4219_v10, %v4219_v10  ;;  %v5521_v8 = vpack.c.bf16 %v4613_v29, %v4610_v7 }
 0x466   :  { %4362 = vadd.xlane.f32.xlu1 %v4361_v35  ;;  %v4324_v0 = vmul.f32 %v4265_v2, %v9644_v47  ;;  %v4281_v13 = vrot.slane %v4234_v30, %v6414_v43  ;;  %v4358_v58 = vsel %vm297_vm0, %v4326_v34, 0.0  ;;  %v4619_v35 = vld [vmem:[%s8879_s10 + $0x50] sm:$0xff]  ;;  %v5523_v53 = vpack.c.bf16 %v4612_v24, %v4609_v23 }
 0x467   :  { %v4330_v45 = vmul.f32 %v4289_v55, %v8543_v42  ;;  %v4297_v41 = vrot.slane %v4235_v1, %v6414_v43  ;;  %v5525_v46 = vpack.c.bf16 %v4619_v35, %v4616_v48  ;;  %5522 = vmatprep.subr.bf16.mxu1 %v5521_v8 }
 0x468   :  { %4350 = vadd.xlane.f32.xlu0 %v4349_v57  ;;  %v4352_v61 = vsel %vm297_vm0, %v4324_v0, 0.0  ;;  %v4328_v22 = vmul.f32 %v4281_v13, %v8534_v18  ;;  %v4618_v57 = vld [vmem:[%s8879_s10 + $0x48] sm:$0xff]  ;;  %5524 = vmatpush1.bf16.msra.mxu1 %v5523_v53 }
 0x469   :  { %v4370_v44 = vsel %vm297_vm0, %v4330_v45, 0.0  ;;  %v4332_v54 = vmul.f32 %v4297_v41, %v8555_v50  ;;  %v5527_v39 = vpack.c.bf16 %v4618_v57, %v4615_v16  ;;  %5526 = vmatprep.subr.bf16.mxu1 %v5525_v46 }
 0x46a   :  { %4374 = vadd.xlane.f32.xlu1 %v4373_v51  ;;  %v4364_v62 = vsel %vm297_vm0, %v4328_v22, 0.0 }
 0x46b   :  { %v4376_v20 = vsel %vm297_vm0, %v4332_v54, 0.0 }
 0x46c   :  { %4356 = vadd.xlane.f32.xlu0 %v4355_v15  ;;  %5528 = vmatpush1.bf16.msra.mxu1 %v5527_v39 }
 0x46e   :  { %4335 = vadd.xlane.f32.xlu1 %v4334_v21 }
 0x470   :  { %4380 = vadd.xlane.f32.xlu0 %v4379_v33 }
 0x472   :  { %4347 = vadd.xlane.f32.xlu1 %v4346_v17 }
 0x474   :  { %4341 = vadd.xlane.f32.xlu0 %v4340_v59 }
 0x476   :  { %4359 = vadd.xlane.f32.xlu1 %v4358_v58 }
 0x478   :  { %4353 = vadd.xlane.f32.xlu0 %v4352_v61 }
 0x47a   :  { %4371 = vadd.xlane.f32.xlu1 %v4370_v44 }
 0x47c   :  { %4365 = vadd.xlane.f32.xlu0 %v4364_v62 }
 0x480   :  { %4377 = vadd.xlane.f32.xlu0 %v4376_v20 }
 0x4ed   :  { %v4339_v11 = vpop.xlane.xlu0 %4338 }
 0x4ee   :  { %v4383_v5 = vmul.f32 0.5, %v4339_v11 }
 0x4ef   :  { %v4345_v51 = vpop.xlane.xlu1 %4344 }
 0x4f0   :  { %5969 = vtanh.f32 %v4383_v5  ;;  %v4385_v36 = vmul.f32 0.5, %v4345_v51 }
 0x4f1   :  { %v4369_v60 = vpop.xlane.xlu0 %4368 }
 0x4f2   :  { %5971 = vtanh.f32 %v4385_v36  ;;  %v4393_v19 = vmul.f32 0.5, %v4369_v60 }
 0x4f3   :  { %v4363_v15 = vpop.xlane.xlu1 %4362 }
 0x4f4   :  { %5973 = vtanh.f32 %v4393_v19  ;;  %v4391_v26 = vmul.f32 0.5, %v4363_v15 }
 0x4f5   :  { %v4351_v32 = vpop.xlane.xlu0 %4350 }
 0x4f6   :  { %5975 = vtanh.f32 %v4391_v26  ;;  %v4387_v25 = vmul.f32 0.5, %v4351_v32 }
 0x4f7   :  { %v4375_v21 = vpop.xlane.xlu1 %4374 }
 0x4f8   :  { %5977 = vtanh.f32 %v4387_v25  ;;  %v4395_v49 = vmul.f32 0.5, %v4375_v21 }
 0x4f9   :  { %v4357_v28 = vpop.xlane.xlu0 %4356 }
 0x4fa   :  { %v5970_v10 = vpop.eup %5969  ;;  %5979 = vtanh.f32 %v4395_v49  ;;  %v4389_v33 = vmul.f32 0.5, %v4357_v28 }
 0x4fb   :  { %v4415_v52 = vadd.f32 1.0, %v5970_v10 }
 0x4fc   :  { %v5972_v2 = vpop.eup %5971  ;;  %5981 = vtanh.f32 %v4389_v33 }
 0x4fd   :  { %v4431_v30 = vmul.f32 0.5, %v4415_v52  ;;  %v4417_v17 = vadd.f32 1.0, %v5972_v2  ;;  %v4381_v34 = vpop.xlane.xlu0 %4380 }
 0x4fe   :  { %v5974_v55 = vpop.eup %5973  ;;  %v4397_v59 = vmul.f32 0.5, %v4381_v34 }
 0x4ff   :  { %v4447_v0 = vmul.f32 %v4431_v30, %v8024_v38  ;;  %v4433_v13 = vmul.f32 0.5, %v4417_v17  ;;  %v4425_v1 = vadd.f32 1.0, %v5974_v55 }
 0x500   :  { %v5976_v58 = vpop.eup %5975  ;;  %5983 = vtanh.f32 %v4397_v59 }
 0x501   :  { %v4469_v45 = vsel %vm297_vm0, %v4447_v0, 0.0  ;;  %v4449_v61 = vmul.f32 %v4433_v13, %v9638_v56  ;;  %v4441_v22 = vmul.f32 0.5, %v4425_v1  ;;  %v4423_v41 = vadd.f32 1.0, %v5976_v58 }
 0x502   :  { %v5978_v44 = vpop.eup %5977  ;;  %v4470_v62 = vrot.slane %v4469_v45, 4 }
 0x503   :  { %v4483_v54 = vsel %vm297_vm0, %v4449_v61, 0.0  ;;  %v4457_v20 = vmul.f32 %v4441_v22, %v8367_v3  ;;  %v4439_v7 = vmul.f32 0.5, %v4423_v41  ;;  %v4419_v29 = vadd.f32 1.0, %v5978_v44 }
 0x504   :  { %v5980_v23 = vpop.eup %5979  ;;  %v4484_v38 = vrot.slane %v4483_v54, 4  ;;  %v4471_v53 = vadd.f32 %v4470_v62, %v4469_v45 }
 0x505   :  { %v4539_v8 = vsel %vm297_vm0, %v4457_v20, 0.0  ;;  %v4455_v24 = vmul.f32 %v4439_v7, %v8363_v40  ;;  %v4435_v48 = vmul.f32 0.5, %v4419_v29  ;;  %v4427_v35 = vadd.f32 1.0, %v5980_v23 }
 0x506   :  { %v5982_v56 = vpop.eup %5981  ;;  %v4485_v46 = vadd.f32 %v4484_v38, %v4483_v54  ;;  %v4540_v5 = vrot.slane %v4539_v8, 4  ;;  %v4472_v40 = vrot.slane %v4471_v53, 2 }
 0x507   :  { %v4525_v16 = vsel %vm297_vm0, %v4455_v24, 0.0  ;;  %v4451_v57 = vmul.f32 %v4435_v48, %v9639_v6  ;;  %v4443_v39 = vmul.f32 0.5, %v4427_v35  ;;  %v4421_v11 = vadd.f32 1.0, %v5982_v56 }
 0x508   :  { %v4486_v3 = vrot.slane %v4485_v46, 2  ;;  %v4526_v51 = vrot.slane %v4525_v16, 4  ;;  %v4541_v6 = vadd.f32 %v4540_v5, %v4539_v8  ;;  %v4473_v2 = vadd.f32 %v4472_v40, %v4471_v53 }
 0x509   :  { %v4497_v36 = vsel %vm297_vm0, %v4451_v57, 0.0  ;;  %v4459_v60 = vmul.f32 %v4443_v39, %v8537_v9  ;;  %v4437_v19 = vmul.f32 0.5, %v4421_v11 }
 0x50a   :  { %v4527_v15 = vadd.f32 %v4526_v51, %v4525_v16  ;;  %v4498_v26 = vrot.slane %v4497_v36, 4  ;;  %v5984_v21 = vpop.eup %5983  ;;  %v4487_v49 = vadd.f32 %v4486_v3, %v4485_v46  ;;  %v4542_v59 = vrot.slane %v4541_v6, 2 }
 0x50b   :  { %v4553_v32 = vsel %vm297_vm0, %v4459_v60, 0.0  ;;  %v4453_v25 = vmul.f32 %v4437_v19, %v9640_v63  ;;  %v4429_v34 = vadd.f32 1.0, %v5984_v21  ;;  %v4474_v45 = vrot.slane %v4473_v2, 1  ;;  %v4798_v21 = vld [vmem:[%s8880_s11] sm:$0xff] }
 0x50c   :  { %v4528_v28 = vrot.slane %v4527_v15, 2  ;;  %v4499_v10 = vadd.f32 %v4498_v26, %v4497_v36  ;;  %v4554_v33 = vrot.slane %v4553_v32, 4  ;;  %v4488_v55 = vrot.slane %v4487_v49, 1 }
 0x50d   :  { %v4511_v52 = vsel %vm297_vm0, %v4453_v25, 0.0  ;;  %v4445_v63 = vmul.f32 0.5, %v4429_v34  ;;  %v4543_v62 = vadd.f32 %v4542_v59, %v4541_v6  ;;  %v4475_v38 = vadd.f32 %v4474_v45, %v4473_v2  ;;  %v4815_v25 = vld [vmem:[%s8880_s11 + $0x88] sm:$0xff]  ;;  %v4816_v6 = vld [vmem:[%s8880_s11 + $0x90] sm:$0xff]  ;;  %v4802_v59 = vld [vmem:[%s8880_s11 + $0x20] sm:$0xff] }
 0x50e   :  { %v4512_v30 = vrot.slane %v4511_v52, 4  ;;  %v4500_v17 = vrot.slane %v4499_v10, 2  ;;  %v4555_v9 = vadd.f32 %v4554_v33, %v4553_v32  ;;  %v4529_v13 = vadd.f32 %v4528_v28, %v4527_v15  ;;  %v4814_v32 = vld [vmem:[%s8880_s11 + $0x80] sm:$0xff]  ;;  %v4817_v33 = vld [vmem:[%s8880_s11 + $0x98] sm:$0xff]  ;;  %v4800_v2 = vld [vmem:[%s8880_s11 + $0x10] sm:$0xff] }
 0x50f   :  { %v4461_v41 = vmul.f32 %v4445_v63, %v8553_v31  ;;  %v4489_v44 = vadd.f32 %v4488_v55, %v4487_v49  ;;  %v4544_v35 = vrot.slane %v4543_v62, 1  ;;  %v6037_v15 = vmov 0.0|0.0   ;;  %v4799_v49 = vld [vmem:[%s8880_s11 + $0x8] sm:$0xff]  ;;  %v4804_v45 = vld [vmem:[%s8880_s11 + $0x30] sm:$0xff] }
 0x510   :  { %v4513_v0 = vadd.f32 %v4512_v30, %v4511_v52  ;;  %v4501_v1 = vadd.f32 %v4500_v17, %v4499_v10  ;;  %v4556_v58 = vrot.slane %v4555_v9, 2  ;;  %v4530_v20 = vrot.slane %v4529_v13, 1  ;;  %5529 = vmatprep.subr.bf16.mxu1 %v6037_v15  ;;  %v4801_v30 = vld [vmem:[%s8880_s11 + $0x18] sm:$0xff]  ;;  %v4818_v17 = vld [vmem:[%s8880_s11 + $0xa0] sm:$0xff] }
 0x511   :  { %v4567_v23 = vsel %vm297_vm0, %v4461_v41, 0.0  ;;  %v4598_v48 = vsel %vm4023_vm13, %v4489_v44, %v4475_v38  ;;  %v4545_v3 = vadd.f32 %v4544_v35, %v4543_v62  ;;  %v5535_v28 = vpack.c.bf16 %v4815_v25, %v4814_v32  ;;  %v4823_v41 = vld [vmem:[%s8880_s11 + $0xc8] sm:$0xff] }
 0x512   :  { %v4514_v61 = vrot.slane %v4513_v0, 2  ;;  %v4502_v22 = vrot.slane %v4501_v1, 1  ;;  %v4557_v29 = vadd.f32 %v4556_v58, %v4555_v9  ;;  %v4568_v24 = vrot.slane %v4567_v23, 4  ;;  %v4819_v9 = vld [vmem:[%s8880_s11 + $0xa8] sm:$0xff] }
 0x513   :  { %v4531_v46 = vadd.f32 %v4530_v20, %v4529_v13  ;;  %v5537_v10 = vpack.c.bf16 %v4799_v49, %v4798_v21  ;;  %v5539_v52 = vpack.c.bf16 %v4817_v33, %v4816_v6  ;;  %5536 = vmatprep.subr.bf16.mxu0 %v5535_v28  ;;  %v5541_v34 = vpack.c.bf16 %v4801_v30, %v4800_v2  ;;  %v4820_v13 = vld [vmem:[%s8880_s11 + $0xb0] sm:$0xff]  ;;  %v4807_v20 = vld [vmem:[%s8880_s11 + $0x48] sm:$0xff] }
 0x514   :  { %v4515_v54 = vadd.f32 %v4514_v61, %v4513_v0  ;;  %v4503_v7 = vadd.f32 %v4502_v22, %v4501_v1  ;;  %v4569_v53 = vadd.f32 %v4568_v24, %v4567_v23  ;;  %v4558_v31 = vrot.slane %v4557_v29, 1  ;;  %v4803_v0 = vld [vmem:[%s8880_s11 + $0x28] sm:$0xff]  ;;  %v4821_v1 = vld [vmem:[%s8880_s11 + $0xb8] sm:$0xff]  ;;  %v4822_v22 = vld [vmem:[%s8880_s11 + $0xc0] sm:$0xff] }
 0x515   :  { %5538 = vmatpush3.bf16.msra.mxu0 %v5537_v10  ;;  %v5543_v55 = vpack.c.bf16 %v4819_v9, %v4818_v17  ;;  %v5545_v58 = vpack.c.bf16 %v4803_v0, %v4802_v59  ;;  %v5547_v63 = vpack.c.bf16 %v4821_v1, %v4820_v13  ;;  %v4805_v61 = vld [vmem:[%s8880_s11 + $0x38] sm:$0xff]  ;;  %v5551_v62 = vpack.c.bf16 %v4823_v41, %v4822_v22  ;;  %v4827_v35 = vld [vmem:[%s8880_s11 + $0xe8] sm:$0xff] }
 0x516   :  { %v4516_v8 = vrot.slane %v4515_v54, 1  ;;  %v4599_v16 = vsel %vm4026_vm2, %v4503_v7, %v4598_v48  ;;  %v4570_v39 = vrot.slane %v4569_v53, 2  ;;  %v4559_v51 = vadd.f32 %v4558_v31, %v4557_v29  ;;  %5540 = vmatprep.subr.bf16.mxu0 %v5539_v52  ;;  %v4824_v7 = vld [vmem:[%s8880_s11 + $0xd0] sm:$0xff]  ;;  %v4825_v29 = vld [vmem:[%s8880_s11 + $0xd8] sm:$0xff]  ;;  %v4826_v48 = vld [vmem:[%s8880_s11 + $0xe0] sm:$0xff] }
 0x517   :  { %v5549_v44 = vpack.c.bf16 %v4805_v61, %v4804_v45  ;;  %v5555_v38 = vpack.c.bf16 %v4825_v29, %v4824_v7  ;;  %v4809_v24 = vld [vmem:[%s8880_s11 + $0x58] sm:$0xff] }
 0x518   :  { %v4517_v56 = vadd.f32 %v4516_v8, %v4515_v54  ;;  %v4571_v5 = vadd.f32 %v4570_v39, %v4569_v53  ;;  %v4806_v54 = vld [vmem:[%s8880_s11 + $0x40] sm:$0xff]  ;;  %v4808_v8 = vld [vmem:[%s8880_s11 + $0x50] sm:$0xff]  ;;  %v5559_v53 = vpack.c.bf16 %v4827_v35, %v4826_v48  ;;  %v4336_v39 = vpop.xlane.xlu1 %4335 }
 0x519   :  { %5542 = vmatpush3.bf16.msra.mxu0 %v5541_v34  ;;  %v5553_v23 = vpack.c.bf16 %v4807_v20, %v4806_v54 }
 0x51a   :  { %v4600_v57 = vsel %vm4029_vm4, %v4517_v56, %v4599_v16  ;;  %v4572_v36 = vrot.slane %v4571_v5, 1  ;;  %5544 = vmatprep.subr.bf16.mxu0 %v5543_v55  ;;  %v5557_v56 = vpack.c.bf16 %v4809_v24, %v4808_v8  ;;  %v4811_v16 = vld [vmem:[%s8880_s11 + $0x68] sm:$0xff] }
 0x51b   :  { %v4601_v11 = vsel %vm4032_vm5, %v4531_v46, %v4600_v57  ;;  %v4810_v46 = vld [vmem:[%s8880_s11 + $0x60] sm:$0xff]  ;;  %v4342_v57 = vpop.xlane.xlu0 %4341 }
 0x51c   :  { %v4602_v60 = vsel %vm4035_vm6, %v4545_v3, %v4601_v11  ;;  %v4573_v40 = vadd.f32 %v4572_v36, %v4571_v5  ;;  %v5561_v31 = vpack.c.bf16 %v4811_v16, %v4810_v46  ;;  %v4348_v3 = vpop.xlane.xlu1 %4347  ;;  %v4384_v5 = vmul.f32 0.5, %v4342_v57 }
 0x51d   :  { %v4603_v19 = vsel %vm4038_vm7, %v4559_v51, %v4602_v60  ;;  %5546 = vmatpush3.bf16.msra.mxu0 %v5545_v58  ;;  %v4382_v51 = vmul.f32 0.5, %v4336_v39 }
 0x51e   :  { %v8681_v26 = vsel %vm4041_vm8, %v4573_v40, %v4603_v19  ;;  %5548 = vmatprep.subr.bf16.mxu0 %v5547_v63  ;;  %5985 = vtanh.f32 %v4384_v5  ;;  %v4386_v40 = vmul.f32 0.5, %v4348_v3 }
 0x51f   :  { %4766 = vrot.lane.b32.xlu0 %v8681_v26, %s6038_s9  ;;  %4605 = vrot.lane.b32.xlu1 %v8681_v26, %s6039_s19  ;;  %v4354_v11 = vpop.xlane.xlu0 %4353  ;;  %5987 = vtanh.f32 %v4382_v51 }
 0x520   :  { %v4360_v60 = vpop.xlane.xlu1 %4359  ;;  %v4388_v19 = vmul.f32 0.5, %v4354_v11 }
 0x521   :  { %5550 = vmatpush3.bf16.msra.mxu0 %v5549_v44  ;;  %v4390_v25 = vmul.f32 0.5, %v4360_v60 }
 0x522   :  { %5552 = vmatprep.subr.bf16.mxu0 %v5551_v62  ;;  %5989 = vtanh.f32 %v4388_v19 }
 0x523   :  { %4775 = vrot.lane.b32.xlu0 %v8681_v26, %s6040_s29  ;;  %4769 = vrot.lane.b32.xlu1 %v8681_v26, %s6041_s2  ;;  %v4366_v36 = vpop.xlane.xlu0 %4365  ;;  %5991 = vtanh.f32 %v4386_v40 }
 0x524   :  { %v4392_v32 = vmul.f32 0.5, %v4366_v36  ;;  %v4372_v49 = vpop.xlane.xlu1 %4371 }
 0x525   :  { %5554 = vmatpush3.bf16.msra.mxu0 %v5553_v23  ;;  %v4394_v28 = vmul.f32 0.5, %v4372_v49 }
 0x526   :  { %5556 = vmatprep.subr.bf16.mxu0 %v5555_v38  ;;  %5993 = vtanh.f32 %v4392_v32 }
 0x527   :  { %4781 = vrot.lane.b32.xlu0 %v8681_v26, %s6042_s8  ;;  %4772 = vrot.lane.b32.xlu1 %v8681_v26, %s6043_s1  ;;  %v4378_v21 = vpop.xlane.xlu0 %4377  ;;  %5995 = vtanh.f32 %v4390_v25 }
 0x528   :  { %v4396_v6 = vmul.f32 0.5, %v4378_v21  ;;  %v5986_v10 = vpop.eup %5985 }
 0x529   :  { %5558 = vmatpush3.bf16.msra.mxu0 %v5557_v56  ;;  %v5988_v33 = vpop.eup %5987  ;;  %v4416_v52 = vadd.f32 1.0, %v5986_v10 }
 0x52a   :  { %5560 = vmatprep.subr.bf16.mxu0 %v5559_v53  ;;  %5997 = vtanh.f32 %v4396_v6  ;;  %v4414_v17 = vadd.f32 1.0, %v5988_v33 }
 0x52b   :  { %4778 = vrot.lane.b32.xlu1 %v8681_v26, %s6044_s25  ;;  %5999 = vtanh.f32 %v4394_v28  ;;  %v4432_v9 = vmul.f32 0.5, %v4416_v52 }
 0x52c   :  { %v5990_v2 = vpop.eup %5989  ;;  %v4430_v13 = vmul.f32 0.5, %v4414_v17 }
 0x52d   :  { %5562 = vmatpush3.bf16.msra.mxu0 %v5561_v31  ;;  %v5992_v30 = vpop.eup %5991  ;;  %v4420_v34 = vadd.f32 1.0, %v5990_v2  ;;  %v4448_v1 = vmul.f32 %v4432_v9, %v9643_v27 }
 0x52e   :  { %v4418_v59 = vadd.f32 1.0, %v5992_v30  ;;  %v4446_v44 = vmul.f32 %v4430_v13, %v9641_v37 }
 0x52f   :  { %v4436_v58 = vmul.f32 0.5, %v4420_v34  ;;  %v4476_v62 = vsel %vm297_vm0, %v4448_v1, 0.0 }
 0x530   :  { %v5994_v55 = vpop.eup %5993  ;;  %v4434_v61 = vmul.f32 0.5, %v4418_v59  ;;  %v4462_v27 = vsel %vm297_vm0, %v4446_v44, 0.0  ;;  %v4477_v8 = vrot.slane %v4476_v62, 4 }
 0x531   :  { %v5996_v0 = vpop.eup %5995  ;;  %v4424_v63 = vadd.f32 1.0, %v5994_v55  ;;  %v4452_v54 = vmul.f32 %v4436_v58, %v9644_v47  ;;  %v4463_v56 = vrot.slane %v4462_v27, 4 }
 0x532   :  { %v4422_v22 = vadd.f32 1.0, %v5996_v0  ;;  %v4450_v29 = vmul.f32 %v4434_v61, %v9642_v14  ;;  %v4478_v46 = vadd.f32 %v4477_v8, %v4476_v62 }
 0x533   :  { %v4440_v20 = vmul.f32 0.5, %v4424_v63  ;;  %v4504_v24 = vsel %vm297_vm0, %v4452_v54, 0.0  ;;  %v4464_v39 = vadd.f32 %v4463_v56, %v4462_v27  ;;  %v4611_v56 = vld [vmem:[%s8879_s10 + $0x10] sm:$0xff] }
 0x534   :  { %v5998_v45 = vpop.eup %5997  ;;  %v4438_v23 = vmul.f32 0.5, %v4422_v22  ;;  %v4490_v37 = vsel %vm297_vm0, %v4450_v29, 0.0  ;;  %v4505_v16 = vrot.slane %v4504_v24, 4 }
 0x535   :  { %v6000_v41 = vpop.eup %5999  ;;  %v4428_v7 = vadd.f32 1.0, %v5998_v45  ;;  %v4456_v48 = vmul.f32 %v4440_v20, %v8534_v18  ;;  %v4491_v31 = vrot.slane %v4490_v37, 4  ;;  %v4479_v18 = vrot.slane %v4478_v46, 2 }
 0x536   :  { %v4426_v38 = vadd.f32 1.0, %v6000_v41  ;;  %v4454_v53 = vmul.f32 %v4438_v23, %v8370_v12  ;;  %v4506_v5 = vadd.f32 %v4505_v16, %v4504_v24  ;;  %v4465_v19 = vrot.slane %v4464_v39, 2 }
 0x537   :  { %v4444_v35 = vmul.f32 0.5, %v4428_v7  ;;  %v4532_v14 = vsel %vm297_vm0, %v4456_v48, 0.0  ;;  %v4492_v36 = vadd.f32 %v4491_v31, %v4490_v37  ;;  %v4480_v32 = vadd.f32 %v4479_v18, %v4478_v46  ;;  %v4614_v37 = vld [vmem:[%s8879_s10 + $0x28] sm:$0xff]  ;;  %v4829_v18 = vld [vmem:[%s8880_s11 + $0xf8] sm:$0xff] }
 0x538   :  { %v4442_v47 = vmul.f32 0.5, %v4426_v38  ;;  %v4518_v11 = vsel %vm297_vm0, %v4454_v53, 0.0  ;;  %v4533_v51 = vrot.slane %v4532_v14, 4  ;;  %v4507_v25 = vrot.slane %v4506_v5, 2 }
 0x539   :  { %v4460_v57 = vmul.f32 %v4444_v35, %v8555_v50  ;;  %v4519_v60 = vrot.slane %v4518_v11, 4  ;;  %v4493_v50 = vrot.slane %v4492_v36, 2  ;;  %v4466_v10 = vadd.f32 %v4465_v19, %v4464_v39 }
 0x53a   :  { %v4458_v3 = vmul.f32 %v4442_v47, %v8543_v42  ;;  %v4534_v21 = vadd.f32 %v4533_v51, %v4532_v14  ;;  %v4481_v33 = vrot.slane %v4480_v32, 1  ;;  %v4508_v42 = vadd.f32 %v4507_v25, %v4506_v5  ;;  %v4617_v14 = vld [vmem:[%s8879_s10 + $0x40] sm:$0xff]  ;;  %v4812_v5 = vld [vmem:[%s8880_s11 + $0x70] sm:$0xff] }
 0x53b   :  { %v4560_v12 = vsel %vm297_vm0, %v4460_v57, 0.0  ;;  %v4520_v6 = vadd.f32 %v4519_v60, %v4518_v11  ;;  %v4494_v30 = vadd.f32 %v4493_v50, %v4492_v36  ;;  %v4467_v34 = vrot.slane %v4466_v10, 1  ;;  %v4620_v57 = vld [vmem:[%s8879_s10 + $0x58] sm:$0xff] }
 0x53c   :  { %v4546_v40 = vsel %vm297_vm0, %v4458_v3, 0.0  ;;  %v4561_v49 = vrot.slane %v4560_v12, 4  ;;  %v4535_v52 = vrot.slane %v4534_v21, 2  ;;  %v4482_v55 = vadd.f32 %v4481_v33, %v4480_v32  ;;  %v4828_v3 = vld [vmem:[%s8880_s11 + $0xf0] sm:$0xff]  ;;  %v4813_v36 = vld [vmem:[%s8880_s11 + $0x78] sm:$0xff] }
 0x53d   :  { %v4547_v28 = vrot.slane %v4546_v40, 4  ;;  %v4521_v17 = vrot.slane %v4520_v6, 2  ;;  %v4509_v59 = vrot.slane %v4508_v42, 1  ;;  %v4495_v1 = vrot.slane %v4494_v30, 1 }
 0x53e   :  { %v4562_v2 = vadd.f32 %v4561_v49, %v4560_v12  ;;  %v4536_v0 = vadd.f32 %v4535_v52, %v4534_v21  ;;  %v4468_v45 = vadd.f32 %v4467_v34, %v4466_v10  ;;  %v5530_v46 = vpack.c.bf16 %v4614_v37, %v4611_v56  ;;  %v4909_v34 = vld [vmem:[%s8882_s13] sm:$0xff] }
 0x53f   :  { %v4548_v9 = vadd.f32 %v4547_v28, %v4546_v40  ;;  %v4522_v58 = vadd.f32 %v4521_v17, %v4520_v6  ;;  %v4510_v61 = vadd.f32 %v4509_v59, %v4508_v42  ;;  %v4496_v62 = vadd.f32 %v4495_v1, %v4494_v30  ;;  %v4912_v59 = vld [vmem:[%s8883_s14 + $0x8] sm:$0xff] }
 0x540   :  { %v4563_v13 = vrot.slane %v4562_v2, 2  ;;  %v4537_v22 = vrot.slane %v4536_v0, 1  ;;  %v4582_v44 = vsel %vm4023_vm13, %v4482_v55, %v4468_v45  ;;  %v5533_v11 = vpack.c.bf16 %v4620_v57, %v4617_v14  ;;  %v4911_v55 = vld [vmem:[%s8883_s14] sm:$0xff]  ;;  %4920 = vperm.xlu0 %5962, %v4912_v59  }
 0x541   :  { %v4549_v63 = vrot.slane %v4548_v9, 2  ;;  %v4523_v54 = vrot.slane %v4522_v58, 1  ;;  %v4583_v7 = vsel %vm4026_vm2, %v4496_v62, %v4582_v44  ;;  %v5563_v51 = vpack.c.bf16 %v4829_v18, %v4828_v3  ;;  %4915 = vperm.xlu1 %5961, %v4911_v55  }
 0x542   :  { %v4564_v41 = vadd.f32 %v4563_v13, %v4562_v2  ;;  %v4538_v29 = vadd.f32 %v4537_v22, %v4536_v0  ;;  %v4584_v38 = vsel %vm4029_vm4, %v4510_v61, %v4583_v7  ;;  %v5565_v60 = vpack.c.bf16 %v4813_v36, %v4812_v5  ;;  %v5010_v0 = vld [vmem:[#allocation2] sm:$0x1] }
 0x543   :  { %v4550_v20 = vadd.f32 %v4549_v63, %v4548_v9  ;;  %v4524_v27 = vadd.f32 %v4523_v54, %v4522_v58  ;;  %5564 = vmatprep.subr.bf16.mxu0 %v5563_v51  ;;  %vm4788_vm13 = vcmask 523264   ;;  %vm4794_vm2 = vcmask 916480   ;;  %v5184_v63 = vld [vmem:[%s8881_s12] ss:$0 sm:$0xff] }
 0x544   :  { %v4565_v23 = vrot.slane %v4564_v41, 1  ;;  %5566 = vmatpush3.bf16.msra.mxu0 %v5565_v60 }
 0x545   :  { %v4551_v8 = vrot.slane %v4550_v20, 1  ;;  %v4585_v24 = vsel %vm4032_vm5, %v4524_v27, %v4584_v38  ;;  %5013 = vperm.xlu1 %5961, %v5010_v0  }
 0x546   :  { %v4566_v48 = vadd.f32 %v4565_v23, %v4564_v41  ;;  %v4586_v35 = vsel %vm4035_vm6, %v4538_v29, %v4585_v24  ;;  %v4910_v41 = vld [vmem:[%s8882_s13 + $0x8] sm:$0xff]  ;;  %s6046_s13 = smov [#allocation3]  }
 0x547   :  { %v4552_v53 = vadd.f32 %v4551_v8, %v4550_v20  ;;  %v5009_v8 = vld [vmem:[%s8884_s15] sm:$0x1]  ;;  %s5105_s22 = sshll.u32 %s6046_s13, 4  ;;  %s5106_s22 = int_to_ptr.vmem [resolvable:$true] %s5105_s22 }
 0x548   :  { %s6003_s23 = scalar_lea.vmem %s5106_s22, 16  ;;  %s6007_s15 = scalar_lea.vmem %s5106_s22, 32 }
 0x549   :  { %v4587_v47 = vsel %vm4038_vm7, %v4552_v53, %v4586_v35  ;;  %p6004_p0 = scmp.ne.s32.totalorder %s5106_s22, %s6003_s23  ;;  %p6008_p1 = scmp.lt.s32.totalorder %s5106_s22, %s5106_s22 }
 0x54a   :  { %v4588_v31 = vsel %vm4041_vm8, %v4566_v48, %v4587_v47  ;;  %p6009_p2 = scmp.lt.s32.totalorder %s6007_s15, %s6003_s23 }
 0x54c   :  { %p6010_p3 = por %p6009_p2, %p6008_p1 }
 0x54e   :  { %p6011_p4 = pnand %p6010_p3, %p6004_p0 }
 0x591   :  { %v4606_v16 = vpop.permute.xlu1 %4605  ;;  %v4767_v19 = vpop.permute.xlu0 %4766 }
 0x592   :  { %v4608_v39 = vsel %vm297_vm0, %v4588_v31, %v4606_v16  ;;  %v4784_v40 = vsel %vm297_vm0, %v8681_v26, %v4606_v16 }
 0x593   :  { %5182 = vmatmul.mubr.msk.f32.vlgmr.msra.gmra.mrb[18].mxu1 %vm1814_vm1, %v4608_v39  ;;  %v4785_v25 = vsel %vm1814_vm1, %v4784_v40, %v4767_v19 }
 0x594   :  { %5531 = vmatpush3.bf16.msra.mxu1 %v5530_v46  ;;  %5482 = vmatprep.mubr.msk.f32.mxu1 %vm6045_vm11, %v9537_v4 }
 0x595   :  { %5532 = vmatprep.subr.bf16.mxu1 %v6037_v15  ;;  %v4770_v12 = vpop.permute.xlu1 %4769  ;;  %v4776_v49 = vpop.permute.xlu0 %4775 }
 0x596   :  { %v4787_v21 = vsel %vm4786_vm12, %v4785_v25, %v4770_v12 }
 0x598   :  { %5534 = vmatpush3.bf16.msra.mxu1 %v5533_v11 }
 0x599   :  { %v4773_v32 = vpop.permute.xlu1 %4772  ;;  %v4782_v33 = vpop.permute.xlu0 %4781 }
 0x59a   :  { %v4789_v50 = vsel %vm4788_vm13, %v4787_v21, %v4773_v32 }
 0x59b   :  { %5483 = vmatmul.mubr.msk.f32.vlgmr.msra.gmra.mrb[20].mxu1 %vm1814_vm1, %v4608_v39  ;;  %v4791_v28 = vsel %vm4790_vm14, %v4789_v50, %v4776_v49  ;;  %vm5097_vm1 = vcmask 57344  }
 0x59c   :  { %5487 = vmatprep.mubr.msk.f32.mxu1 %vm297_vm0, %v4909_v34 }
 0x59d   :  { %v4779_v6 = vpop.permute.xlu1 %4778 }
 0x59e   :  { %v4793_v10 = vsel %vm4792_vm15, %v4791_v28, %v4779_v6 }
 0x59f   :  { %v4795_v52 = vsel %vm4794_vm2, %v4793_v10, %v4782_v33 }
 0x5bf   :  { %v4921_v44 = vpop.permute.xlu0 %4920 }
 0x5c0   :  { %v4916_v54 = vpop.permute.xlu1 %4915 }
 0x666   :  { %v4690_v42 = vpop.f32.mrb[18].mxu1 }
 0x667   :  { %v4796_v2 = vmul.f32 %v4795_v52, %v4690_v42  ;;  %v4692_v30 = vpop.f32.mrb[19].mxu1 }
 0x668   :  { %v4797_v26 = vmul.f32 %v4795_v52, %v4692_v30 }
 0x66a   :  { %4894 = vmatprep.mubr.f32.mxu0 %v4797_v26 }
 0x66b   :  { %4895 = vmatmul.mubr.f32.vlgmr.msra.gmra.mrb[32].mxu0 %v4796_v2 }
 0x66e   :  { %v4761_v17 = vpop.f32.mrb[20].mxu1 }
 0x66f   :  { %v5484_v9 = vpop.f32.mrb[21].mxu1 }
 0x73e   :  { %v5366_v13 = vpop.f32.mrb[32].mxu0 }
 0x73f   :  { %v5367_v1 = vpop.f32.mrb[33].mxu0 }
 0x740   :  { %v5368_v58 = vadd.f32 %v5367_v1, %v5366_v13 }
 0x742   :  { %v4897_v45 = vadd.f32 %v5368_v58, %v4761_v17 }
 0x744   :  { %v4907_v61 = vadd.f32 %v5184_v63, %v4897_v45 }
 0x746   :  { %v4908_v22 = vmax.f32 %v4907_v61, 0.0 }
 0x748   :  { %5485 = vmatprep.subr.msk.mxu1 %vm297_vm0, %v4908_v22 }
 0x749   :  { %5486 = vmatpush3.xpose.msk.msra.mxu1 %vm297_vm0, %v4908_v22 }
 0x74a   :  { %5567 = vmatprep.subr.bf16.mxu1 %v6037_v15  ;;  %v5014_v15 = vpop.permute.xlu1 %5013 }
 0x74b   :  { %v5019_v24 = vrot.slane %v5014_v15, %v6414_v43 }
 0x74c   :  { %5488 = vmatmul.mubr.msk.f32.vlgmr.msra.gmra.mrb[22].mxu1 %vm297_vm0, %v4910_v41 }
 0x74d   :  { %5494 = vmatprep.mubr.msk.f32.mxu1 %vm6045_vm11, %v9537_v4 }
 0x81f   :  { %v5489_v62 = vpop.f32.mrb[22].mxu1 }
 0x820   :  { %v5004_v20 = vadd.f32 %v5489_v62, %v4921_v44  ;;  %v4998_v7 = vpop.f32.mrb[23].mxu1 }
 0x821   :  { %v4999_v29 = vadd.f32 %v4998_v7, %v4916_v54 }
 0x822   :  { %v5008_v23 = vmax.f32 %v5004_v20, 0.0 }
 0x823   :  { %v5007_v38 = vmax.f32 %v4999_v29, 0.0 }
 0x825   :  { %v5568_v27 = vpack.c.bf16 %v5008_v23, %v5007_v38 }
 0x827   :  { %5569 = vmatpush3.bf16.msra.mxu1 %v5568_v27 }
 0x82a   :  { %5495 = vmatmul.mubr.msk.f32.vlgmr.msra.gmra.mrb[24].mxu1 %vm297_vm0, %v5009_v8 }
 0x8fd   :  { %v5089_v4 = vpop.f32.mrb[24].mxu1 }
 0x8fe   :  { %v5090_v48 = vadd.f32 %v5089_v4, %v5019_v24  ;;  %v5496_v35 = vpop.f32.mrb[25].mxu1 }
 0x900   :  { %v5093_v56 = vmul.f32 0.5, %v5090_v48 }
 0x902   :  { %6001 = vtanh.f32 %v5093_v56 }
 0x90c   :  { %v6002_v37 = vpop.eup %6001 }
 0x90d   :  { %v5095_v53 = vadd.f32 1.0, %v6002_v37 }
 0x90f   :  { %v5096_v47 = vmul.f32 0.5, %v5095_v53 }
 0x911   :  { %5098 = vst.msk [vmem:[#allocation3] sm:$0x1] %vm5097_vm1, %v5096_v47 }
 0x912   :  { %6014 = shalt.err (!%p6011_p4)
}
 0x913   :  { %s6015_s26 = scalar_lea.hbm %s8886_s17, 16 }
 0x914   :  { %p6016_p5 = scmp.ne.s32.totalorder %s8886_s17, %s6015_s26  ;;  %p6019_p6 = scmp.lt.u32.totalorder %s6015_s26, %s8886_s17 }
 0x916   :  { %p6021_p7 = pnand %p6019_p6, %p6016_p5 }
 0x918   :  { %6024 = shalt.err (!%p6021_p7)
}
 0x919   :  { %5108 = dma.vmem_to_hbm [thread:$0]  %s5106_s22, 16, %s8886_s17, [#allocation4]  }
 0x91a   :  { %6025 = dma.done.wait [#allocation4], 16  }
 0x91b   :  { %6026 = vsyncadd [#allocation4], 4294967280 }
 0x91c   :  { %5112 = vsyncpa [#allocation4], 1 }

</bundles_post_ra>
